<compile_context>
chip_gen: v6e
topology: v6e:2x2x1
jax: 0.10.0
libtpu: 0.0.40
codegen_flags: <defaults>
</compile_context>

<pallas_src>
import jax
import jax.numpy as jnp
from jax.experimental import pallas as pl
from jax.experimental.pallas import tpu as pltpu

_GP = 128  # padded per-gate slab width (lane-aligned)


def _vmem():
    return pl.BlockSpec(memory_space=pltpu.MemorySpace.VMEM)


# -----------------------------------------------------------------------------
# Single fused kernel: bi-GRU #1 recurrence + bi-GRU #2 recurrence + FC head
# -----------------------------------------------------------------------------
def fused_encoder_kernel(gi1_ref, m1_ref, wr1_ref, bhn1_ref, h01_ref,
                         gi2_ref, m2_ref, wr2_ref, bhn2_ref, h02_ref,
                         w1a_ref, w1b_ref, b1_ref, w2_ref, b2_ref,
                         out_ref):
    def run_bigru(gi_ref, m_ref, wr_ref, bhn_ref, h0_ref):
        T = gi_ref.shape[0]
        B = gi_ref.shape[1]
        H2 = h0_ref.shape[1]                       # 2*H (packed [fwd | bwd] hidden)
        wr = wr_ref[...]                           # (2H, 3*128) block-diag, col-padded
        # hoisted ONCE (JAX does not CSE per-iteration implicit broadcasts)
        bhn = jnp.broadcast_to(bhn_ref[...], (B, _GP))
        h = h0_ref[...]                            # (B, 2H)
        # T is small & static: fully unroll (scheduler visibility across steps).
        for t in range(T):
            # only the small recurrent matmul lives in the loop; contraction is
            # exactly 2H so no padded weight rows are pushed to the MXU.
            gh = jnp.dot(h, wr, preferred_element_type=jnp.float32)   # (B, 384)
            gi = gi_ref[t]                                            # (B, 384)
            # gate slabs are whole 128-lane vregs: offsets 0 / 128 / 256.
            r = jax.nn.sigmoid(gi[:, 0:_GP] + gh[:, 0:_GP])
            z = jax.nn.sigmoid(gi[:, _GP:2 * _GP] + gh[:, _GP:2 * _GP])
            n = jnp.tanh(gi[:, 2 * _GP:3 * _GP] + r * (gh[:, 2 * _GP:3 * _GP] + bhn))
            # packed-sequence mask folded into the update gate:
            #   h <- h + m*(1-z)*(n-h)  ==  mask*((1-z)*n + z*h) + (1-mask)*h
            u = m_ref[t] * (1.0 - z[:, 0:H2])
            h = h + u * (n[:, 0:H2] - h)
        return h                                   # (B, 2H)

    h1 = run_bigru(gi1_ref, m1_ref, wr1_ref, bhn1_ref, h01_ref)
    h2 = run_bigru(gi2_ref, m2_ref, wr2_ref, bhn2_ref, h02_ref)
    # direction-sum + concat + Linear folded into the prepacked w1a / w1b.
    z = jnp.maximum(
        jnp.dot(h1, w1a_ref[...], preferred_element_type=jnp.float32)
        + jnp.dot(h2, w1b_ref[...], preferred_element_type=jnp.float32)
        + b1_ref[...], 0.0)
    # TODO(synk): nn.Dropout(dropout_fc) omitted (eval-mode identity).
    out_ref[...] = jnp.dot(z, w2_ref[...],
                           preferred_element_type=jnp.float32) + b2_ref[...]


# -----------------------------------------------------------------------------
# Init/load-time weight prepacking (runs ONCE, not on the per-call path)
# -----------------------------------------------------------------------------
def prepack_params(params):
    f32 = jnp.float32

    def pack_gru(p):
        H = p['whh_f'].shape[1]
        E = p['wih_f'].shape[1]
        H2 = 2 * H
        pad = _GP - H2

        # input-side packed weight (E, 3*128): gate-major [r|z|n], per-slab [fwd|bwd|0]
        def slab_w(g):
            wf = p['wih_f'][g * H:(g + 1) * H]
            wb = p['wih_b'][g * H:(g + 1) * H]
            return jnp.concatenate([wf, wb, jnp.zeros((pad, E), f32)], axis=0)

        wih = jnp.concatenate([slab_w(0), slab_w(1), slab_w(2)], axis=0).T   # (E, 384)

        # packed input bias: b_ih (all gates) + b_hh (r, z only); b_hn stays recurrent.
        def slab_b(g, add_bhh):
            bf = p['bih_f'][g * H:(g + 1) * H]
            bb = p['bih_b'][g * H:(g + 1) * H]
            if add_bhh:
                bf = bf + p['bhh_f'][g * H:(g + 1) * H]
                bb = bb + p['bhh_b'][g * H:(g + 1) * H]
            return jnp.concatenate([bf, bb, jnp.zeros((pad,), f32)])

        bih = jnp.concatenate([slab_b(0, True), slab_b(1, True), slab_b(2, False)])

        # recurrent block-diag weight, output columns zero-padded to 128/gate:
        # (2H, 384); contraction dim kept at 2H (no padded rows pushed to the MXU).
        zHH = jnp.zeros((H, H), f32)
        zpad = jnp.zeros((H2, pad), f32)

        def slab_r(g):
            wf = p['whh_f'][g * H:(g + 1) * H].T
            wb = p['whh_b'][g * H:(g + 1) * H].T
            blk = jnp.concatenate([jnp.concatenate([wf, zHH], axis=1),
                                   jnp.concatenate([zHH, wb], axis=1)], axis=0)
            return jnp.concatenate([blk, zpad], axis=1)                      # (2H, 128)

        whh = jnp.concatenate([slab_r(0), slab_r(1), slab_r(2)], axis=1)     # (2H, 384)

        bhn = jnp.concatenate([p['bhh_f'][2 * H:], p['bhh_b'][2 * H:],
                               jnp.zeros((pad,), f32)]).reshape(1, _GP)      # (1, 128)

        lane = jnp.arange(H2)
        fwd_lane = (lane < H).astype(f32).reshape(1, 1, H2)
        bwd_lane = (lane >= H).astype(f32).reshape(1, 1, H2)
        slab_bwd = jnp.concatenate([jnp.zeros((H,), jnp.bool_),
                                    jnp.ones((H,), jnp.bool_),
                                    jnp.zeros((pad,), jnp.bool_)])
        bwd_cols = jnp.tile(slab_bwd, 3).reshape(1, 1, 3 * _GP)              # (1,1,384)
        return dict(wih=wih, bih=bih, whh=whh, bhn=bhn,
                    fwd_lane=fwd_lane, bwd_lane=bwd_lane, bwd_cols=bwd_cols)

    fc = params['fc']
    H1 = params['rnn1']['whh_f'].shape[1]
    w1t = fc['w1'].T                                                         # (H1+H2, fc)
    # fold the direction-sum (h_fwd + h_bwd) and the concat into the FC1 weight.
    w1a = jnp.concatenate([w1t[:H1], w1t[:H1]], axis=0)                      # (2H1, fc)
    w1b = jnp.concatenate([w1t[H1:], w1t[H1:]], axis=0)                      # (2H2, fc)
    return dict(
        embedding=params['embedding'],
        rnn1=pack_gru(params['rnn1']),
        rnn2=pack_gru(params['rnn2']),
        fc=dict(w1a=w1a, w1b=w1b, b1=fc['b1'].reshape(1, -1),
                w2t=fc['w2'].T, b2=fc['b2'].reshape(1, -1)),
    )


# -----------------------------------------------------------------------------
# Per-call preprocessing (XLA): one einsum, small time-flip, mask, h0 packing
# -----------------------------------------------------------------------------
def _prep_gru_inputs(x_emb, lengths, pp, h0):
    f32 = jnp.float32
    T = x_emb.shape[1]
    # single batched projection, written directly time-major: (T, B, 384)
    gi = jnp.einsum('bte,eg->tbg', x_emb, pp['wih'],
                    preferred_element_type=f32) + pp['bih']
    # backward direction = flip the SMALL projection along time (not the (B,T,300) emb)
    gi = jnp.where(pp['bwd_cols'], jnp.flip(gi, axis=0), gi)
    # pack_padded_sequence h_n semantics: fwd updates iff t < len;
    # bwd (scanning the reversed input) updates iff (T-1-t) < len.
    valid = (jnp.arange(T)[:, None] < lengths[None, :]).astype(f32)          # (T, B)
    mask = (valid[:, :, None] * pp['fwd_lane']
            + jnp.flip(valid, axis=0)[:, :, None] * pp['bwd_lane'])          # (T, B, 2H)
    h0p = jnp.concatenate([h0[0], h0[1]], axis=1)                            # (B, 2H)
    return gi, mask, h0p


def rnn_encoder_forward(packed, x1, lengths1, x2, lengths2, h0_1, h0_2):
    emb = packed['embedding']
    e1 = jnp.take(emb, x1, axis=0)                                           # (B, T1, E)
    e2 = jnp.take(emb, x2, axis=0)                                           # (B, T2, E)
    g1, g2, fc = packed['rnn1'], packed['rnn2'], packed['fc']
    gi1, m1, h01 = _prep_gru_inputs(e1, lengths1, g1, h0_1)
    gi2, m2, h02 = _prep_gru_inputs(e2, lengths2, g2, h0_2)
    args = (gi1, m1, g1['whh'], g1['bhn'], h01,
            gi2, m2, g2['whh'], g2['bhn'], h02,
            fc['w1a'], fc['w1b'], fc['b1'], fc['w2t'], fc['b2'])
    B = x1.shape[0]
    num_classes = fc['w2t'].shape[1]
    return pl.pallas_call(
        fused_encoder_kernel,
        out_shape=jax.ShapeDtypeStruct((B, num_classes), jnp.float32),
        in_specs=[_vmem() for _ in args],
        out_specs=_vmem(),
    )(*args)


rnn_encoder_forward_jit = jax.jit(rnn_encoder_forward)


# -----------------------------------------------------------------------------
# Deterministic parameter init (shapes per the module's __init__)
# -----------------------------------------------------------------------------
def init_params(key, vocab, emb_size, h1, h2, fc_dim, num_classes):
    ks = jax.random.split(key, 4)

    def u(k, shape, scale):
        return jax.random.uniform(k, shape, jnp.float32, -scale, scale)

    def gru(kbase, H, E):
        kk = jax.random.split(kbase, 8)
        s = 1.0 / float(H) ** 0.5
        return dict(
            wih_f=u(kk[0], (3 * H, E), s), whh_f=u(kk[1], (3 * H, H), s),
            bih_f=u(kk[2], (3 * H,), s), bhh_f=u(kk[3], (3 * H,), s),
            wih_b=u(kk[4], (3 * H, E), s), whh_b=u(kk[5], (3 * H, H), s),
            bih_b=u(kk[6], (3 * H,), s), bhh_b=u(kk[7], (3 * H,), s),
        )

    kfc = jax.random.split(ks[3], 4)
    s1 = 1.0 / float(h1 + h2) ** 0.5
    s2 = 1.0 / float(fc_dim) ** 0.5
    return dict(
        embedding=jax.random.normal(ks[0], (vocab, emb_size), jnp.float32),
        rnn1=gru(ks[1], h1, emb_size),
        rnn2=gru(ks[2], h2, emb_size),
        fc=dict(w1=u(kfc[0], (fc_dim, h1 + h2), s1), b1=u(kfc[1], (fc_dim,), s1),
                w2=u(kfc[2], (num_classes, fc_dim), s2), b2=u(kfc[3], (num_classes,), s2)),
    )


# -----------------------------------------------------------------------------
# Pure-JAX reference (no Pallas, raw params) for correctness check
# -----------------------------------------------------------------------------
def _gru_dir_ref(x, lens, wih, whh, bih, bhh, h0, reverse):
    B, T, E = x.shape
    H = h0.shape[1]
    h = h0
    order = range(T - 1, -1, -1) if reverse else range(T)
    for t in order:
        xt = x[:, t, :]
        gi = xt @ wih.T + bih
        gh = h @ whh.T + bhh
        r = jax.nn.sigmoid(gi[:, :H] + gh[:, :H])
        z = jax.nn.sigmoid(gi[:, H:2 * H] + gh[:, H:2 * H])
        n = jnp.tanh(gi[:, 2 * H:] + r * gh[:, 2 * H:])
        h_new = (1.0 - z) * n + z * h
        mask = (t < lens)[:, None]
        h = jnp.where(mask, h_new, h)
    return h


def reference_forward(params, x1, l1, x2, l2, h0_1, h0_2):
    emb = params['embedding']
    e1 = jnp.take(emb, x1, axis=0)
    e2 = jnp.take(emb, x2, axis=0)

    def bigru(e, l, p, h0):
        hf = _gru_dir_ref(e, l, p['wih_f'], p['whh_f'], p['bih_f'], p['bhh_f'], h0[0], False)
        hb = _gru_dir_ref(e, l, p['wih_b'], p['whh_b'], p['bih_b'], p['bhh_b'], h0[1], True)
        return hf + hb

    hn1 = bigru(e1, l1, params['rnn1'], h0_1)
    hn2 = bigru(e2, l2, params['rnn2'], h0_2)
    h = jnp.concatenate([hn1, hn2], axis=1)
    fc = params['fc']
    z = jnp.maximum(h @ fc['w1'].T + fc['b1'], 0.0)
    return z @ fc['w2'].T + fc['b2']


if __name__ == "__main__":
    key = jax.random.PRNGKey(0)
    k_param, k_x1, k_x2, k_h1, k_h2 = jax.random.split(key, 5)

    vocab, emb_size = 50, 300
    h1, h2 = 32, 48                      # hidden_size = (32, 48)
    fc_dim, num_classes = 64, 3
    B, T1, T2 = 2, 8, 10

    params = init_params(k_param, vocab, emb_size, h1, h2, fc_dim, num_classes)
    packed = prepack_params(params)      # weight-only packing: once, off the call path

    x1 = jax.random.randint(k_x1, (B, T1), 0, vocab)
    x2 = jax.random.randint(k_x2, (B, T2), 0, vocab)
    lengths1 = jnp.array([5, 8], jnp.int32)
    lengths2 = jnp.array([10, 4], jnp.int32)

    # deterministic stand-in for init_hidden()'s torch.randn
    h0_1 = jax.random.normal(k_h1, (2, B, h1), jnp.float32)
    h0_2 = jax.random.normal(k_h2, (2, B, h2), jnp.float32)

    logits = rnn_encoder_forward_jit(packed, x1, lengths1, x2, lengths2, h0_1, h0_2)
    logits = jax.block_until_ready(logits)

    ref = reference_forward(params, x1, lengths1, x2, lengths2, h0_1, h0_2)
    assert logits.shape == (B, num_classes)
    assert jnp.allclose(logits, ref, atol=1e-4, rtol=1e-4), (logits, ref)

    print("KERNEL_OK")
</pallas_src>

<mosaic_0001>
module attributes {stable_mosaic.version = 11 : i64} {
  func.func @fused_encoder_kernel(%arg0: memref<8x2x384xf32, #tpu.memory_space<vmem>>, %arg1: memref<8x2x64xf32, #tpu.memory_space<vmem>>, %arg2: memref<64x384xf32, #tpu.memory_space<vmem>>, %arg3: memref<1x128xf32, #tpu.memory_space<vmem>>, %arg4: memref<2x64xf32, #tpu.memory_space<vmem>>, %arg5: memref<10x2x384xf32, #tpu.memory_space<vmem>>, %arg6: memref<10x2x96xf32, #tpu.memory_space<vmem>>, %arg7: memref<96x384xf32, #tpu.memory_space<vmem>>, %arg8: memref<1x128xf32, #tpu.memory_space<vmem>>, %arg9: memref<2x96xf32, #tpu.memory_space<vmem>>, %arg10: memref<64x64xf32, #tpu.memory_space<vmem>>, %arg11: memref<96x64xf32, #tpu.memory_space<vmem>>, %arg12: memref<1x64xf32, #tpu.memory_space<vmem>>, %arg13: memref<64x3xf32, #tpu.memory_space<vmem>>, %arg14: memref<1x3xf32, #tpu.memory_space<vmem>>, %arg15: memref<2x3xf32, #tpu.memory_space<vmem>>) attributes {dimension_semantics = [], scalar_prefetch = 0 : i64, scratch_operands = 0 : i64, tpu.core_type = #tpu.core_type<tc>} {
    %c0 = arith.constant 0 : index
    %c0_0 = arith.constant 0 : index
    %0 = vector.load %arg2[%c0, %c0_0] : memref<64x384xf32, #tpu.memory_space<vmem>>, vector<64x384xf32>
    %c0_1 = arith.constant 0 : index
    %c0_2 = arith.constant 0 : index
    %1 = vector.load %arg3[%c0_1, %c0_2] : memref<1x128xf32, #tpu.memory_space<vmem>>, vector<1x128xf32>
    %2 = vector.shape_cast %1 : vector<1x128xf32> to vector<1x128xf32>
    %3 = vector.broadcast %2 : vector<1x128xf32> to vector<2x128xf32>
    %c0_3 = arith.constant 0 : index
    %c0_4 = arith.constant 0 : index
    %4 = vector.load %arg4[%c0_3, %c0_4] : memref<2x64xf32, #tpu.memory_space<vmem>>, vector<2x64xf32>
    %cst = arith.constant dense<0.000000e+00> : vector<2x384xf32>
    %5 = tpu.matmul %4, %0, %cst {dimension_numbers = #tpu.dot_dimension_numbers<[1], [0], [0], [1], [0, 0, 1, 1], [], []>} : vector<2x64xf32>, vector<64x384xf32>, vector<2x384xf32> -> vector<2x384xf32>
    %c0_5 = arith.constant 0 : index
    %c0_6 = arith.constant 0 : index
    %c0_7 = arith.constant 0 : index
    %6 = vector.load %arg0[%c0_5, %c0_6, %c0_7] : memref<8x2x384xf32, #tpu.memory_space<vmem>>, vector<1x2x384xf32>
    %7 = vector.shape_cast %6 : vector<1x2x384xf32> to vector<2x384xf32>
    %8 = vector.extract_strided_slice %7 {offsets = [0, 0], sizes = [2, 128], strides = [1, 1]} : vector<2x384xf32> to vector<2x128xf32>
    %9 = vector.extract_strided_slice %5 {offsets = [0, 0], sizes = [2, 128], strides = [1, 1]} : vector<2x384xf32> to vector<2x128xf32>
    %10 = arith.addf %8, %9 : vector<2x128xf32>
    %11 = arith.negf %10 : vector<2x128xf32>
    %12 = math.exp %11 : vector<2x128xf32>
    %cst_8 = arith.constant 1.000000e+00 : f32
    %13 = vector.broadcast %cst_8 : f32 to vector<2x128xf32>
    %14 = arith.addf %13, %12 : vector<2x128xf32>
    %15 = arith.divf %13, %14 : vector<2x128xf32>
    %16 = vector.extract_strided_slice %7 {offsets = [0, 128], sizes = [2, 128], strides = [1, 1]} : vector<2x384xf32> to vector<2x128xf32>
    %17 = vector.extract_strided_slice %5 {offsets = [0, 128], sizes = [2, 128], strides = [1, 1]} : vector<2x384xf32> to vector<2x128xf32>
    %18 = arith.addf %16, %17 : vector<2x128xf32>
    %19 = arith.negf %18 : vector<2x128xf32>
    %20 = math.exp %19 : vector<2x128xf32>
    %cst_9 = arith.constant 1.000000e+00 : f32
    %21 = vector.broadcast %cst_9 : f32 to vector<2x128xf32>
    %22 = arith.addf %21, %20 : vector<2x128xf32>
    %23 = arith.divf %21, %22 : vector<2x128xf32>
    %24 = vector.extract_strided_slice %7 {offsets = [0, 256], sizes = [2, 128], strides = [1, 1]} : vector<2x384xf32> to vector<2x128xf32>
    %25 = vector.extract_strided_slice %5 {offsets = [0, 256], sizes = [2, 128], strides = [1, 1]} : vector<2x384xf32> to vector<2x128xf32>
    %26 = arith.addf %25, %3 : vector<2x128xf32>
    %27 = arith.mulf %15, %26 : vector<2x128xf32>
    %28 = arith.addf %24, %27 : vector<2x128xf32>
    %29 = math.tanh %28 : vector<2x128xf32>
    %c0_10 = arith.constant 0 : index
    %c0_11 = arith.constant 0 : index
    %c0_12 = arith.constant 0 : index
    %30 = vector.load %arg1[%c0_10, %c0_11, %c0_12] : memref<8x2x64xf32, #tpu.memory_space<vmem>>, vector<1x2x64xf32>
    %31 = vector.shape_cast %30 : vector<1x2x64xf32> to vector<2x64xf32>
    %32 = vector.extract_strided_slice %23 {offsets = [0, 0], sizes = [2, 64], strides = [1, 1]} : vector<2x128xf32> to vector<2x64xf32>
    %cst_13 = arith.constant 1.000000e+00 : f32
    %33 = vector.broadcast %cst_13 : f32 to vector<2x64xf32>
    %34 = arith.subf %33, %32 : vector<2x64xf32>
    %35 = arith.mulf %31, %34 : vector<2x64xf32>
    %36 = vector.extract_strided_slice %29 {offsets = [0, 0], sizes = [2, 64], strides = [1, 1]} : vector<2x128xf32> to vector<2x64xf32>
    %37 = arith.subf %36, %4 : vector<2x64xf32>
    %38 = arith.mulf %35, %37 : vector<2x64xf32>
    %39 = arith.addf %4, %38 : vector<2x64xf32>
    %cst_14 = arith.constant dense<0.000000e+00> : vector<2x384xf32>
    %40 = tpu.matmul %39, %0, %cst_14 {dimension_numbers = #tpu.dot_dimension_numbers<[1], [0], [0], [1], [0, 0, 1, 1], [], []>} : vector<2x64xf32>, vector<64x384xf32>, vector<2x384xf32> -> vector<2x384xf32>
    %c1 = arith.constant 1 : index
    %c0_15 = arith.constant 0 : index
    %c0_16 = arith.constant 0 : index
    %41 = vector.load %arg0[%c1, %c0_15, %c0_16] : memref<8x2x384xf32, #tpu.memory_space<vmem>>, vector<1x2x384xf32>
    %42 = vector.shape_cast %41 : vector<1x2x384xf32> to vector<2x384xf32>
    %43 = vector.extract_strided_slice %42 {offsets = [0, 0], sizes = [2, 128], strides = [1, 1]} : vector<2x384xf32> to vector<2x128xf32>
    %44 = vector.extract_strided_slice %40 {offsets = [0, 0], sizes = [2, 128], strides = [1, 1]} : vector<2x384xf32> to vector<2x128xf32>
    %45 = arith.addf %43, %44 : vector<2x128xf32>
    %46 = arith.negf %45 : vector<2x128xf32>
    %47 = math.exp %46 : vector<2x128xf32>
    %cst_17 = arith.constant 1.000000e+00 : f32
    %48 = vector.broadcast %cst_17 : f32 to vector<2x128xf32>
    %49 = arith.addf %48, %47 : vector<2x128xf32>
    %50 = arith.divf %48, %49 : vector<2x128xf32>
    %51 = vector.extract_strided_slice %42 {offsets = [0, 128], sizes = [2, 128], strides = [1, 1]} : vector<2x384xf32> to vector<2x128xf32>
    %52 = vector.extract_strided_slice %40 {offsets = [0, 128], sizes = [2, 128], strides = [1, 1]} : vector<2x384xf32> to vector<2x128xf32>
    %53 = arith.addf %51, %52 : vector<2x128xf32>
    %54 = arith.negf %53 : vector<2x128xf32>
    %55 = math.exp %54 : vector<2x128xf32>
    %cst_18 = arith.constant 1.000000e+00 : f32
    %56 = vector.broadcast %cst_18 : f32 to vector<2x128xf32>
    %57 = arith.addf %56, %55 : vector<2x128xf32>
    %58 = arith.divf %56, %57 : vector<2x128xf32>
    %59 = vector.extract_strided_slice %42 {offsets = [0, 256], sizes = [2, 128], strides = [1, 1]} : vector<2x384xf32> to vector<2x128xf32>
    %60 = vector.extract_strided_slice %40 {offsets = [0, 256], sizes = [2, 128], strides = [1, 1]} : vector<2x384xf32> to vector<2x128xf32>
    %61 = arith.addf %60, %3 : vector<2x128xf32>
    %62 = arith.mulf %50, %61 : vector<2x128xf32>
    %63 = arith.addf %59, %62 : vector<2x128xf32>
    %64 = math.tanh %63 : vector<2x128xf32>
    %c1_19 = arith.constant 1 : index
    %c0_20 = arith.constant 0 : index
    %c0_21 = arith.constant 0 : index
    %65 = vector.load %arg1[%c1_19, %c0_20, %c0_21] : memref<8x2x64xf32, #tpu.memory_space<vmem>>, vector<1x2x64xf32>
    %66 = vector.shape_cast %65 : vector<1x2x64xf32> to vector<2x64xf32>
    %67 = vector.extract_strided_slice %58 {offsets = [0, 0], sizes = [2, 64], strides = [1, 1]} : vector<2x128xf32> to vector<2x64xf32>
    %cst_22 = arith.constant 1.000000e+00 : f32
    %68 = vector.broadcast %cst_22 : f32 to vector<2x64xf32>
    %69 = arith.subf %68, %67 : vector<2x64xf32>
    %70 = arith.mulf %66, %69 : vector<2x64xf32>
    %71 = vector.extract_strided_slice %64 {offsets = [0, 0], sizes = [2, 64], strides = [1, 1]} : vector<2x128xf32> to vector<2x64xf32>
    %72 = arith.subf %71, %39 : vector<2x64xf32>
    %73 = arith.mulf %70, %72 : vector<2x64xf32>
    %74 = arith.addf %39, %73 : vector<2x64xf32>
    %cst_23 = arith.constant dense<0.000000e+00> : vector<2x384xf32>
    %75 = tpu.matmul %74, %0, %cst_23 {dimension_numbers = #tpu.dot_dimension_numbers<[1], [0], [0], [1], [0, 0, 1, 1], [], []>} : vector<2x64xf32>, vector<64x384xf32>, vector<2x384xf32> -> vector<2x384xf32>
    %c2 = arith.constant 2 : index
    %c0_24 = arith.constant 0 : index
    %c0_25 = arith.constant 0 : index
    %76 = vector.load %arg0[%c2, %c0_24, %c0_25] : memref<8x2x384xf32, #tpu.memory_space<vmem>>, vector<1x2x384xf32>
    %77 = vector.shape_cast %76 : vector<1x2x384xf32> to vector<2x384xf32>
    %78 = vector.extract_strided_slice %77 {offsets = [0, 0], sizes = [2, 128], strides = [1, 1]} : vector<2x384xf32> to vector<2x128xf32>
    %79 = vector.extract_strided_slice %75 {offsets = [0, 0], sizes = [2, 128], strides = [1, 1]} : vector<2x384xf32> to vector<2x128xf32>
    %80 = arith.addf %78, %79 : vector<2x128xf32>
    %81 = arith.negf %80 : vector<2x128xf32>
    %82 = math.exp %81 : vector<2x128xf32>
    %cst_26 = arith.constant 1.000000e+00 : f32
    %83 = vector.broadcast %cst_26 : f32 to vector<2x128xf32>
    %84 = arith.addf %83, %82 : vector<2x128xf32>
    %85 = arith.divf %83, %84 : vector<2x128xf32>
    %86 = vector.extract_strided_slice %77 {offsets = [0, 128], sizes = [2, 128], strides = [1, 1]} : vector<2x384xf32> to vector<2x128xf32>
    %87 = vector.extract_strided_slice %75 {offsets = [0, 128], sizes = [2, 128], strides = [1, 1]} : vector<2x384xf32> to vector<2x128xf32>
    %88 = arith.addf %86, %87 : vector<2x128xf32>
    %89 = arith.negf %88 : vector<2x128xf32>
    %90 = math.exp %89 : vector<2x128xf32>
    %cst_27 = arith.constant 1.000000e+00 : f32
    %91 = vector.broadcast %cst_27 : f32 to vector<2x128xf32>
    %92 = arith.addf %91, %90 : vector<2x128xf32>
    %93 = arith.divf %91, %92 : vector<2x128xf32>
    %94 = vector.extract_strided_slice %77 {offsets = [0, 256], sizes = [2, 128], strides = [1, 1]} : vector<2x384xf32> to vector<2x128xf32>
    %95 = vector.extract_strided_slice %75 {offsets = [0, 256], sizes = [2, 128], strides = [1, 1]} : vector<2x384xf32> to vector<2x128xf32>
    %96 = arith.addf %95, %3 : vector<2x128xf32>
    %97 = arith.mulf %85, %96 : vector<2x128xf32>
    %98 = arith.addf %94, %97 : vector<2x128xf32>
    %99 = math.tanh %98 : vector<2x128xf32>
    %c2_28 = arith.constant 2 : index
    %c0_29 = arith.constant 0 : index
    %c0_30 = arith.constant 0 : index
    %100 = vector.load %arg1[%c2_28, %c0_29, %c0_30] : memref<8x2x64xf32, #tpu.memory_space<vmem>>, vector<1x2x64xf32>
    %101 = vector.shape_cast %100 : vector<1x2x64xf32> to vector<2x64xf32>
    %102 = vector.extract_strided_slice %93 {offsets = [0, 0], sizes = [2, 64], strides = [1, 1]} : vector<2x128xf32> to vector<2x64xf32>
    %cst_31 = arith.constant 1.000000e+00 : f32
    %103 = vector.broadcast %cst_31 : f32 to vector<2x64xf32>
    %104 = arith.subf %103, %102 : vector<2x64xf32>
    %105 = arith.mulf %101, %104 : vector<2x64xf32>
    %106 = vector.extract_strided_slice %99 {offsets = [0, 0], sizes = [2, 64], strides = [1, 1]} : vector<2x128xf32> to vector<2x64xf32>
    %107 = arith.subf %106, %74 : vector<2x64xf32>
    %108 = arith.mulf %105, %107 : vector<2x64xf32>
    %109 = arith.addf %74, %108 : vector<2x64xf32>
    %cst_32 = arith.constant dense<0.000000e+00> : vector<2x384xf32>
    %110 = tpu.matmul %109, %0, %cst_32 {dimension_numbers = #tpu.dot_dimension_numbers<[1], [0], [0], [1], [0, 0, 1, 1], [], []>} : vector<2x64xf32>, vector<64x384xf32>, vector<2x384xf32> -> vector<2x384xf32>
    %c3 = arith.constant 3 : index
    %c0_33 = arith.constant 0 : index
    %c0_34 = arith.constant 0 : index
    %111 = vector.load %arg0[%c3, %c0_33, %c0_34] : memref<8x2x384xf32, #tpu.memory_space<vmem>>, vector<1x2x384xf32>
    %112 = vector.shape_cast %111 : vector<1x2x384xf32> to vector<2x384xf32>
    %113 = vector.extract_strided_slice %112 {offsets = [0, 0], sizes = [2, 128], strides = [1, 1]} : vector<2x384xf32> to vector<2x128xf32>
    %114 = vector.extract_strided_slice %110 {offsets = [0, 0], sizes = [2, 128], strides = [1, 1]} : vector<2x384xf32> to vector<2x128xf32>
    %115 = arith.addf %113, %114 : vector<2x128xf32>
    %116 = arith.negf %115 : vector<2x128xf32>
    %117 = math.exp %116 : vector<2x128xf32>
    %cst_35 = arith.constant 1.000000e+00 : f32
    %118 = vector.broadcast %cst_35 : f32 to vector<2x128xf32>
    %119 = arith.addf %118, %117 : vector<2x128xf32>
    %120 = arith.divf %118, %119 : vector<2x128xf32>
    %121 = vector.extract_strided_slice %112 {offsets = [0, 128], sizes = [2, 128], strides = [1, 1]} : vector<2x384xf32> to vector<2x128xf32>
    %122 = vector.extract_strided_slice %110 {offsets = [0, 128], sizes = [2, 128], strides = [1, 1]} : vector<2x384xf32> to vector<2x128xf32>
    %123 = arith.addf %121, %122 : vector<2x128xf32>
    %124 = arith.negf %123 : vector<2x128xf32>
    %125 = math.exp %124 : vector<2x128xf32>
    %cst_36 = arith.constant 1.000000e+00 : f32
    %126 = vector.broadcast %cst_36 : f32 to vector<2x128xf32>
    %127 = arith.addf %126, %125 : vector<2x128xf32>
    %128 = arith.divf %126, %127 : vector<2x128xf32>
    %129 = vector.extract_strided_slice %112 {offsets = [0, 256], sizes = [2, 128], strides = [1, 1]} : vector<2x384xf32> to vector<2x128xf32>
    %130 = vector.extract_strided_slice %110 {offsets = [0, 256], sizes = [2, 128], strides = [1, 1]} : vector<2x384xf32> to vector<2x128xf32>
    %131 = arith.addf %130, %3 : vector<2x128xf32>
    %132 = arith.mulf %120, %131 : vector<2x128xf32>
    %133 = arith.addf %129, %132 : vector<2x128xf32>
    %134 = math.tanh %133 : vector<2x128xf32>
    %c3_37 = arith.constant 3 : index
    %c0_38 = arith.constant 0 : index
    %c0_39 = arith.constant 0 : index
    %135 = vector.load %arg1[%c3_37, %c0_38, %c0_39] : memref<8x2x64xf32, #tpu.memory_space<vmem>>, vector<1x2x64xf32>
    %136 = vector.shape_cast %135 : vector<1x2x64xf32> to vector<2x64xf32>
    %137 = vector.extract_strided_slice %128 {offsets = [0, 0], sizes = [2, 64], strides = [1, 1]} : vector<2x128xf32> to vector<2x64xf32>
    %cst_40 = arith.constant 1.000000e+00 : f32
    %138 = vector.broadcast %cst_40 : f32 to vector<2x64xf32>
    %139 = arith.subf %138, %137 : vector<2x64xf32>
    %140 = arith.mulf %136, %139 : vector<2x64xf32>
    %141 = vector.extract_strided_slice %134 {offsets = [0, 0], sizes = [2, 64], strides = [1, 1]} : vector<2x128xf32> to vector<2x64xf32>
    %142 = arith.subf %141, %109 : vector<2x64xf32>
    %143 = arith.mulf %140, %142 : vector<2x64xf32>
    %144 = arith.addf %109, %143 : vector<2x64xf32>
    %cst_41 = arith.constant dense<0.000000e+00> : vector<2x384xf32>
    %145 = tpu.matmul %144, %0, %cst_41 {dimension_numbers = #tpu.dot_dimension_numbers<[1], [0], [0], [1], [0, 0, 1, 1], [], []>} : vector<2x64xf32>, vector<64x384xf32>, vector<2x384xf32> -> vector<2x384xf32>
    %c4 = arith.constant 4 : index
    %c0_42 = arith.constant 0 : index
    %c0_43 = arith.constant 0 : index
    %146 = vector.load %arg0[%c4, %c0_42, %c0_43] : memref<8x2x384xf32, #tpu.memory_space<vmem>>, vector<1x2x384xf32>
    %147 = vector.shape_cast %146 : vector<1x2x384xf32> to vector<2x384xf32>
    %148 = vector.extract_strided_slice %147 {offsets = [0, 0], sizes = [2, 128], strides = [1, 1]} : vector<2x384xf32> to vector<2x128xf32>
    %149 = vector.extract_strided_slice %145 {offsets = [0, 0], sizes = [2, 128], strides = [1, 1]} : vector<2x384xf32> to vector<2x128xf32>
    %150 = arith.addf %148, %149 : vector<2x128xf32>
    %151 = arith.negf %150 : vector<2x128xf32>
    %152 = math.exp %151 : vector<2x128xf32>
    %cst_44 = arith.constant 1.000000e+00 : f32
    %153 = vector.broadcast %cst_44 : f32 to vector<2x128xf32>
    %154 = arith.addf %153, %152 : vector<2x128xf32>
    %155 = arith.divf %153, %154 : vector<2x128xf32>
    %156 = vector.extract_strided_slice %147 {offsets = [0, 128], sizes = [2, 128], strides = [1, 1]} : vector<2x384xf32> to vector<2x128xf32>
    %157 = vector.extract_strided_slice %145 {offsets = [0, 128], sizes = [2, 128], strides = [1, 1]} : vector<2x384xf32> to vector<2x128xf32>
    %158 = arith.addf %156, %157 : vector<2x128xf32>
    %159 = arith.negf %158 : vector<2x128xf32>
    %160 = math.exp %159 : vector<2x128xf32>
    %cst_45 = arith.constant 1.000000e+00 : f32
    %161 = vector.broadcast %cst_45 : f32 to vector<2x128xf32>
    %162 = arith.addf %161, %160 : vector<2x128xf32>
    %163 = arith.divf %161, %162 : vector<2x128xf32>
    %164 = vector.extract_strided_slice %147 {offsets = [0, 256], sizes = [2, 128], strides = [1, 1]} : vector<2x384xf32> to vector<2x128xf32>
    %165 = vector.extract_strided_slice %145 {offsets = [0, 256], sizes = [2, 128], strides = [1, 1]} : vector<2x384xf32> to vector<2x128xf32>
    %166 = arith.addf %165, %3 : vector<2x128xf32>
    %167 = arith.mulf %155, %166 : vector<2x128xf32>
    %168 = arith.addf %164, %167 : vector<2x128xf32>
    %169 = math.tanh %168 : vector<2x128xf32>
    %c4_46 = arith.constant 4 : index
    %c0_47 = arith.constant 0 : index
    %c0_48 = arith.constant 0 : index
    %170 = vector.load %arg1[%c4_46, %c0_47, %c0_48] : memref<8x2x64xf32, #tpu.memory_space<vmem>>, vector<1x2x64xf32>
    %171 = vector.shape_cast %170 : vector<1x2x64xf32> to vector<2x64xf32>
    %172 = vector.extract_strided_slice %163 {offsets = [0, 0], sizes = [2, 64], strides = [1, 1]} : vector<2x128xf32> to vector<2x64xf32>
    %cst_49 = arith.constant 1.000000e+00 : f32
    %173 = vector.broadcast %cst_49 : f32 to vector<2x64xf32>
    %174 = arith.subf %173, %172 : vector<2x64xf32>
    %175 = arith.mulf %171, %174 : vector<2x64xf32>
    %176 = vector.extract_strided_slice %169 {offsets = [0, 0], sizes = [2, 64], strides = [1, 1]} : vector<2x128xf32> to vector<2x64xf32>
    %177 = arith.subf %176, %144 : vector<2x64xf32>
    %178 = arith.mulf %175, %177 : vector<2x64xf32>
    %179 = arith.addf %144, %178 : vector<2x64xf32>
    %cst_50 = arith.constant dense<0.000000e+00> : vector<2x384xf32>
    %180 = tpu.matmul %179, %0, %cst_50 {dimension_numbers = #tpu.dot_dimension_numbers<[1], [0], [0], [1], [0, 0, 1, 1], [], []>} : vector<2x64xf32>, vector<64x384xf32>, vector<2x384xf32> -> vector<2x384xf32>
    %c5 = arith.constant 5 : index
    %c0_51 = arith.constant 0 : index
    %c0_52 = arith.constant 0 : index
    %181 = vector.load %arg0[%c5, %c0_51, %c0_52] : memref<8x2x384xf32, #tpu.memory_space<vmem>>, vector<1x2x384xf32>
    %182 = vector.shape_cast %181 : vector<1x2x384xf32> to vector<2x384xf32>
    %183 = vector.extract_strided_slice %182 {offsets = [0, 0], sizes = [2, 128], strides = [1, 1]} : vector<2x384xf32> to vector<2x128xf32>
    %184 = vector.extract_strided_slice %180 {offsets = [0, 0], sizes = [2, 128], strides = [1, 1]} : vector<2x384xf32> to vector<2x128xf32>
    %185 = arith.addf %183, %184 : vector<2x128xf32>
    %186 = arith.negf %185 : vector<2x128xf32>
    %187 = math.exp %186 : vector<2x128xf32>
    %cst_53 = arith.constant 1.000000e+00 : f32
    %188 = vector.broadcast %cst_53 : f32 to vector<2x128xf32>
    %189 = arith.addf %188, %187 : vector<2x128xf32>
    %190 = arith.divf %188, %189 : vector<2x128xf32>
    %191 = vector.extract_strided_slice %182 {offsets = [0, 128], sizes = [2, 128], strides = [1, 1]} : vector<2x384xf32> to vector<2x128xf32>
    %192 = vector.extract_strided_slice %180 {offsets = [0, 128], sizes = [2, 128], strides = [1, 1]} : vector<2x384xf32> to vector<2x128xf32>
    %193 = arith.addf %191, %192 : vector<2x128xf32>
    %194 = arith.negf %193 : vector<2x128xf32>
    %195 = math.exp %194 : vector<2x128xf32>
    %cst_54 = arith.constant 1.000000e+00 : f32
    %196 = vector.broadcast %cst_54 : f32 to vector<2x128xf32>
    %197 = arith.addf %196, %195 : vector<2x128xf32>
    %198 = arith.divf %196, %197 : vector<2x128xf32>
    %199 = vector.extract_strided_slice %182 {offsets = [0, 256], sizes = [2, 128], strides = [1, 1]} : vector<2x384xf32> to vector<2x128xf32>
    %200 = vector.extract_strided_slice %180 {offsets = [0, 256], sizes = [2, 128], strides = [1, 1]} : vector<2x384xf32> to vector<2x128xf32>
    %201 = arith.addf %200, %3 : vector<2x128xf32>
    %202 = arith.mulf %190, %201 : vector<2x128xf32>
    %203 = arith.addf %199, %202 : vector<2x128xf32>
    %204 = math.tanh %203 : vector<2x128xf32>
    %c5_55 = arith.constant 5 : index
    %c0_56 = arith.constant 0 : index
    %c0_57 = arith.constant 0 : index
    %205 = vector.load %arg1[%c5_55, %c0_56, %c0_57] : memref<8x2x64xf32, #tpu.memory_space<vmem>>, vector<1x2x64xf32>
    %206 = vector.shape_cast %205 : vector<1x2x64xf32> to vector<2x64xf32>
    %207 = vector.extract_strided_slice %198 {offsets = [0, 0], sizes = [2, 64], strides = [1, 1]} : vector<2x128xf32> to vector<2x64xf32>
    %cst_58 = arith.constant 1.000000e+00 : f32
    %208 = vector.broadcast %cst_58 : f32 to vector<2x64xf32>
    %209 = arith.subf %208, %207 : vector<2x64xf32>
    %210 = arith.mulf %206, %209 : vector<2x64xf32>
    %211 = vector.extract_strided_slice %204 {offsets = [0, 0], sizes = [2, 64], strides = [1, 1]} : vector<2x128xf32> to vector<2x64xf32>
    %212 = arith.subf %211, %179 : vector<2x64xf32>
    %213 = arith.mulf %210, %212 : vector<2x64xf32>
    %214 = arith.addf %179, %213 : vector<2x64xf32>
    %cst_59 = arith.constant dense<0.000000e+00> : vector<2x384xf32>
    %215 = tpu.matmul %214, %0, %cst_59 {dimension_numbers = #tpu.dot_dimension_numbers<[1], [0], [0], [1], [0, 0, 1, 1], [], []>} : vector<2x64xf32>, vector<64x384xf32>, vector<2x384xf32> -> vector<2x384xf32>
    %c6 = arith.constant 6 : index
    %c0_60 = arith.constant 0 : index
    %c0_61 = arith.constant 0 : index
    %216 = vector.load %arg0[%c6, %c0_60, %c0_61] : memref<8x2x384xf32, #tpu.memory_space<vmem>>, vector<1x2x384xf32>
    %217 = vector.shape_cast %216 : vector<1x2x384xf32> to vector<2x384xf32>
    %218 = vector.extract_strided_slice %217 {offsets = [0, 0], sizes = [2, 128], strides = [1, 1]} : vector<2x384xf32> to vector<2x128xf32>
    %219 = vector.extract_strided_slice %215 {offsets = [0, 0], sizes = [2, 128], strides = [1, 1]} : vector<2x384xf32> to vector<2x128xf32>
    %220 = arith.addf %218, %219 : vector<2x128xf32>
    %221 = arith.negf %220 : vector<2x128xf32>
    %222 = math.exp %221 : vector<2x128xf32>
    %cst_62 = arith.constant 1.000000e+00 : f32
    %223 = vector.broadcast %cst_62 : f32 to vector<2x128xf32>
    %224 = arith.addf %223, %222 : vector<2x128xf32>
    %225 = arith.divf %223, %224 : vector<2x128xf32>
    %226 = vector.extract_strided_slice %217 {offsets = [0, 128], sizes = [2, 128], strides = [1, 1]} : vector<2x384xf32> to vector<2x128xf32>
    %227 = vector.extract_strided_slice %215 {offsets = [0, 128], sizes = [2, 128], strides = [1, 1]} : vector<2x384xf32> to vector<2x128xf32>
    %228 = arith.addf %226, %227 : vector<2x128xf32>
    %229 = arith.negf %228 : vector<2x128xf32>
    %230 = math.exp %229 : vector<2x128xf32>
    %cst_63 = arith.constant 1.000000e+00 : f32
    %231 = vector.broadcast %cst_63 : f32 to vector<2x128xf32>
    %232 = arith.addf %231, %230 : vector<2x128xf32>
    %233 = arith.divf %231, %232 : vector<2x128xf32>
    %234 = vector.extract_strided_slice %217 {offsets = [0, 256], sizes = [2, 128], strides = [1, 1]} : vector<2x384xf32> to vector<2x128xf32>
    %235 = vector.extract_strided_slice %215 {offsets = [0, 256], sizes = [2, 128], strides = [1, 1]} : vector<2x384xf32> to vector<2x128xf32>
    %236 = arith.addf %235, %3 : vector<2x128xf32>
    %237 = arith.mulf %225, %236 : vector<2x128xf32>
    %238 = arith.addf %234, %237 : vector<2x128xf32>
    %239 = math.tanh %238 : vector<2x128xf32>
    %c6_64 = arith.constant 6 : index
    %c0_65 = arith.constant 0 : index
    %c0_66 = arith.constant 0 : index
    %240 = vector.load %arg1[%c6_64, %c0_65, %c0_66] : memref<8x2x64xf32, #tpu.memory_space<vmem>>, vector<1x2x64xf32>
    %241 = vector.shape_cast %240 : vector<1x2x64xf32> to vector<2x64xf32>
    %242 = vector.extract_strided_slice %233 {offsets = [0, 0], sizes = [2, 64], strides = [1, 1]} : vector<2x128xf32> to vector<2x64xf32>
    %cst_67 = arith.constant 1.000000e+00 : f32
    %243 = vector.broadcast %cst_67 : f32 to vector<2x64xf32>
    %244 = arith.subf %243, %242 : vector<2x64xf32>
    %245 = arith.mulf %241, %244 : vector<2x64xf32>
    %246 = vector.extract_strided_slice %239 {offsets = [0, 0], sizes = [2, 64], strides = [1, 1]} : vector<2x128xf32> to vector<2x64xf32>
    %247 = arith.subf %246, %214 : vector<2x64xf32>
    %248 = arith.mulf %245, %247 : vector<2x64xf32>
    %249 = arith.addf %214, %248 : vector<2x64xf32>
    %cst_68 = arith.constant dense<0.000000e+00> : vector<2x384xf32>
    %250 = tpu.matmul %249, %0, %cst_68 {dimension_numbers = #tpu.dot_dimension_numbers<[1], [0], [0], [1], [0, 0, 1, 1], [], []>} : vector<2x64xf32>, vector<64x384xf32>, vector<2x384xf32> -> vector<2x384xf32>
    %c7 = arith.constant 7 : index
    %c0_69 = arith.constant 0 : index
    %c0_70 = arith.constant 0 : index
    %251 = vector.load %arg0[%c7, %c0_69, %c0_70] : memref<8x2x384xf32, #tpu.memory_space<vmem>>, vector<1x2x384xf32>
    %252 = vector.shape_cast %251 : vector<1x2x384xf32> to vector<2x384xf32>
    %253 = vector.extract_strided_slice %252 {offsets = [0, 0], sizes = [2, 128], strides = [1, 1]} : vector<2x384xf32> to vector<2x128xf32>
    %254 = vector.extract_strided_slice %250 {offsets = [0, 0], sizes = [2, 128], strides = [1, 1]} : vector<2x384xf32> to vector<2x128xf32>
    %255 = arith.addf %253, %254 : vector<2x128xf32>
    %256 = arith.negf %255 : vector<2x128xf32>
    %257 = math.exp %256 : vector<2x128xf32>
    %cst_71 = arith.constant 1.000000e+00 : f32
    %258 = vector.broadcast %cst_71 : f32 to vector<2x128xf32>
    %259 = arith.addf %258, %257 : vector<2x128xf32>
    %260 = arith.divf %258, %259 : vector<2x128xf32>
    %261 = vector.extract_strided_slice %252 {offsets = [0, 128], sizes = [2, 128], strides = [1, 1]} : vector<2x384xf32> to vector<2x128xf32>
    %262 = vector.extract_strided_slice %250 {offsets = [0, 128], sizes = [2, 128], strides = [1, 1]} : vector<2x384xf32> to vector<2x128xf32>
    %263 = arith.addf %261, %262 : vector<2x128xf32>
    %264 = arith.negf %263 : vector<2x128xf32>
    %265 = math.exp %264 : vector<2x128xf32>
    %cst_72 = arith.constant 1.000000e+00 : f32
    %266 = vector.broadcast %cst_72 : f32 to vector<2x128xf32>
    %267 = arith.addf %266, %265 : vector<2x128xf32>
    %268 = arith.divf %266, %267 : vector<2x128xf32>
    %269 = vector.extract_strided_slice %252 {offsets = [0, 256], sizes = [2, 128], strides = [1, 1]} : vector<2x384xf32> to vector<2x128xf32>
    %270 = vector.extract_strided_slice %250 {offsets = [0, 256], sizes = [2, 128], strides = [1, 1]} : vector<2x384xf32> to vector<2x128xf32>
    %271 = arith.addf %270, %3 : vector<2x128xf32>
    %272 = arith.mulf %260, %271 : vector<2x128xf32>
    %273 = arith.addf %269, %272 : vector<2x128xf32>
    %274 = math.tanh %273 : vector<2x128xf32>
    %c7_73 = arith.constant 7 : index
    %c0_74 = arith.constant 0 : index
    %c0_75 = arith.constant 0 : index
    %275 = vector.load %arg1[%c7_73, %c0_74, %c0_75] : memref<8x2x64xf32, #tpu.memory_space<vmem>>, vector<1x2x64xf32>
    %276 = vector.shape_cast %275 : vector<1x2x64xf32> to vector<2x64xf32>
    %277 = vector.extract_strided_slice %268 {offsets = [0, 0], sizes = [2, 64], strides = [1, 1]} : vector<2x128xf32> to vector<2x64xf32>
    %cst_76 = arith.constant 1.000000e+00 : f32
    %278 = vector.broadcast %cst_76 : f32 to vector<2x64xf32>
    %279 = arith.subf %278, %277 : vector<2x64xf32>
    %280 = arith.mulf %276, %279 : vector<2x64xf32>
    %281 = vector.extract_strided_slice %274 {offsets = [0, 0], sizes = [2, 64], strides = [1, 1]} : vector<2x128xf32> to vector<2x64xf32>
    %282 = arith.subf %281, %249 : vector<2x64xf32>
    %283 = arith.mulf %280, %282 : vector<2x64xf32>
    %284 = arith.addf %249, %283 : vector<2x64xf32>
    %c0_77 = arith.constant 0 : index
    %c0_78 = arith.constant 0 : index
    %285 = vector.load %arg7[%c0_77, %c0_78] : memref<96x384xf32, #tpu.memory_space<vmem>>, vector<96x384xf32>
    %c0_79 = arith.constant 0 : index
    %c0_80 = arith.constant 0 : index
    %286 = vector.load %arg8[%c0_79, %c0_80] : memref<1x128xf32, #tpu.memory_space<vmem>>, vector<1x128xf32>
    %287 = vector.shape_cast %286 : vector<1x128xf32> to vector<1x128xf32>
    %288 = vector.broadcast %287 : vector<1x128xf32> to vector<2x128xf32>
    %c0_81 = arith.constant 0 : index
    %c0_82 = arith.constant 0 : index
    %289 = vector.load %arg9[%c0_81, %c0_82] : memref<2x96xf32, #tpu.memory_space<vmem>>, vector<2x96xf32>
    %cst_83 = arith.constant dense<0.000000e+00> : vector<2x384xf32>
    %290 = tpu.matmul %289, %285, %cst_83 {dimension_numbers = #tpu.dot_dimension_numbers<[1], [0], [0], [1], [0, 0, 1, 1], [], []>} : vector<2x96xf32>, vector<96x384xf32>, vector<2x384xf32> -> vector<2x384xf32>
    %c0_84 = arith.constant 0 : index
    %c0_85 = arith.constant 0 : index
    %c0_86 = arith.constant 0 : index
    %291 = vector.load %arg5[%c0_84, %c0_85, %c0_86] : memref<10x2x384xf32, #tpu.memory_space<vmem>>, vector<1x2x384xf32>
    %292 = vector.shape_cast %291 : vector<1x2x384xf32> to vector<2x384xf32>
    %293 = vector.extract_strided_slice %292 {offsets = [0, 0], sizes = [2, 128], strides = [1, 1]} : vector<2x384xf32> to vector<2x128xf32>
    %294 = vector.extract_strided_slice %290 {offsets = [0, 0], sizes = [2, 128], strides = [1, 1]} : vector<2x384xf32> to vector<2x128xf32>
    %295 = arith.addf %293, %294 : vector<2x128xf32>
    %296 = arith.negf %295 : vector<2x128xf32>
    %297 = math.exp %296 : vector<2x128xf32>
    %cst_87 = arith.constant 1.000000e+00 : f32
    %298 = vector.broadcast %cst_87 : f32 to vector<2x128xf32>
    %299 = arith.addf %298, %297 : vector<2x128xf32>
    %300 = arith.divf %298, %299 : vector<2x128xf32>
    %301 = vector.extract_strided_slice %292 {offsets = [0, 128], sizes = [2, 128], strides = [1, 1]} : vector<2x384xf32> to vector<2x128xf32>
    %302 = vector.extract_strided_slice %290 {offsets = [0, 128], sizes = [2, 128], strides = [1, 1]} : vector<2x384xf32> to vector<2x128xf32>
    %303 = arith.addf %301, %302 : vector<2x128xf32>
    %304 = arith.negf %303 : vector<2x128xf32>
    %305 = math.exp %304 : vector<2x128xf32>
    %cst_88 = arith.constant 1.000000e+00 : f32
    %306 = vector.broadcast %cst_88 : f32 to vector<2x128xf32>
    %307 = arith.addf %306, %305 : vector<2x128xf32>
    %308 = arith.divf %306, %307 : vector<2x128xf32>
    %309 = vector.extract_strided_slice %292 {offsets = [0, 256], sizes = [2, 128], strides = [1, 1]} : vector<2x384xf32> to vector<2x128xf32>
    %310 = vector.extract_strided_slice %290 {offsets = [0, 256], sizes = [2, 128], strides = [1, 1]} : vector<2x384xf32> to vector<2x128xf32>
    %311 = arith.addf %310, %288 : vector<2x128xf32>
    %312 = arith.mulf %300, %311 : vector<2x128xf32>
    %313 = arith.addf %309, %312 : vector<2x128xf32>
    %314 = math.tanh %313 : vector<2x128xf32>
    %c0_89 = arith.constant 0 : index
    %c0_90 = arith.constant 0 : index
    %c0_91 = arith.constant 0 : index
    %315 = vector.load %arg6[%c0_89, %c0_90, %c0_91] : memref<10x2x96xf32, #tpu.memory_space<vmem>>, vector<1x2x96xf32>
    %316 = vector.shape_cast %315 : vector<1x2x96xf32> to vector<2x96xf32>
    %317 = vector.extract_strided_slice %308 {offsets = [0, 0], sizes = [2, 96], strides = [1, 1]} : vector<2x128xf32> to vector<2x96xf32>
    %cst_92 = arith.constant 1.000000e+00 : f32
    %318 = vector.broadcast %cst_92 : f32 to vector<2x96xf32>
    %319 = arith.subf %318, %317 : vector<2x96xf32>
    %320 = arith.mulf %316, %319 : vector<2x96xf32>
    %321 = vector.extract_strided_slice %314 {offsets = [0, 0], sizes = [2, 96], strides = [1, 1]} : vector<2x128xf32> to vector<2x96xf32>
    %322 = arith.subf %321, %289 : vector<2x96xf32>
    %323 = arith.mulf %320, %322 : vector<2x96xf32>
    %324 = arith.addf %289, %323 : vector<2x96xf32>
    %cst_93 = arith.constant dense<0.000000e+00> : vector<2x384xf32>
    %325 = tpu.matmul %324, %285, %cst_93 {dimension_numbers = #tpu.dot_dimension_numbers<[1], [0], [0], [1], [0, 0, 1, 1], [], []>} : vector<2x96xf32>, vector<96x384xf32>, vector<2x384xf32> -> vector<2x384xf32>
    %c1_94 = arith.constant 1 : index
    %c0_95 = arith.constant 0 : index
    %c0_96 = arith.constant 0 : index
    %326 = vector.load %arg5[%c1_94, %c0_95, %c0_96] : memref<10x2x384xf32, #tpu.memory_space<vmem>>, vector<1x2x384xf32>
    %327 = vector.shape_cast %326 : vector<1x2x384xf32> to vector<2x384xf32>
    %328 = vector.extract_strided_slice %327 {offsets = [0, 0], sizes = [2, 128], strides = [1, 1]} : vector<2x384xf32> to vector<2x128xf32>
    %329 = vector.extract_strided_slice %325 {offsets = [0, 0], sizes = [2, 128], strides = [1, 1]} : vector<2x384xf32> to vector<2x128xf32>
    %330 = arith.addf %328, %329 : vector<2x128xf32>
    %331 = arith.negf %330 : vector<2x128xf32>
    %332 = math.exp %331 : vector<2x128xf32>
    %cst_97 = arith.constant 1.000000e+00 : f32
    %333 = vector.broadcast %cst_97 : f32 to vector<2x128xf32>
    %334 = arith.addf %333, %332 : vector<2x128xf32>
    %335 = arith.divf %333, %334 : vector<2x128xf32>
    %336 = vector.extract_strided_slice %327 {offsets = [0, 128], sizes = [2, 128], strides = [1, 1]} : vector<2x384xf32> to vector<2x128xf32>
    %337 = vector.extract_strided_slice %325 {offsets = [0, 128], sizes = [2, 128], strides = [1, 1]} : vector<2x384xf32> to vector<2x128xf32>
    %338 = arith.addf %336, %337 : vector<2x128xf32>
    %339 = arith.negf %338 : vector<2x128xf32>
    %340 = math.exp %339 : vector<2x128xf32>
    %cst_98 = arith.constant 1.000000e+00 : f32
    %341 = vector.broadcast %cst_98 : f32 to vector<2x128xf32>
    %342 = arith.addf %341, %340 : vector<2x128xf32>
    %343 = arith.divf %341, %342 : vector<2x128xf32>
    %344 = vector.extract_strided_slice %327 {offsets = [0, 256], sizes = [2, 128], strides = [1, 1]} : vector<2x384xf32> to vector<2x128xf32>
    %345 = vector.extract_strided_slice %325 {offsets = [0, 256], sizes = [2, 128], strides = [1, 1]} : vector<2x384xf32> to vector<2x128xf32>
    %346 = arith.addf %345, %288 : vector<2x128xf32>
    %347 = arith.mulf %335, %346 : vector<2x128xf32>
    %348 = arith.addf %344, %347 : vector<2x128xf32>
    %349 = math.tanh %348 : vector<2x128xf32>
    %c1_99 = arith.constant 1 : index
    %c0_100 = arith.constant 0 : index
    %c0_101 = arith.constant 0 : index
    %350 = vector.load %arg6[%c1_99, %c0_100, %c0_101] : memref<10x2x96xf32, #tpu.memory_space<vmem>>, vector<1x2x96xf32>
    %351 = vector.shape_cast %350 : vector<1x2x96xf32> to vector<2x96xf32>
    %352 = vector.extract_strided_slice %343 {offsets = [0, 0], sizes = [2, 96], strides = [1, 1]} : vector<2x128xf32> to vector<2x96xf32>
    %cst_102 = arith.constant 1.000000e+00 : f32
    %353 = vector.broadcast %cst_102 : f32 to vector<2x96xf32>
    %354 = arith.subf %353, %352 : vector<2x96xf32>
    %355 = arith.mulf %351, %354 : vector<2x96xf32>
    %356 = vector.extract_strided_slice %349 {offsets = [0, 0], sizes = [2, 96], strides = [1, 1]} : vector<2x128xf32> to vector<2x96xf32>
    %357 = arith.subf %356, %324 : vector<2x96xf32>
    %358 = arith.mulf %355, %357 : vector<2x96xf32>
    %359 = arith.addf %324, %358 : vector<2x96xf32>
    %cst_103 = arith.constant dense<0.000000e+00> : vector<2x384xf32>
    %360 = tpu.matmul %359, %285, %cst_103 {dimension_numbers = #tpu.dot_dimension_numbers<[1], [0], [0], [1], [0, 0, 1, 1], [], []>} : vector<2x96xf32>, vector<96x384xf32>, vector<2x384xf32> -> vector<2x384xf32>
    %c2_104 = arith.constant 2 : index
    %c0_105 = arith.constant 0 : index
    %c0_106 = arith.constant 0 : index
    %361 = vector.load %arg5[%c2_104, %c0_105, %c0_106] : memref<10x2x384xf32, #tpu.memory_space<vmem>>, vector<1x2x384xf32>
    %362 = vector.shape_cast %361 : vector<1x2x384xf32> to vector<2x384xf32>
    %363 = vector.extract_strided_slice %362 {offsets = [0, 0], sizes = [2, 128], strides = [1, 1]} : vector<2x384xf32> to vector<2x128xf32>
    %364 = vector.extract_strided_slice %360 {offsets = [0, 0], sizes = [2, 128], strides = [1, 1]} : vector<2x384xf32> to vector<2x128xf32>
    %365 = arith.addf %363, %364 : vector<2x128xf32>
    %366 = arith.negf %365 : vector<2x128xf32>
    %367 = math.exp %366 : vector<2x128xf32>
    %cst_107 = arith.constant 1.000000e+00 : f32
    %368 = vector.broadcast %cst_107 : f32 to vector<2x128xf32>
    %369 = arith.addf %368, %367 : vector<2x128xf32>
    %370 = arith.divf %368, %369 : vector<2x128xf32>
    %371 = vector.extract_strided_slice %362 {offsets = [0, 128], sizes = [2, 128], strides = [1, 1]} : vector<2x384xf32> to vector<2x128xf32>
    %372 = vector.extract_strided_slice %360 {offsets = [0, 128], sizes = [2, 128], strides = [1, 1]} : vector<2x384xf32> to vector<2x128xf32>
    %373 = arith.addf %371, %372 : vector<2x128xf32>
    %374 = arith.negf %373 : vector<2x128xf32>
    %375 = math.exp %374 : vector<2x128xf32>
    %cst_108 = arith.constant 1.000000e+00 : f32
    %376 = vector.broadcast %cst_108 : f32 to vector<2x128xf32>
    %377 = arith.addf %376, %375 : vector<2x128xf32>
    %378 = arith.divf %376, %377 : vector<2x128xf32>
    %379 = vector.extract_strided_slice %362 {offsets = [0, 256], sizes = [2, 128], strides = [1, 1]} : vector<2x384xf32> to vector<2x128xf32>
    %380 = vector.extract_strided_slice %360 {offsets = [0, 256], sizes = [2, 128], strides = [1, 1]} : vector<2x384xf32> to vector<2x128xf32>
    %381 = arith.addf %380, %288 : vector<2x128xf32>
    %382 = arith.mulf %370, %381 : vector<2x128xf32>
    %383 = arith.addf %379, %382 : vector<2x128xf32>
    %384 = math.tanh %383 : vector<2x128xf32>
    %c2_109 = arith.constant 2 : index
    %c0_110 = arith.constant 0 : index
    %c0_111 = arith.constant 0 : index
    %385 = vector.load %arg6[%c2_109, %c0_110, %c0_111] : memref<10x2x96xf32, #tpu.memory_space<vmem>>, vector<1x2x96xf32>
    %386 = vector.shape_cast %385 : vector<1x2x96xf32> to vector<2x96xf32>
    %387 = vector.extract_strided_slice %378 {offsets = [0, 0], sizes = [2, 96], strides = [1, 1]} : vector<2x128xf32> to vector<2x96xf32>
    %cst_112 = arith.constant 1.000000e+00 : f32
    %388 = vector.broadcast %cst_112 : f32 to vector<2x96xf32>
    %389 = arith.subf %388, %387 : vector<2x96xf32>
    %390 = arith.mulf %386, %389 : vector<2x96xf32>
    %391 = vector.extract_strided_slice %384 {offsets = [0, 0], sizes = [2, 96], strides = [1, 1]} : vector<2x128xf32> to vector<2x96xf32>
    %392 = arith.subf %391, %359 : vector<2x96xf32>
    %393 = arith.mulf %390, %392 : vector<2x96xf32>
    %394 = arith.addf %359, %393 : vector<2x96xf32>
    %cst_113 = arith.constant dense<0.000000e+00> : vector<2x384xf32>
    %395 = tpu.matmul %394, %285, %cst_113 {dimension_numbers = #tpu.dot_dimension_numbers<[1], [0], [0], [1], [0, 0, 1, 1], [], []>} : vector<2x96xf32>, vector<96x384xf32>, vector<2x384xf32> -> vector<2x384xf32>
    %c3_114 = arith.constant 3 : index
    %c0_115 = arith.constant 0 : index
    %c0_116 = arith.constant 0 : index
    %396 = vector.load %arg5[%c3_114, %c0_115, %c0_116] : memref<10x2x384xf32, #tpu.memory_space<vmem>>, vector<1x2x384xf32>
    %397 = vector.shape_cast %396 : vector<1x2x384xf32> to vector<2x384xf32>
    %398 = vector.extract_strided_slice %397 {offsets = [0, 0], sizes = [2, 128], strides = [1, 1]} : vector<2x384xf32> to vector<2x128xf32>
    %399 = vector.extract_strided_slice %395 {offsets = [0, 0], sizes = [2, 128], strides = [1, 1]} : vector<2x384xf32> to vector<2x128xf32>
    %400 = arith.addf %398, %399 : vector<2x128xf32>
    %401 = arith.negf %400 : vector<2x128xf32>
    %402 = math.exp %401 : vector<2x128xf32>
    %cst_117 = arith.constant 1.000000e+00 : f32
    %403 = vector.broadcast %cst_117 : f32 to vector<2x128xf32>
    %404 = arith.addf %403, %402 : vector<2x128xf32>
    %405 = arith.divf %403, %404 : vector<2x128xf32>
    %406 = vector.extract_strided_slice %397 {offsets = [0, 128], sizes = [2, 128], strides = [1, 1]} : vector<2x384xf32> to vector<2x128xf32>
    %407 = vector.extract_strided_slice %395 {offsets = [0, 128], sizes = [2, 128], strides = [1, 1]} : vector<2x384xf32> to vector<2x128xf32>
    %408 = arith.addf %406, %407 : vector<2x128xf32>
    %409 = arith.negf %408 : vector<2x128xf32>
    %410 = math.exp %409 : vector<2x128xf32>
    %cst_118 = arith.constant 1.000000e+00 : f32
    %411 = vector.broadcast %cst_118 : f32 to vector<2x128xf32>
    %412 = arith.addf %411, %410 : vector<2x128xf32>
    %413 = arith.divf %411, %412 : vector<2x128xf32>
    %414 = vector.extract_strided_slice %397 {offsets = [0, 256], sizes = [2, 128], strides = [1, 1]} : vector<2x384xf32> to vector<2x128xf32>
    %415 = vector.extract_strided_slice %395 {offsets = [0, 256], sizes = [2, 128], strides = [1, 1]} : vector<2x384xf32> to vector<2x128xf32>
    %416 = arith.addf %415, %288 : vector<2x128xf32>
    %417 = arith.mulf %405, %416 : vector<2x128xf32>
    %418 = arith.addf %414, %417 : vector<2x128xf32>
    %419 = math.tanh %418 : vector<2x128xf32>
    %c3_119 = arith.constant 3 : index
    %c0_120 = arith.constant 0 : index
    %c0_121 = arith.constant 0 : index
    %420 = vector.load %arg6[%c3_119, %c0_120, %c0_121] : memref<10x2x96xf32, #tpu.memory_space<vmem>>, vector<1x2x96xf32>
    %421 = vector.shape_cast %420 : vector<1x2x96xf32> to vector<2x96xf32>
    %422 = vector.extract_strided_slice %413 {offsets = [0, 0], sizes = [2, 96], strides = [1, 1]} : vector<2x128xf32> to vector<2x96xf32>
    %cst_122 = arith.constant 1.000000e+00 : f32
    %423 = vector.broadcast %cst_122 : f32 to vector<2x96xf32>
    %424 = arith.subf %423, %422 : vector<2x96xf32>
    %425 = arith.mulf %421, %424 : vector<2x96xf32>
    %426 = vector.extract_strided_slice %419 {offsets = [0, 0], sizes = [2, 96], strides = [1, 1]} : vector<2x128xf32> to vector<2x96xf32>
    %427 = arith.subf %426, %394 : vector<2x96xf32>
    %428 = arith.mulf %425, %427 : vector<2x96xf32>
    %429 = arith.addf %394, %428 : vector<2x96xf32>
    %cst_123 = arith.constant dense<0.000000e+00> : vector<2x384xf32>
    %430 = tpu.matmul %429, %285, %cst_123 {dimension_numbers = #tpu.dot_dimension_numbers<[1], [0], [0], [1], [0, 0, 1, 1], [], []>} : vector<2x96xf32>, vector<96x384xf32>, vector<2x384xf32> -> vector<2x384xf32>
    %c4_124 = arith.constant 4 : index
    %c0_125 = arith.constant 0 : index
    %c0_126 = arith.constant 0 : index
    %431 = vector.load %arg5[%c4_124, %c0_125, %c0_126] : memref<10x2x384xf32, #tpu.memory_space<vmem>>, vector<1x2x384xf32>
    %432 = vector.shape_cast %431 : vector<1x2x384xf32> to vector<2x384xf32>
    %433 = vector.extract_strided_slice %432 {offsets = [0, 0], sizes = [2, 128], strides = [1, 1]} : vector<2x384xf32> to vector<2x128xf32>
    %434 = vector.extract_strided_slice %430 {offsets = [0, 0], sizes = [2, 128], strides = [1, 1]} : vector<2x384xf32> to vector<2x128xf32>
    %435 = arith.addf %433, %434 : vector<2x128xf32>
    %436 = arith.negf %435 : vector<2x128xf32>
    %437 = math.exp %436 : vector<2x128xf32>
    %cst_127 = arith.constant 1.000000e+00 : f32
    %438 = vector.broadcast %cst_127 : f32 to vector<2x128xf32>
    %439 = arith.addf %438, %437 : vector<2x128xf32>
    %440 = arith.divf %438, %439 : vector<2x128xf32>
    %441 = vector.extract_strided_slice %432 {offsets = [0, 128], sizes = [2, 128], strides = [1, 1]} : vector<2x384xf32> to vector<2x128xf32>
    %442 = vector.extract_strided_slice %430 {offsets = [0, 128], sizes = [2, 128], strides = [1, 1]} : vector<2x384xf32> to vector<2x128xf32>
    %443 = arith.addf %441, %442 : vector<2x128xf32>
    %444 = arith.negf %443 : vector<2x128xf32>
    %445 = math.exp %444 : vector<2x128xf32>
    %cst_128 = arith.constant 1.000000e+00 : f32
    %446 = vector.broadcast %cst_128 : f32 to vector<2x128xf32>
    %447 = arith.addf %446, %445 : vector<2x128xf32>
    %448 = arith.divf %446, %447 : vector<2x128xf32>
    %449 = vector.extract_strided_slice %432 {offsets = [0, 256], sizes = [2, 128], strides = [1, 1]} : vector<2x384xf32> to vector<2x128xf32>
    %450 = vector.extract_strided_slice %430 {offsets = [0, 256], sizes = [2, 128], strides = [1, 1]} : vector<2x384xf32> to vector<2x128xf32>
    %451 = arith.addf %450, %288 : vector<2x128xf32>
    %452 = arith.mulf %440, %451 : vector<2x128xf32>
    %453 = arith.addf %449, %452 : vector<2x128xf32>
    %454 = math.tanh %453 : vector<2x128xf32>
    %c4_129 = arith.constant 4 : index
    %c0_130 = arith.constant 0 : index
    %c0_131 = arith.constant 0 : index
    %455 = vector.load %arg6[%c4_129, %c0_130, %c0_131] : memref<10x2x96xf32, #tpu.memory_space<vmem>>, vector<1x2x96xf32>
    %456 = vector.shape_cast %455 : vector<1x2x96xf32> to vector<2x96xf32>
    %457 = vector.extract_strided_slice %448 {offsets = [0, 0], sizes = [2, 96], strides = [1, 1]} : vector<2x128xf32> to vector<2x96xf32>
    %cst_132 = arith.constant 1.000000e+00 : f32
    %458 = vector.broadcast %cst_132 : f32 to vector<2x96xf32>
    %459 = arith.subf %458, %457 : vector<2x96xf32>
    %460 = arith.mulf %456, %459 : vector<2x96xf32>
    %461 = vector.extract_strided_slice %454 {offsets = [0, 0], sizes = [2, 96], strides = [1, 1]} : vector<2x128xf32> to vector<2x96xf32>
    %462 = arith.subf %461, %429 : vector<2x96xf32>
    %463 = arith.mulf %460, %462 : vector<2x96xf32>
    %464 = arith.addf %429, %463 : vector<2x96xf32>
    %cst_133 = arith.constant dense<0.000000e+00> : vector<2x384xf32>
    %465 = tpu.matmul %464, %285, %cst_133 {dimension_numbers = #tpu.dot_dimension_numbers<[1], [0], [0], [1], [0, 0, 1, 1], [], []>} : vector<2x96xf32>, vector<96x384xf32>, vector<2x384xf32> -> vector<2x384xf32>
    %c5_134 = arith.constant 5 : index
    %c0_135 = arith.constant 0 : index
    %c0_136 = arith.constant 0 : index
    %466 = vector.load %arg5[%c5_134, %c0_135, %c0_136] : memref<10x2x384xf32, #tpu.memory_space<vmem>>, vector<1x2x384xf32>
    %467 = vector.shape_cast %466 : vector<1x2x384xf32> to vector<2x384xf32>
    %468 = vector.extract_strided_slice %467 {offsets = [0, 0], sizes = [2, 128], strides = [1, 1]} : vector<2x384xf32> to vector<2x128xf32>
    %469 = vector.extract_strided_slice %465 {offsets = [0, 0], sizes = [2, 128], strides = [1, 1]} : vector<2x384xf32> to vector<2x128xf32>
    %470 = arith.addf %468, %469 : vector<2x128xf32>
    %471 = arith.negf %470 : vector<2x128xf32>
    %472 = math.exp %471 : vector<2x128xf32>
    %cst_137 = arith.constant 1.000000e+00 : f32
    %473 = vector.broadcast %cst_137 : f32 to vector<2x128xf32>
    %474 = arith.addf %473, %472 : vector<2x128xf32>
    %475 = arith.divf %473, %474 : vector<2x128xf32>
    %476 = vector.extract_strided_slice %467 {offsets = [0, 128], sizes = [2, 128], strides = [1, 1]} : vector<2x384xf32> to vector<2x128xf32>
    %477 = vector.extract_strided_slice %465 {offsets = [0, 128], sizes = [2, 128], strides = [1, 1]} : vector<2x384xf32> to vector<2x128xf32>
    %478 = arith.addf %476, %477 : vector<2x128xf32>
    %479 = arith.negf %478 : vector<2x128xf32>
    %480 = math.exp %479 : vector<2x128xf32>
    %cst_138 = arith.constant 1.000000e+00 : f32
    %481 = vector.broadcast %cst_138 : f32 to vector<2x128xf32>
    %482 = arith.addf %481, %480 : vector<2x128xf32>
    %483 = arith.divf %481, %482 : vector<2x128xf32>
    %484 = vector.extract_strided_slice %467 {offsets = [0, 256], sizes = [2, 128], strides = [1, 1]} : vector<2x384xf32> to vector<2x128xf32>
    %485 = vector.extract_strided_slice %465 {offsets = [0, 256], sizes = [2, 128], strides = [1, 1]} : vector<2x384xf32> to vector<2x128xf32>
    %486 = arith.addf %485, %288 : vector<2x128xf32>
    %487 = arith.mulf %475, %486 : vector<2x128xf32>
    %488 = arith.addf %484, %487 : vector<2x128xf32>
    %489 = math.tanh %488 : vector<2x128xf32>
    %c5_139 = arith.constant 5 : index
    %c0_140 = arith.constant 0 : index
    %c0_141 = arith.constant 0 : index
    %490 = vector.load %arg6[%c5_139, %c0_140, %c0_141] : memref<10x2x96xf32, #tpu.memory_space<vmem>>, vector<1x2x96xf32>
    %491 = vector.shape_cast %490 : vector<1x2x96xf32> to vector<2x96xf32>
    %492 = vector.extract_strided_slice %483 {offsets = [0, 0], sizes = [2, 96], strides = [1, 1]} : vector<2x128xf32> to vector<2x96xf32>
    %cst_142 = arith.constant 1.000000e+00 : f32
    %493 = vector.broadcast %cst_142 : f32 to vector<2x96xf32>
    %494 = arith.subf %493, %492 : vector<2x96xf32>
    %495 = arith.mulf %491, %494 : vector<2x96xf32>
    %496 = vector.extract_strided_slice %489 {offsets = [0, 0], sizes = [2, 96], strides = [1, 1]} : vector<2x128xf32> to vector<2x96xf32>
    %497 = arith.subf %496, %464 : vector<2x96xf32>
    %498 = arith.mulf %495, %497 : vector<2x96xf32>
    %499 = arith.addf %464, %498 : vector<2x96xf32>
    %cst_143 = arith.constant dense<0.000000e+00> : vector<2x384xf32>
    %500 = tpu.matmul %499, %285, %cst_143 {dimension_numbers = #tpu.dot_dimension_numbers<[1], [0], [0], [1], [0, 0, 1, 1], [], []>} : vector<2x96xf32>, vector<96x384xf32>, vector<2x384xf32> -> vector<2x384xf32>
    %c6_144 = arith.constant 6 : index
    %c0_145 = arith.constant 0 : index
    %c0_146 = arith.constant 0 : index
    %501 = vector.load %arg5[%c6_144, %c0_145, %c0_146] : memref<10x2x384xf32, #tpu.memory_space<vmem>>, vector<1x2x384xf32>
    %502 = vector.shape_cast %501 : vector<1x2x384xf32> to vector<2x384xf32>
    %503 = vector.extract_strided_slice %502 {offsets = [0, 0], sizes = [2, 128], strides = [1, 1]} : vector<2x384xf32> to vector<2x128xf32>
    %504 = vector.extract_strided_slice %500 {offsets = [0, 0], sizes = [2, 128], strides = [1, 1]} : vector<2x384xf32> to vector<2x128xf32>
    %505 = arith.addf %503, %504 : vector<2x128xf32>
    %506 = arith.negf %505 : vector<2x128xf32>
    %507 = math.exp %506 : vector<2x128xf32>
    %cst_147 = arith.constant 1.000000e+00 : f32
    %508 = vector.broadcast %cst_147 : f32 to vector<2x128xf32>
    %509 = arith.addf %508, %507 : vector<2x128xf32>
    %510 = arith.divf %508, %509 : vector<2x128xf32>
    %511 = vector.extract_strided_slice %502 {offsets = [0, 128], sizes = [2, 128], strides = [1, 1]} : vector<2x384xf32> to vector<2x128xf32>
    %512 = vector.extract_strided_slice %500 {offsets = [0, 128], sizes = [2, 128], strides = [1, 1]} : vector<2x384xf32> to vector<2x128xf32>
    %513 = arith.addf %511, %512 : vector<2x128xf32>
    %514 = arith.negf %513 : vector<2x128xf32>
    %515 = math.exp %514 : vector<2x128xf32>
    %cst_148 = arith.constant 1.000000e+00 : f32
    %516 = vector.broadcast %cst_148 : f32 to vector<2x128xf32>
    %517 = arith.addf %516, %515 : vector<2x128xf32>
    %518 = arith.divf %516, %517 : vector<2x128xf32>
    %519 = vector.extract_strided_slice %502 {offsets = [0, 256], sizes = [2, 128], strides = [1, 1]} : vector<2x384xf32> to vector<2x128xf32>
    %520 = vector.extract_strided_slice %500 {offsets = [0, 256], sizes = [2, 128], strides = [1, 1]} : vector<2x384xf32> to vector<2x128xf32>
    %521 = arith.addf %520, %288 : vector<2x128xf32>
    %522 = arith.mulf %510, %521 : vector<2x128xf32>
    %523 = arith.addf %519, %522 : vector<2x128xf32>
    %524 = math.tanh %523 : vector<2x128xf32>
    %c6_149 = arith.constant 6 : index
    %c0_150 = arith.constant 0 : index
    %c0_151 = arith.constant 0 : index
    %525 = vector.load %arg6[%c6_149, %c0_150, %c0_151] : memref<10x2x96xf32, #tpu.memory_space<vmem>>, vector<1x2x96xf32>
    %526 = vector.shape_cast %525 : vector<1x2x96xf32> to vector<2x96xf32>
    %527 = vector.extract_strided_slice %518 {offsets = [0, 0], sizes = [2, 96], strides = [1, 1]} : vector<2x128xf32> to vector<2x96xf32>
    %cst_152 = arith.constant 1.000000e+00 : f32
    %528 = vector.broadcast %cst_152 : f32 to vector<2x96xf32>
    %529 = arith.subf %528, %527 : vector<2x96xf32>
    %530 = arith.mulf %526, %529 : vector<2x96xf32>
    %531 = vector.extract_strided_slice %524 {offsets = [0, 0], sizes = [2, 96], strides = [1, 1]} : vector<2x128xf32> to vector<2x96xf32>
    %532 = arith.subf %531, %499 : vector<2x96xf32>
    %533 = arith.mulf %530, %532 : vector<2x96xf32>
    %534 = arith.addf %499, %533 : vector<2x96xf32>
    %cst_153 = arith.constant dense<0.000000e+00> : vector<2x384xf32>
    %535 = tpu.matmul %534, %285, %cst_153 {dimension_numbers = #tpu.dot_dimension_numbers<[1], [0], [0], [1], [0, 0, 1, 1], [], []>} : vector<2x96xf32>, vector<96x384xf32>, vector<2x384xf32> -> vector<2x384xf32>
    %c7_154 = arith.constant 7 : index
    %c0_155 = arith.constant 0 : index
    %c0_156 = arith.constant 0 : index
    %536 = vector.load %arg5[%c7_154, %c0_155, %c0_156] : memref<10x2x384xf32, #tpu.memory_space<vmem>>, vector<1x2x384xf32>
    %537 = vector.shape_cast %536 : vector<1x2x384xf32> to vector<2x384xf32>
    %538 = vector.extract_strided_slice %537 {offsets = [0, 0], sizes = [2, 128], strides = [1, 1]} : vector<2x384xf32> to vector<2x128xf32>
    %539 = vector.extract_strided_slice %535 {offsets = [0, 0], sizes = [2, 128], strides = [1, 1]} : vector<2x384xf32> to vector<2x128xf32>
    %540 = arith.addf %538, %539 : vector<2x128xf32>
    %541 = arith.negf %540 : vector<2x128xf32>
    %542 = math.exp %541 : vector<2x128xf32>
    %cst_157 = arith.constant 1.000000e+00 : f32
    %543 = vector.broadcast %cst_157 : f32 to vector<2x128xf32>
    %544 = arith.addf %543, %542 : vector<2x128xf32>
    %545 = arith.divf %543, %544 : vector<2x128xf32>
    %546 = vector.extract_strided_slice %537 {offsets = [0, 128], sizes = [2, 128], strides = [1, 1]} : vector<2x384xf32> to vector<2x128xf32>
    %547 = vector.extract_strided_slice %535 {offsets = [0, 128], sizes = [2, 128], strides = [1, 1]} : vector<2x384xf32> to vector<2x128xf32>
    %548 = arith.addf %546, %547 : vector<2x128xf32>
    %549 = arith.negf %548 : vector<2x128xf32>
    %550 = math.exp %549 : vector<2x128xf32>
    %cst_158 = arith.constant 1.000000e+00 : f32
    %551 = vector.broadcast %cst_158 : f32 to vector<2x128xf32>
    %552 = arith.addf %551, %550 : vector<2x128xf32>
    %553 = arith.divf %551, %552 : vector<2x128xf32>
    %554 = vector.extract_strided_slice %537 {offsets = [0, 256], sizes = [2, 128], strides = [1, 1]} : vector<2x384xf32> to vector<2x128xf32>
    %555 = vector.extract_strided_slice %535 {offsets = [0, 256], sizes = [2, 128], strides = [1, 1]} : vector<2x384xf32> to vector<2x128xf32>
    %556 = arith.addf %555, %288 : vector<2x128xf32>
    %557 = arith.mulf %545, %556 : vector<2x128xf32>
    %558 = arith.addf %554, %557 : vector<2x128xf32>
    %559 = math.tanh %558 : vector<2x128xf32>
    %c7_159 = arith.constant 7 : index
    %c0_160 = arith.constant 0 : index
    %c0_161 = arith.constant 0 : index
    %560 = vector.load %arg6[%c7_159, %c0_160, %c0_161] : memref<10x2x96xf32, #tpu.memory_space<vmem>>, vector<1x2x96xf32>
    %561 = vector.shape_cast %560 : vector<1x2x96xf32> to vector<2x96xf32>
    %562 = vector.extract_strided_slice %553 {offsets = [0, 0], sizes = [2, 96], strides = [1, 1]} : vector<2x128xf32> to vector<2x96xf32>
    %cst_162 = arith.constant 1.000000e+00 : f32
    %563 = vector.broadcast %cst_162 : f32 to vector<2x96xf32>
    %564 = arith.subf %563, %562 : vector<2x96xf32>
    %565 = arith.mulf %561, %564 : vector<2x96xf32>
    %566 = vector.extract_strided_slice %559 {offsets = [0, 0], sizes = [2, 96], strides = [1, 1]} : vector<2x128xf32> to vector<2x96xf32>
    %567 = arith.subf %566, %534 : vector<2x96xf32>
    %568 = arith.mulf %565, %567 : vector<2x96xf32>
    %569 = arith.addf %534, %568 : vector<2x96xf32>
    %cst_163 = arith.constant dense<0.000000e+00> : vector<2x384xf32>
    %570 = tpu.matmul %569, %285, %cst_163 {dimension_numbers = #tpu.dot_dimension_numbers<[1], [0], [0], [1], [0, 0, 1, 1], [], []>} : vector<2x96xf32>, vector<96x384xf32>, vector<2x384xf32> -> vector<2x384xf32>
    %c8 = arith.constant 8 : index
    %c0_164 = arith.constant 0 : index
    %c0_165 = arith.constant 0 : index
    %571 = vector.load %arg5[%c8, %c0_164, %c0_165] : memref<10x2x384xf32, #tpu.memory_space<vmem>>, vector<1x2x384xf32>
    %572 = vector.shape_cast %571 : vector<1x2x384xf32> to vector<2x384xf32>
    %573 = vector.extract_strided_slice %572 {offsets = [0, 0], sizes = [2, 128], strides = [1, 1]} : vector<2x384xf32> to vector<2x128xf32>
    %574 = vector.extract_strided_slice %570 {offsets = [0, 0], sizes = [2, 128], strides = [1, 1]} : vector<2x384xf32> to vector<2x128xf32>
    %575 = arith.addf %573, %574 : vector<2x128xf32>
    %576 = arith.negf %575 : vector<2x128xf32>
    %577 = math.exp %576 : vector<2x128xf32>
    %cst_166 = arith.constant 1.000000e+00 : f32
    %578 = vector.broadcast %cst_166 : f32 to vector<2x128xf32>
    %579 = arith.addf %578, %577 : vector<2x128xf32>
    %580 = arith.divf %578, %579 : vector<2x128xf32>
    %581 = vector.extract_strided_slice %572 {offsets = [0, 128], sizes = [2, 128], strides = [1, 1]} : vector<2x384xf32> to vector<2x128xf32>
    %582 = vector.extract_strided_slice %570 {offsets = [0, 128], sizes = [2, 128], strides = [1, 1]} : vector<2x384xf32> to vector<2x128xf32>
    %583 = arith.addf %581, %582 : vector<2x128xf32>
    %584 = arith.negf %583 : vector<2x128xf32>
    %585 = math.exp %584 : vector<2x128xf32>
    %cst_167 = arith.constant 1.000000e+00 : f32
    %586 = vector.broadcast %cst_167 : f32 to vector<2x128xf32>
    %587 = arith.addf %586, %585 : vector<2x128xf32>
    %588 = arith.divf %586, %587 : vector<2x128xf32>
    %589 = vector.extract_strided_slice %572 {offsets = [0, 256], sizes = [2, 128], strides = [1, 1]} : vector<2x384xf32> to vector<2x128xf32>
    %590 = vector.extract_strided_slice %570 {offsets = [0, 256], sizes = [2, 128], strides = [1, 1]} : vector<2x384xf32> to vector<2x128xf32>
    %591 = arith.addf %590, %288 : vector<2x128xf32>
    %592 = arith.mulf %580, %591 : vector<2x128xf32>
    %593 = arith.addf %589, %592 : vector<2x128xf32>
    %594 = math.tanh %593 : vector<2x128xf32>
    %c8_168 = arith.constant 8 : index
    %c0_169 = arith.constant 0 : index
    %c0_170 = arith.constant 0 : index
    %595 = vector.load %arg6[%c8_168, %c0_169, %c0_170] : memref<10x2x96xf32, #tpu.memory_space<vmem>>, vector<1x2x96xf32>
    %596 = vector.shape_cast %595 : vector<1x2x96xf32> to vector<2x96xf32>
    %597 = vector.extract_strided_slice %588 {offsets = [0, 0], sizes = [2, 96], strides = [1, 1]} : vector<2x128xf32> to vector<2x96xf32>
    %cst_171 = arith.constant 1.000000e+00 : f32
    %598 = vector.broadcast %cst_171 : f32 to vector<2x96xf32>
    %599 = arith.subf %598, %597 : vector<2x96xf32>
    %600 = arith.mulf %596, %599 : vector<2x96xf32>
    %601 = vector.extract_strided_slice %594 {offsets = [0, 0], sizes = [2, 96], strides = [1, 1]} : vector<2x128xf32> to vector<2x96xf32>
    %602 = arith.subf %601, %569 : vector<2x96xf32>
    %603 = arith.mulf %600, %602 : vector<2x96xf32>
    %604 = arith.addf %569, %603 : vector<2x96xf32>
    %cst_172 = arith.constant dense<0.000000e+00> : vector<2x384xf32>
    %605 = tpu.matmul %604, %285, %cst_172 {dimension_numbers = #tpu.dot_dimension_numbers<[1], [0], [0], [1], [0, 0, 1, 1], [], []>} : vector<2x96xf32>, vector<96x384xf32>, vector<2x384xf32> -> vector<2x384xf32>
    %c9 = arith.constant 9 : index
    %c0_173 = arith.constant 0 : index
    %c0_174 = arith.constant 0 : index
    %606 = vector.load %arg5[%c9, %c0_173, %c0_174] : memref<10x2x384xf32, #tpu.memory_space<vmem>>, vector<1x2x384xf32>
    %607 = vector.shape_cast %606 : vector<1x2x384xf32> to vector<2x384xf32>
    %608 = vector.extract_strided_slice %607 {offsets = [0, 0], sizes = [2, 128], strides = [1, 1]} : vector<2x384xf32> to vector<2x128xf32>
    %609 = vector.extract_strided_slice %605 {offsets = [0, 0], sizes = [2, 128], strides = [1, 1]} : vector<2x384xf32> to vector<2x128xf32>
    %610 = arith.addf %608, %609 : vector<2x128xf32>
    %611 = arith.negf %610 : vector<2x128xf32>
    %612 = math.exp %611 : vector<2x128xf32>
    %cst_175 = arith.constant 1.000000e+00 : f32
    %613 = vector.broadcast %cst_175 : f32 to vector<2x128xf32>
    %614 = arith.addf %613, %612 : vector<2x128xf32>
    %615 = arith.divf %613, %614 : vector<2x128xf32>
    %616 = vector.extract_strided_slice %607 {offsets = [0, 128], sizes = [2, 128], strides = [1, 1]} : vector<2x384xf32> to vector<2x128xf32>
    %617 = vector.extract_strided_slice %605 {offsets = [0, 128], sizes = [2, 128], strides = [1, 1]} : vector<2x384xf32> to vector<2x128xf32>
    %618 = arith.addf %616, %617 : vector<2x128xf32>
    %619 = arith.negf %618 : vector<2x128xf32>
    %620 = math.exp %619 : vector<2x128xf32>
    %cst_176 = arith.constant 1.000000e+00 : f32
    %621 = vector.broadcast %cst_176 : f32 to vector<2x128xf32>
    %622 = arith.addf %621, %620 : vector<2x128xf32>
    %623 = arith.divf %621, %622 : vector<2x128xf32>
    %624 = vector.extract_strided_slice %607 {offsets = [0, 256], sizes = [2, 128], strides = [1, 1]} : vector<2x384xf32> to vector<2x128xf32>
    %625 = vector.extract_strided_slice %605 {offsets = [0, 256], sizes = [2, 128], strides = [1, 1]} : vector<2x384xf32> to vector<2x128xf32>
    %626 = arith.addf %625, %288 : vector<2x128xf32>
    %627 = arith.mulf %615, %626 : vector<2x128xf32>
    %628 = arith.addf %624, %627 : vector<2x128xf32>
    %629 = math.tanh %628 : vector<2x128xf32>
    %c9_177 = arith.constant 9 : index
    %c0_178 = arith.constant 0 : index
    %c0_179 = arith.constant 0 : index
    %630 = vector.load %arg6[%c9_177, %c0_178, %c0_179] : memref<10x2x96xf32, #tpu.memory_space<vmem>>, vector<1x2x96xf32>
    %631 = vector.shape_cast %630 : vector<1x2x96xf32> to vector<2x96xf32>
    %632 = vector.extract_strided_slice %623 {offsets = [0, 0], sizes = [2, 96], strides = [1, 1]} : vector<2x128xf32> to vector<2x96xf32>
    %cst_180 = arith.constant 1.000000e+00 : f32
    %633 = vector.broadcast %cst_180 : f32 to vector<2x96xf32>
    %634 = arith.subf %633, %632 : vector<2x96xf32>
    %635 = arith.mulf %631, %634 : vector<2x96xf32>
    %636 = vector.extract_strided_slice %629 {offsets = [0, 0], sizes = [2, 96], strides = [1, 1]} : vector<2x128xf32> to vector<2x96xf32>
    %637 = arith.subf %636, %604 : vector<2x96xf32>
    %638 = arith.mulf %635, %637 : vector<2x96xf32>
    %639 = arith.addf %604, %638 : vector<2x96xf32>
    %c0_181 = arith.constant 0 : index
    %c0_182 = arith.constant 0 : index
    %640 = vector.load %arg10[%c0_181, %c0_182] : memref<64x64xf32, #tpu.memory_space<vmem>>, vector<64x64xf32>
    %cst_183 = arith.constant dense<0.000000e+00> : vector<2x64xf32>
    %641 = tpu.matmul %284, %640, %cst_183 {dimension_numbers = #tpu.dot_dimension_numbers<[1], [0], [0], [1], [0, 0, 1, 1], [], []>} : vector<2x64xf32>, vector<64x64xf32>, vector<2x64xf32> -> vector<2x64xf32>
    %c0_184 = arith.constant 0 : index
    %c0_185 = arith.constant 0 : index
    %642 = vector.load %arg11[%c0_184, %c0_185] : memref<96x64xf32, #tpu.memory_space<vmem>>, vector<96x64xf32>
    %cst_186 = arith.constant dense<0.000000e+00> : vector<2x64xf32>
    %643 = tpu.matmul %639, %642, %cst_186 {dimension_numbers = #tpu.dot_dimension_numbers<[1], [0], [0], [1], [0, 0, 1, 1], [], []>} : vector<2x96xf32>, vector<96x64xf32>, vector<2x64xf32> -> vector<2x64xf32>
    %644 = arith.addf %641, %643 : vector<2x64xf32>
    %c0_187 = arith.constant 0 : index
    %c0_188 = arith.constant 0 : index
    %645 = vector.load %arg12[%c0_187, %c0_188] : memref<1x64xf32, #tpu.memory_space<vmem>>, vector<1x64xf32>
    %646 = vector.broadcast %645 : vector<1x64xf32> to vector<2x64xf32>
    %647 = arith.addf %644, %646 : vector<2x64xf32>
    %cst_189 = arith.constant 0.000000e+00 : f32
    %648 = vector.broadcast %cst_189 : f32 to vector<2x64xf32>
    %649 = arith.maximumf %647, %648 : vector<2x64xf32>
    %c0_190 = arith.constant 0 : index
    %c0_191 = arith.constant 0 : index
    %650 = vector.load %arg13[%c0_190, %c0_191] : memref<64x3xf32, #tpu.memory_space<vmem>>, vector<64x3xf32>
    %cst_192 = arith.constant dense<0.000000e+00> : vector<2x3xf32>
    %651 = tpu.matmul %649, %650, %cst_192 {dimension_numbers = #tpu.dot_dimension_numbers<[1], [0], [0], [1], [0, 0, 1, 1], [], []>} : vector<2x64xf32>, vector<64x3xf32>, vector<2x3xf32> -> vector<2x3xf32>
    %c0_193 = arith.constant 0 : index
    %c0_194 = arith.constant 0 : index
    %652 = vector.load %arg14[%c0_193, %c0_194] : memref<1x3xf32, #tpu.memory_space<vmem>>, vector<1x3xf32>
    %653 = vector.broadcast %652 : vector<1x3xf32> to vector<2x3xf32>
    %654 = arith.addf %651, %653 : vector<2x3xf32>
    %c0_195 = arith.constant 0 : index
    %c0_196 = arith.constant 0 : index
    %655 = vector.load %arg15[%c0_195, %c0_196] : memref<2x3xf32, #tpu.memory_space<vmem>>, vector<2x3xf32>
    tpu.vector_store %arg15[%c0_195, %c0_196], %654 {strides = array<i32>} : memref<2x3xf32, #tpu.memory_space<vmem>>, vector<2x3xf32>,
    return
  }
}

</mosaic_0001>

<bundles_post_ra>
// kernel: rnn_encoder_forward.1
= control target key start
LH: loop header
LB: loop body
LE: loop exit
PB: predicated region body
PF: predicated region fallthrough
CT: control target
= control target key end

     0   :  { %v4646_v4 = vmov 0.0   ;;  %vm4647_vm0 = vmmov 0   ;;  %s6425_s0 = inlined_call_operand.vmem [shape: f32[8,2,384], index: 0, kind: input, shape index: {}]   ;;  %s6426_s1 = inlined_call_operand.vmem [shape: f32[8,2,64], index: 1, kind: input, shape index: {}]   ;;  %s6427_s2 = inlined_call_operand.vmem [shape: f32[64,384], index: 2, kind: input, shape index: {}]   ;;  %s6428_s3 = inlined_call_operand.vmem [shape: f32[1,128], index: 3, kind: input, shape index: {}]   ;;  %s6429_s4 = inlined_call_operand.vmem [shape: f32[2,64], index: 4, kind: input, shape index: {}]   ;;  %s6430_s5 = inlined_call_operand.vmem [shape: f32[10,2,384], index: 5, kind: input, shape index: {}]   ;;  %s6431_s6 = inlined_call_operand.vmem [shape: f32[10,2,96], index: 6, kind: input, shape index: {}]   ;;  %s6432_s7 = inlined_call_operand.vmem [shape: f32[96,384], index: 7, kind: input, shape index: {}]   ;;  %s6433_s8 = inlined_call_operand.vmem [shape: f32[1,128], index: 8, kind: input, shape index: {}]   ;;  %s6434_s9 = inlined_call_operand.vmem [shape: f32[2,96], index: 9, kind: input, shape index: {}]   ;;  %s6435_s10 = inlined_call_operand.vmem [shape: f32[64,64], index: 10, kind: input, shape index: {}]   ;;  %s6436_s11 = inlined_call_operand.vmem [shape: f32[96,64], index: 11, kind: input, shape index: {}]   ;;  %s6437_s12 = inlined_call_operand.vmem [shape: f32[1,64], index: 12, kind: input, shape index: {}]   ;;  %s6438_s13 = inlined_call_operand.vmem [shape: f32[64,3], index: 13, kind: input, shape index: {}]   ;;  %s6439_s14 = inlined_call_operand.vmem [shape: f32[1,3], index: 14, kind: input, shape index: {}]   ;;  %s6440_s15 = inlined_call_operand.hbm [shape: f32[2,3], index: 15, kind: output, shape index: {}]  }
   0x1   :  { %v4732_v0 = vld [vmem:[%s6427_s2 + $0xb0] sm:$0xff]  ;;  %v4737_v1 = vld [vmem:[%s6427_s2 + $0xa8] sm:$0xff]  ;;  %v4742_v2 = vld [vmem:[%s6427_s2 + $0x98] sm:$0xff]  ;;  %151 = vmatprep.mubr.f32.mxu0 %v4646_v4  ;;  %3916 = vmatprep.subr.mxu1 %v4646_v4 }
   0x2   :  { %103 = vmatprep.subr.mxu0 %v4732_v0  ;;  %v4748_v3 = vld [vmem:[%s6427_s2 + $0x90] sm:$0xff]  ;;  %v4755_v5 = vld [vmem:[%s6427_s2 + $0x80] sm:$0xff]  ;;  %v4762_v6 = vld [vmem:[%s6427_s2 + $0x78] sm:$0xff]  ;;  %3932 = vmatprep.mubr.msk.f32.mxu1 %vm4647_vm0, %v4646_v4 }
   0x3   :  { %104 = vmatpush1.msra.mxu0 %v4737_v1  ;;  %v4770_v7 = vld [vmem:[%s6427_s2 + $0x68] sm:$0xff]  ;;  %v4776_v8 = vld [vmem:[%s6427_s2 + $0x60] sm:$0xff]  ;;  %v4781_v9 = vld [vmem:[%s6427_s2 + $0xb8] sm:$0xff] }
   0x4   :  { %105 = vmatprep.subr.mxu0 %v4742_v2  ;;  %v4787_v10 = vld [vmem:[%s6427_s2 + $0x50] sm:$0xff]  ;;  %3917 = vmatpush3.msra.mxu1 %v4781_v9  ;;  %v4793_v11 = vld [vmem:[%s6427_s2 + $0xa0] sm:$0xff]  ;;  %v4799_v12 = vld [vmem:[%s6427_s2 + $0x48] sm:$0xff] }
   0x5   :  { %106 = vmatpush1.msra.mxu0 %v4748_v3  ;;  %3918 = vmatprep.subr.mxu1 %v4646_v4  ;;  %v4805_v13 = vld [vmem:[%s6427_s2 + $0x88] sm:$0xff]  ;;  %v4811_v14 = vld [vmem:[%s6427_s2 + $0x38] sm:$0xff] }
   0x6   :  { %107 = vmatprep.subr.mxu0 %v4755_v5  ;;  %3919 = vmatpush3.msra.mxu1 %v4793_v11 }
   0x7   :  { %108 = vmatpush1.msra.mxu0 %v4762_v6 }
   0x8   :  { %109 = vmatprep.subr.mxu0 %v4770_v7 }
   0x9   :  { %110 = vmatpush1.msra.mxu0 %v4776_v8 }
   0xa   :  { %20 = vsyncpa [#allocation3], 0  ;;  %111 = vmatprep.subr.mxu0 %v4787_v10  ;;  %v4818_v15 = vld [vmem:[%s6427_s2 + $0x30] sm:$0xff]  ;;  %3920 = vmatprep.subr.mxu1 %v4646_v4  ;;  %v4830_v17 = vld [vmem:[%s6427_s2 + $0x20] sm:$0xff]  ;;  %vm83_vm1 = vcmask 523264   ;;  %vm1534_vm2 = vcmask 785408  }
   0xb   :  { %v4824_v16 = vld [vmem:[%s6427_s2 + $0x70] sm:$0xff]  ;;  %112 = vmatpush1.msra.mxu0 %v4799_v12  ;;  %3921 = vmatpush3.msra.mxu1 %v4805_v13  ;;  %v4837_v18 = vld [vmem:[%s6427_s2 + $0x18] sm:$0xff]  ;;  %v4849_v20 = vld [vmem:[%s6427_s2 + $0x8] sm:$0xff]  ;;  %s4648_s24 = smov [#allocation2]   ;;  %vm3556_vm3 = vcmask 17408  }
   0xc   :  { %113 = vmatprep.subr.mxu0 %v4811_v14  ;;  %3922 = vmatprep.subr.mxu1 %v4646_v4  ;;  %v4843_v19 = vld [vmem:[%s6427_s2 + $0x58] sm:$0xff]  ;;  %v4856_v21 = vld [vmem:[%s6427_s2] sm:$0xff]  ;;  %v4876_v24 = vld [vmem:[%s6427_s2 + $0x28] sm:$0xff] }
   0xd   :  { %114 = vmatpush1.msra.mxu0 %v4818_v15  ;;  %3923 = vmatpush3.msra.mxu1 %v4824_v16  ;;  %v4862_v22 = vld [vmem:[%s6427_s2 + $0x40] sm:$0xff]  ;;  %v4886_v25 = vld [vmem:[%s6427_s2 + $0x10] sm:$0xff] }
   0xe   :  { %115 = vmatprep.subr.mxu0 %v4830_v17  ;;  %3924 = vmatprep.subr.mxu1 %v4646_v4  ;;  %v4868_v23 = vld [vmem:[%s6429_s4] sm:$0x3]  ;;  %v3579_v54 = vld [vmem:[%s6425_s0 + $0x6] sm:$0x3f] }
   0xf   :  { %116 = vmatpush1.msra.mxu0 %v4837_v18  ;;  %3925 = vmatpush3.msra.mxu1 %v4843_v19  ;;  %v228_v26 = vld [vmem:[%s6425_s0] sm:$0x3f]  ;;  %v412_v58 = vrot.slane %v3579_v54, 2 }
  0x10   :  { %117 = vmatprep.subr.mxu0 %v4849_v20  ;;  %3926 = vmatprep.subr.mxu1 %v4646_v4  ;;  %v237_v29 = vrot.slane %v228_v26, 2  ;;  %v4936_v39 = vld [vmem:[%s6428_s3] ss:$0 sm:$0xff]  ;;  %v248_v42 = vrot.slane %v228_v26, 4 }
  0x11   :  { %118 = vmatpush1.msra.mxu0 %v4856_v21  ;;  %3927 = vmatpush3.msra.mxu1 %v4862_v22  ;;  %v252_v48 = vld [vmem:[%s6426_s1] sm:$0x3] }
  0x12   :  { %3573 = vmatmul.mubr.msk.f32.vlgmr.msra.gmra.mxu0 %vm83_vm1, %v4868_v23  ;;  %3928 = vmatprep.subr.mxu1 %v4646_v4 }
  0x13   :  { %3929 = vmatpush3.msra.mxu1 %v4876_v24  ;;  %277 = vmatprep.subr.mxu0 %v4732_v0 }
  0x14   :  { %3930 = vmatprep.subr.mxu1 %v4646_v4  ;;  %278 = vmatpush1.msra.mxu0 %v4737_v1 }
  0x15   :  { %3931 = vmatpush3.msra.mxu1 %v4886_v25  ;;  %279 = vmatprep.subr.mxu0 %v4742_v2 }
  0x16   :  { %3933 = vmatmul.mubr.msk.f32.vlgmr.msra.gmra.mxu1 %vm83_vm1, %v4868_v23  ;;  %3935 = vmatprep.subr.mxu1 %v4646_v4 }
  0x17   :  { %3936 = vmatpush3.msra.mxu1 %v4781_v9  ;;  %280 = vmatpush1.msra.mxu0 %v4748_v3 }
  0x18   :  { %3937 = vmatprep.subr.mxu1 %v4646_v4  ;;  %281 = vmatprep.subr.mxu0 %v4755_v5 }
  0x19   :  { %3938 = vmatpush3.msra.mxu1 %v4793_v11  ;;  %282 = vmatpush1.msra.mxu0 %v4762_v6 }
  0x1a   :  { %3939 = vmatprep.subr.mxu1 %v4646_v4  ;;  %283 = vmatprep.subr.mxu0 %v4770_v7 }
  0x1b   :  { %3940 = vmatpush3.msra.mxu1 %v4805_v13  ;;  %284 = vmatpush1.msra.mxu0 %v4776_v8 }
  0x1c   :  { %3941 = vmatprep.subr.mxu1 %v4646_v4  ;;  %285 = vmatprep.subr.mxu0 %v4787_v10 }
  0x1d   :  { %3942 = vmatpush3.msra.mxu1 %v4824_v16  ;;  %286 = vmatpush1.msra.mxu0 %v4799_v12 }
  0x1e   :  { %3943 = vmatprep.subr.mxu1 %v4646_v4  ;;  %287 = vmatprep.subr.mxu0 %v4811_v14 }
  0x1f   :  { %3944 = vmatpush3.msra.mxu1 %v4843_v19  ;;  %288 = vmatpush1.msra.mxu0 %v4818_v15 }
  0x20   :  { %3945 = vmatprep.subr.mxu1 %v4646_v4  ;;  %289 = vmatprep.subr.mxu0 %v4830_v17 }
  0x21   :  { %3946 = vmatpush3.msra.mxu1 %v4862_v22  ;;  %290 = vmatpush1.msra.mxu0 %v4837_v18 }
  0x22   :  { %3947 = vmatprep.subr.mxu1 %v4646_v4  ;;  %291 = vmatprep.subr.mxu0 %v4849_v20 }
  0x23   :  { %3948 = vmatpush3.msra.mxu1 %v4876_v24  ;;  %292 = vmatpush1.msra.mxu0 %v4856_v21 }
  0x24   :  { %3949 = vmatprep.subr.mxu1 %v4646_v4  ;;  %325 = vmatprep.mubr.f32.mxu0 %v4646_v4 }
  0x25   :  { %3950 = vmatpush3.msra.mxu1 %v4886_v25  ;;  %3951 = vmatprep.mubr.msk.f32.mxu1 %vm4647_vm0, %v4646_v4 }
  0x26   :  { %453 = vmatprep.subr.mxu0 %v4732_v0  ;;  %3954 = vmatprep.subr.mxu1 %v4646_v4 }
  0xd2   :  { %v153_v27 = vpop.f32.mrf.mxu0 }
  0xd3   :  { %v229_v28 = vadd.f32 %v228_v26, %v153_v27 }
  0xd4   :  { %v155_v30 = vpop.f32.mrf.mxu0 }
  0xd5   :  { %v3575_v31 = vmul.f32 -1.442695, %v229_v28  ;;  %v239_v33 = vadd.f32 %v237_v29, %v155_v30  ;;  %v423_v29 = vrot.slane %v3579_v54, 4 }
  0xd6   :  { %v224_v32 = vpop.f32.mrf.mxu1 }
  0xd7   :  { %4406 = vpow2.f32 %v3575_v31  ;;  %v3576_v35 = vmul.f32 -1.442695, %v239_v33  ;;  %v246_v41 = vadd.f32 %v4936_v39, %v224_v32 }
  0xd8   :  { %v3934_v34 = vpop.f32.mrf.mxu1 }
  0xd9   :  { %4408 = vpow2.f32 %v3576_v35 }
  0xe4   :  { %v4407_v36 = vpop.eup %4406 }
  0xe5   :  { %v233_v37 = vadd.f32 1.0, %v4407_v36  ;;  %v3582_v36 = vld [vmem:[%s6426_s1 + $0x2] sm:$0x3] }
  0xe6   :  { %v4409_v38 = vpop.eup %4408 }
  0xe7   :  { %4410 = vrcp.f32 %v233_v37  ;;  %v243_v40 = vadd.f32 1.0, %v4409_v38 }
  0xe9   :  { %4412 = vrcp.f32 %v243_v40 }
  0xf4   :  { %v4411_v43 = vpop.eup %4410 }
  0xf5   :  { %v247_v44 = vmul.f32 %v4411_v43, %v246_v41  ;;  %v3585_v43 = vld [vmem:[%s6425_s0 + $0xc] sm:$0x3f] }
  0xf6   :  { %v4413_v46 = vpop.eup %4412 }
  0xf7   :  { %v250_v45 = vadd.f32 %v248_v42, %v247_v44  ;;  %v253_v47 = vsub.f32 1.0, %v4413_v46 }
  0xf9   :  { %4414 = vtanh.f32 %v250_v45  ;;  %v254_v50 = vmul.f32 %v253_v47, %v252_v48  ;;  %v588_v47 = vrot.slane %v3585_v43, 2 }
 0x106   :  { %v4415_v49 = vpop.eup %4414 }
 0x107   :  { %v255_v51 = vsub.f32 %v4415_v49, %v4868_v23 }
 0x109   :  { %v256_v52 = vmul.f32 %v255_v51, %v254_v50 }
 0x10b   :  { %v4944_v53 = vadd.f32 %v256_v52, %v4868_v23 }
 0x10d   :  { %3577 = vmatmul.mubr.msk.f32.vlgmr.msra.gmra.mxu0 %vm83_vm1, %v4944_v53  ;;  %3952 = vmatmul.mubr.msk.f32.vlgmr.msra.gmra.mxu1 %vm83_vm1, %v4944_v53 }
 0x10e   :  { %454 = vmatpush1.msra.mxu0 %v4737_v1  ;;  %3955 = vmatpush3.msra.mxu1 %v4781_v9 }
 0x10f   :  { %455 = vmatprep.subr.mxu0 %v4742_v2  ;;  %3956 = vmatprep.subr.mxu1 %v4646_v4 }
 0x110   :  { %456 = vmatpush1.msra.mxu0 %v4748_v3  ;;  %3957 = vmatpush3.msra.mxu1 %v4793_v11 }
 0x111   :  { %457 = vmatprep.subr.mxu0 %v4755_v5  ;;  %3958 = vmatprep.subr.mxu1 %v4646_v4 }
 0x112   :  { %458 = vmatpush1.msra.mxu0 %v4762_v6  ;;  %3959 = vmatpush3.msra.mxu1 %v4805_v13 }
 0x113   :  { %459 = vmatprep.subr.mxu0 %v4770_v7  ;;  %3960 = vmatprep.subr.mxu1 %v4646_v4 }
 0x114   :  { %460 = vmatpush1.msra.mxu0 %v4776_v8  ;;  %3961 = vmatpush3.msra.mxu1 %v4824_v16 }
 0x115   :  { %461 = vmatprep.subr.mxu0 %v4787_v10  ;;  %3962 = vmatprep.subr.mxu1 %v4646_v4 }
 0x116   :  { %462 = vmatpush1.msra.mxu0 %v4799_v12  ;;  %3963 = vmatpush3.msra.mxu1 %v4843_v19 }
 0x117   :  { %463 = vmatprep.subr.mxu0 %v4811_v14  ;;  %3964 = vmatprep.subr.mxu1 %v4646_v4 }
 0x118   :  { %464 = vmatpush1.msra.mxu0 %v4818_v15  ;;  %3965 = vmatpush3.msra.mxu1 %v4862_v22 }
 0x119   :  { %465 = vmatprep.subr.mxu0 %v4830_v17  ;;  %3966 = vmatprep.subr.mxu1 %v4646_v4 }
 0x11a   :  { %466 = vmatpush1.msra.mxu0 %v4837_v18  ;;  %3967 = vmatpush3.msra.mxu1 %v4876_v24 }
 0x11b   :  { %467 = vmatprep.subr.mxu0 %v4849_v20  ;;  %3968 = vmatprep.subr.mxu1 %v4646_v4 }
 0x11c   :  { %468 = vmatpush1.msra.mxu0 %v4856_v21  ;;  %501 = vmatprep.mubr.f32.mxu0 %v4646_v4 }
 0x11d   :  { %3969 = vmatpush3.msra.mxu1 %v4886_v25  ;;  %3970 = vmatprep.mubr.msk.f32.mxu1 %vm4647_vm0, %v4646_v4 }
 0x11e   :  { %629 = vmatprep.subr.mxu0 %v4732_v0  ;;  %3973 = vmatprep.subr.mxu1 %v4646_v4 }
 0x1cd   :  { %v327_v55 = vpop.f32.mrf.mxu0  ;;  %v398_v56 = vpop.f32.mrf.mxu1 }
 0x1ce   :  { %v404_v57 = vadd.f32 %v3579_v54, %v327_v55  ;;  %v421_v30 = vadd.f32 %v4936_v39, %v398_v56 }
 0x1cf   :  { %v329_v59 = vpop.f32.mrf.mxu0  ;;  %v3953_v60 = vpop.f32.mrf.mxu1 }
 0x1d0   :  { %v3580_v61 = vmul.f32 -1.442695, %v404_v57  ;;  %v414_v62 = vadd.f32 %v412_v58, %v329_v59  ;;  %v599_v57 = vrot.slane %v3585_v43, 4 }
 0x1d2   :  { %4416 = vpow2.f32 %v3580_v61  ;;  %v3581_v63 = vmul.f32 -1.442695, %v414_v62 }
 0x1d4   :  { %4418 = vpow2.f32 %v3581_v63 }
 0x1df   :  { %v4417_v23 = vpop.eup %4416 }
 0x1e0   :  { %v408_v26 = vadd.f32 1.0, %v4417_v23  ;;  %v3588_v23 = vld [vmem:[%s6426_s1 + $0x4] sm:$0x3] }
 0x1e1   :  { %v4419_v27 = vpop.eup %4418 }
 0x1e2   :  { %4420 = vrcp.f32 %v408_v26  ;;  %v418_v28 = vadd.f32 1.0, %v4419_v27 }
 0x1e4   :  { %4422 = vrcp.f32 %v418_v28 }
 0x1ef   :  { %v4421_v31 = vpop.eup %4420 }
 0x1f0   :  { %v422_v32 = vmul.f32 %v4421_v31, %v421_v30  ;;  %v3591_v31 = vld [vmem:[%s6425_s0 + $0x12] sm:$0x3f] }
 0x1f1   :  { %v4423_v34 = vpop.eup %4422 }
 0x1f2   :  { %v425_v33 = vadd.f32 %v423_v29, %v422_v32  ;;  %v429_v35 = vsub.f32 1.0, %v4423_v34 }
 0x1f4   :  { %4424 = vtanh.f32 %v425_v33  ;;  %v430_v38 = vmul.f32 %v3582_v36, %v429_v35  ;;  %v764_v35 = vrot.slane %v3591_v31, 2 }
 0x201   :  { %v4425_v37 = vpop.eup %4424 }
 0x202   :  { %v431_v40 = vsub.f32 %v4425_v37, %v4944_v53 }
 0x204   :  { %v432_v41 = vmul.f32 %v431_v40, %v430_v38 }
 0x206   :  { %v4994_v42 = vadd.f32 %v432_v41, %v4944_v53 }
 0x208   :  { %3583 = vmatmul.mubr.msk.f32.vlgmr.msra.gmra.mxu0 %vm83_vm1, %v4994_v42  ;;  %3971 = vmatmul.mubr.msk.f32.vlgmr.msra.gmra.mxu1 %vm83_vm1, %v4994_v42 }
 0x209   :  { %630 = vmatpush1.msra.mxu0 %v4737_v1  ;;  %3974 = vmatpush3.msra.mxu1 %v4781_v9 }
 0x20a   :  { %631 = vmatprep.subr.mxu0 %v4742_v2  ;;  %3975 = vmatprep.subr.mxu1 %v4646_v4 }
 0x20b   :  { %632 = vmatpush1.msra.mxu0 %v4748_v3  ;;  %3976 = vmatpush3.msra.mxu1 %v4793_v11 }
 0x20c   :  { %633 = vmatprep.subr.mxu0 %v4755_v5  ;;  %3977 = vmatprep.subr.mxu1 %v4646_v4 }
 0x20d   :  { %634 = vmatpush1.msra.mxu0 %v4762_v6  ;;  %3978 = vmatpush3.msra.mxu1 %v4805_v13 }
 0x20e   :  { %635 = vmatprep.subr.mxu0 %v4770_v7  ;;  %3979 = vmatprep.subr.mxu1 %v4646_v4 }
 0x20f   :  { %636 = vmatpush1.msra.mxu0 %v4776_v8  ;;  %3980 = vmatpush3.msra.mxu1 %v4824_v16 }
 0x210   :  { %637 = vmatprep.subr.mxu0 %v4787_v10  ;;  %3981 = vmatprep.subr.mxu1 %v4646_v4 }
 0x211   :  { %638 = vmatpush1.msra.mxu0 %v4799_v12  ;;  %3982 = vmatpush3.msra.mxu1 %v4843_v19 }
 0x212   :  { %639 = vmatprep.subr.mxu0 %v4811_v14  ;;  %3983 = vmatprep.subr.mxu1 %v4646_v4 }
 0x213   :  { %640 = vmatpush1.msra.mxu0 %v4818_v15  ;;  %3984 = vmatpush3.msra.mxu1 %v4862_v22 }
 0x214   :  { %641 = vmatprep.subr.mxu0 %v4830_v17  ;;  %3985 = vmatprep.subr.mxu1 %v4646_v4 }
 0x215   :  { %642 = vmatpush1.msra.mxu0 %v4837_v18  ;;  %3986 = vmatpush3.msra.mxu1 %v4876_v24 }
 0x216   :  { %643 = vmatprep.subr.mxu0 %v4849_v20  ;;  %3987 = vmatprep.subr.mxu1 %v4646_v4 }
 0x217   :  { %644 = vmatpush1.msra.mxu0 %v4856_v21  ;;  %677 = vmatprep.mubr.f32.mxu0 %v4646_v4 }
 0x218   :  { %3988 = vmatpush3.msra.mxu1 %v4886_v25  ;;  %3989 = vmatprep.mubr.msk.f32.mxu1 %vm4647_vm0, %v4646_v4 }
 0x219   :  { %805 = vmatprep.subr.mxu0 %v4732_v0  ;;  %3992 = vmatprep.subr.mxu1 %v4646_v4 }
 0x2c8   :  { %v503_v44 = vpop.f32.mrf.mxu0  ;;  %v574_v45 = vpop.f32.mrf.mxu1 }
 0x2c9   :  { %v580_v46 = vadd.f32 %v3585_v43, %v503_v44  ;;  %v597_v58 = vadd.f32 %v4936_v39, %v574_v45 }
 0x2ca   :  { %v505_v48 = vpop.f32.mrf.mxu0  ;;  %v3972_v49 = vpop.f32.mrf.mxu1 }
 0x2cb   :  { %v3586_v50 = vmul.f32 -1.442695, %v580_v46  ;;  %v590_v51 = vadd.f32 %v588_v47, %v505_v48  ;;  %v775_v46 = vrot.slane %v3591_v31, 4 }
 0x2cd   :  { %4426 = vpow2.f32 %v3586_v50  ;;  %v3587_v52 = vmul.f32 -1.442695, %v590_v51 }
 0x2cf   :  { %4428 = vpow2.f32 %v3587_v52 }
 0x2da   :  { %v4427_v53 = vpop.eup %4426 }
 0x2db   :  { %v584_v54 = vadd.f32 1.0, %v4427_v53  ;;  %v3594_v53 = vld [vmem:[%s6426_s1 + $0x6] sm:$0x3] }
 0x2dc   :  { %v4429_v55 = vpop.eup %4428 }
 0x2dd   :  { %4430 = vrcp.f32 %v584_v54  ;;  %v594_v56 = vadd.f32 1.0, %v4429_v55 }
 0x2df   :  { %4432 = vrcp.f32 %v594_v56 }
 0x2ea   :  { %v4431_v59 = vpop.eup %4430 }
 0x2eb   :  { %v598_v60 = vmul.f32 %v4431_v59, %v597_v58  ;;  %v3597_v59 = vld [vmem:[%s6425_s0 + $0x18] sm:$0x3f] }
 0x2ec   :  { %v4433_v62 = vpop.eup %4432 }
 0x2ed   :  { %v601_v61 = vadd.f32 %v599_v57, %v598_v60  ;;  %v605_v63 = vsub.f32 1.0, %v4433_v62 }
 0x2ef   :  { %4434 = vtanh.f32 %v601_v61  ;;  %v606_v27 = vmul.f32 %v3588_v23, %v605_v63  ;;  %v940_v63 = vrot.slane %v3597_v59, 2 }
 0x2fc   :  { %v4435_v26 = vpop.eup %4434 }
 0x2fd   :  { %v607_v28 = vsub.f32 %v4435_v26, %v4994_v42 }
 0x2ff   :  { %v608_v29 = vmul.f32 %v607_v28, %v606_v27 }
 0x301   :  { %v5044_v30 = vadd.f32 %v608_v29, %v4994_v42 }
 0x303   :  { %3589 = vmatmul.mubr.msk.f32.vlgmr.msra.gmra.mxu0 %vm83_vm1, %v5044_v30  ;;  %3990 = vmatmul.mubr.msk.f32.vlgmr.msra.gmra.mxu1 %vm83_vm1, %v5044_v30 }
 0x304   :  { %806 = vmatpush1.msra.mxu0 %v4737_v1  ;;  %3993 = vmatpush3.msra.mxu1 %v4781_v9 }
 0x305   :  { %807 = vmatprep.subr.mxu0 %v4742_v2  ;;  %3994 = vmatprep.subr.mxu1 %v4646_v4 }
 0x306   :  { %808 = vmatpush1.msra.mxu0 %v4748_v3  ;;  %3995 = vmatpush3.msra.mxu1 %v4793_v11 }
 0x307   :  { %809 = vmatprep.subr.mxu0 %v4755_v5  ;;  %3996 = vmatprep.subr.mxu1 %v4646_v4 }
 0x308   :  { %810 = vmatpush1.msra.mxu0 %v4762_v6  ;;  %3997 = vmatpush3.msra.mxu1 %v4805_v13 }
 0x309   :  { %811 = vmatprep.subr.mxu0 %v4770_v7  ;;  %3998 = vmatprep.subr.mxu1 %v4646_v4 }
 0x30a   :  { %812 = vmatpush1.msra.mxu0 %v4776_v8  ;;  %3999 = vmatpush3.msra.mxu1 %v4824_v16 }
 0x30b   :  { %813 = vmatprep.subr.mxu0 %v4787_v10  ;;  %4000 = vmatprep.subr.mxu1 %v4646_v4 }
 0x30c   :  { %814 = vmatpush1.msra.mxu0 %v4799_v12  ;;  %4001 = vmatpush3.msra.mxu1 %v4843_v19 }
 0x30d   :  { %815 = vmatprep.subr.mxu0 %v4811_v14  ;;  %4002 = vmatprep.subr.mxu1 %v4646_v4 }
 0x30e   :  { %816 = vmatpush1.msra.mxu0 %v4818_v15  ;;  %4003 = vmatpush3.msra.mxu1 %v4862_v22 }
 0x30f   :  { %817 = vmatprep.subr.mxu0 %v4830_v17  ;;  %4004 = vmatprep.subr.mxu1 %v4646_v4 }
 0x310   :  { %818 = vmatpush1.msra.mxu0 %v4837_v18  ;;  %4005 = vmatpush3.msra.mxu1 %v4876_v24 }
 0x311   :  { %819 = vmatprep.subr.mxu0 %v4849_v20  ;;  %4006 = vmatprep.subr.mxu1 %v4646_v4 }
 0x312   :  { %820 = vmatpush1.msra.mxu0 %v4856_v21  ;;  %853 = vmatprep.mubr.f32.mxu0 %v4646_v4 }
 0x313   :  { %4007 = vmatpush3.msra.mxu1 %v4886_v25  ;;  %4008 = vmatprep.mubr.msk.f32.mxu1 %vm4647_vm0, %v4646_v4 }
 0x314   :  { %981 = vmatprep.subr.mxu0 %v4732_v0  ;;  %4011 = vmatprep.subr.mxu1 %v4646_v4 }
 0x3c3   :  { %v679_v32 = vpop.f32.mrf.mxu0  ;;  %v750_v33 = vpop.f32.mrf.mxu1 }
 0x3c4   :  { %v756_v34 = vadd.f32 %v3591_v31, %v679_v32  ;;  %v773_v47 = vadd.f32 %v4936_v39, %v750_v33 }
 0x3c5   :  { %v681_v36 = vpop.f32.mrf.mxu0  ;;  %v3991_v37 = vpop.f32.mrf.mxu1 }
 0x3c6   :  { %v3592_v38 = vmul.f32 -1.442695, %v756_v34  ;;  %v766_v40 = vadd.f32 %v764_v35, %v681_v36  ;;  %v951_v34 = vrot.slane %v3597_v59, 4 }
 0x3c8   :  { %4436 = vpow2.f32 %v3592_v38  ;;  %v3593_v41 = vmul.f32 -1.442695, %v766_v40 }
 0x3ca   :  { %4438 = vpow2.f32 %v3593_v41 }
 0x3d5   :  { %v4437_v42 = vpop.eup %4436 }
 0x3d6   :  { %v760_v43 = vadd.f32 1.0, %v4437_v42  ;;  %v3600_v42 = vld [vmem:[%s6426_s1 + $0x8] sm:$0x3] }
 0x3d7   :  { %v4439_v44 = vpop.eup %4438 }
 0x3d8   :  { %4440 = vrcp.f32 %v760_v43  ;;  %v770_v45 = vadd.f32 1.0, %v4439_v44 }
 0x3da   :  { %4442 = vrcp.f32 %v770_v45 }
 0x3e5   :  { %v4441_v48 = vpop.eup %4440 }
 0x3e6   :  { %v774_v49 = vmul.f32 %v4441_v48, %v773_v47  ;;  %v3603_v48 = vld [vmem:[%s6425_s0 + $0x1e] sm:$0x3f] }
 0x3e7   :  { %v4443_v51 = vpop.eup %4442 }
 0x3e8   :  { %v777_v50 = vadd.f32 %v775_v46, %v774_v49  ;;  %v781_v52 = vsub.f32 1.0, %v4443_v51 }
 0x3ea   :  { %4444 = vtanh.f32 %v777_v50  ;;  %v782_v55 = vmul.f32 %v3594_v53, %v781_v52  ;;  %v1116_v52 = vrot.slane %v3603_v48, 2 }
 0x3f7   :  { %v4445_v54 = vpop.eup %4444 }
 0x3f8   :  { %v783_v56 = vsub.f32 %v4445_v54, %v5044_v30 }
 0x3fa   :  { %v784_v57 = vmul.f32 %v783_v56, %v782_v55 }
 0x3fc   :  { %v5094_v58 = vadd.f32 %v784_v57, %v5044_v30 }
 0x3fe   :  { %3595 = vmatmul.mubr.msk.f32.vlgmr.msra.gmra.mxu0 %vm83_vm1, %v5094_v58  ;;  %4009 = vmatmul.mubr.msk.f32.vlgmr.msra.gmra.mxu1 %vm83_vm1, %v5094_v58 }
 0x3ff   :  { %982 = vmatpush1.msra.mxu0 %v4737_v1  ;;  %4012 = vmatpush3.msra.mxu1 %v4781_v9 }
 0x400   :  { %983 = vmatprep.subr.mxu0 %v4742_v2  ;;  %4013 = vmatprep.subr.mxu1 %v4646_v4 }
 0x401   :  { %984 = vmatpush1.msra.mxu0 %v4748_v3  ;;  %4014 = vmatpush3.msra.mxu1 %v4793_v11 }
 0x402   :  { %985 = vmatprep.subr.mxu0 %v4755_v5  ;;  %4015 = vmatprep.subr.mxu1 %v4646_v4 }
 0x403   :  { %986 = vmatpush1.msra.mxu0 %v4762_v6  ;;  %4016 = vmatpush3.msra.mxu1 %v4805_v13 }
 0x404   :  { %987 = vmatprep.subr.mxu0 %v4770_v7  ;;  %4017 = vmatprep.subr.mxu1 %v4646_v4 }
 0x405   :  { %988 = vmatpush1.msra.mxu0 %v4776_v8  ;;  %4018 = vmatpush3.msra.mxu1 %v4824_v16 }
 0x406   :  { %989 = vmatprep.subr.mxu0 %v4787_v10  ;;  %4019 = vmatprep.subr.mxu1 %v4646_v4 }
 0x407   :  { %990 = vmatpush1.msra.mxu0 %v4799_v12  ;;  %4020 = vmatpush3.msra.mxu1 %v4843_v19 }
 0x408   :  { %991 = vmatprep.subr.mxu0 %v4811_v14  ;;  %4021 = vmatprep.subr.mxu1 %v4646_v4 }
 0x409   :  { %992 = vmatpush1.msra.mxu0 %v4818_v15  ;;  %4022 = vmatpush3.msra.mxu1 %v4862_v22 }
 0x40a   :  { %993 = vmatprep.subr.mxu0 %v4830_v17  ;;  %4023 = vmatprep.subr.mxu1 %v4646_v4 }
 0x40b   :  { %994 = vmatpush1.msra.mxu0 %v4837_v18  ;;  %4024 = vmatpush3.msra.mxu1 %v4876_v24 }
 0x40c   :  { %995 = vmatprep.subr.mxu0 %v4849_v20  ;;  %4025 = vmatprep.subr.mxu1 %v4646_v4 }
 0x40d   :  { %996 = vmatpush1.msra.mxu0 %v4856_v21  ;;  %1029 = vmatprep.mubr.f32.mxu0 %v4646_v4 }
 0x40e   :  { %4026 = vmatpush3.msra.mxu1 %v4886_v25  ;;  %4027 = vmatprep.mubr.msk.f32.mxu1 %vm4647_vm0, %v4646_v4 }
 0x40f   :  { %1157 = vmatprep.subr.mxu0 %v4732_v0  ;;  %4030 = vmatprep.subr.mxu1 %v4646_v4 }
 0x4be   :  { %v855_v60 = vpop.f32.mrf.mxu0  ;;  %v926_v61 = vpop.f32.mrf.mxu1 }
 0x4bf   :  { %v932_v62 = vadd.f32 %v3597_v59, %v855_v60  ;;  %v949_v35 = vadd.f32 %v4936_v39, %v926_v61  ;;  %v1127_v61 = vrot.slane %v3603_v48, 4 }
 0x4c0   :  { %v857_v23 = vpop.f32.mrf.mxu0  ;;  %v4010_v26 = vpop.f32.mrf.mxu1 }
 0x4c1   :  { %v3598_v27 = vmul.f32 -1.442695, %v932_v62  ;;  %v942_v28 = vadd.f32 %v940_v63, %v857_v23 }
 0x4c3   :  { %4446 = vpow2.f32 %v3598_v27  ;;  %v3599_v29 = vmul.f32 -1.442695, %v942_v28 }
 0x4c5   :  { %4448 = vpow2.f32 %v3599_v29  ;;  %v3606_v29 = vld [vmem:[%s6426_s1 + $0xa] sm:$0x3] }
 0x4d0   :  { %v4447_v30 = vpop.eup %4446 }
 0x4d1   :  { %v936_v31 = vadd.f32 1.0, %v4447_v30 }
 0x4d2   :  { %v4449_v32 = vpop.eup %4448 }
 0x4d3   :  { %4450 = vrcp.f32 %v936_v31  ;;  %v946_v33 = vadd.f32 1.0, %v4449_v32 }
 0x4d5   :  { %4452 = vrcp.f32 %v946_v33 }
 0x4e0   :  { %v4451_v36 = vpop.eup %4450 }
 0x4e1   :  { %v950_v37 = vmul.f32 %v4451_v36, %v949_v35 }
 0x4e2   :  { %v4453_v40 = vpop.eup %4452 }
 0x4e3   :  { %v953_v38 = vadd.f32 %v951_v34, %v950_v37  ;;  %v957_v41 = vsub.f32 1.0, %v4453_v40 }
 0x4e5   :  { %4454 = vtanh.f32 %v953_v38  ;;  %v958_v44 = vmul.f32 %v3600_v42, %v957_v41  ;;  %v5259_v41 = vld [vmem:[%s6432_s7 + $0xf8] sm:$0xff] }
 0x4e6   :  { %v5264_v42 = vld [vmem:[%s6432_s7 + $0x118] sm:$0xff] }
 0x4f2   :  { %v4455_v43 = vpop.eup %4454 }
 0x4f3   :  { %v959_v45 = vsub.f32 %v4455_v43, %v5094_v58  ;;  %v5273_v43 = vld [vmem:[%s6432_s7 + $0xf0] sm:$0xff] }
 0x4f5   :  { %v960_v46 = vmul.f32 %v959_v45, %v958_v44  ;;  %v5279_v44 = vld [vmem:[%s6432_s7 + $0xe0] sm:$0xff] }
 0x4f6   :  { %v5285_v45 = vld [vmem:[%s6432_s7 + $0x100] sm:$0xff] }
 0x4f7   :  { %v5144_v47 = vadd.f32 %v960_v46, %v5094_v58  ;;  %v5291_v46 = vld [vmem:[%s6432_s7 + $0xd8] sm:$0xff] }
 0x4f9   :  { %3601 = vmatmul.mubr.msk.f32.vlgmr.msra.gmra.mxu0 %vm83_vm1, %v5144_v47  ;;  %4028 = vmatmul.mubr.msk.f32.vlgmr.msra.gmra.mxu1 %vm83_vm1, %v5144_v47 }
 0x4fa   :  { %1158 = vmatpush1.msra.mxu0 %v4737_v1  ;;  %4031 = vmatpush3.msra.mxu1 %v4781_v9 }
 0x4fb   :  { %1159 = vmatprep.subr.mxu0 %v4742_v2  ;;  %4032 = vmatprep.subr.mxu1 %v4646_v4 }
 0x4fc   :  { %1160 = vmatpush1.msra.mxu0 %v4748_v3  ;;  %4033 = vmatpush3.msra.mxu1 %v4793_v11 }
 0x4fd   :  { %1161 = vmatprep.subr.mxu0 %v4755_v5  ;;  %4034 = vmatprep.subr.mxu1 %v4646_v4 }
 0x4fe   :  { %1162 = vmatpush1.msra.mxu0 %v4762_v6  ;;  %4035 = vmatpush3.msra.mxu1 %v4805_v13 }
 0x4ff   :  { %1163 = vmatprep.subr.mxu0 %v4770_v7  ;;  %4036 = vmatprep.subr.mxu1 %v4646_v4 }
 0x500   :  { %1164 = vmatpush1.msra.mxu0 %v4776_v8  ;;  %4037 = vmatpush3.msra.mxu1 %v4824_v16 }
 0x501   :  { %1165 = vmatprep.subr.mxu0 %v4787_v10  ;;  %4038 = vmatprep.subr.mxu1 %v4646_v4 }
 0x502   :  { %1166 = vmatpush1.msra.mxu0 %v4799_v12  ;;  %4039 = vmatpush3.msra.mxu1 %v4843_v19 }
 0x503   :  { %1167 = vmatprep.subr.mxu0 %v4811_v14  ;;  %4040 = vmatprep.subr.mxu1 %v4646_v4 }
 0x504   :  { %1168 = vmatpush1.msra.mxu0 %v4818_v15  ;;  %4041 = vmatpush3.msra.mxu1 %v4862_v22 }
 0x505   :  { %1169 = vmatprep.subr.mxu0 %v4830_v17  ;;  %4042 = vmatprep.subr.mxu1 %v4646_v4 }
 0x506   :  { %1170 = vmatpush1.msra.mxu0 %v4837_v18  ;;  %4043 = vmatpush3.msra.mxu1 %v4876_v24 }
 0x507   :  { %1171 = vmatprep.subr.mxu0 %v4849_v20  ;;  %4044 = vmatprep.subr.mxu1 %v4646_v4 }
 0x508   :  { %1172 = vmatpush1.msra.mxu0 %v4856_v21  ;;  %1205 = vmatprep.mubr.f32.mxu0 %v4646_v4 }
 0x509   :  { %4045 = vmatpush3.msra.mxu1 %v4886_v25  ;;  %4046 = vmatprep.mubr.msk.f32.mxu1 %vm4647_vm0, %v4646_v4 }
 0x50a   :  { %1333 = vmatprep.subr.mxu0 %v4732_v0  ;;  %4049 = vmatprep.subr.mxu1 %v4646_v4 }
 0x5b9   :  { %v1031_v49 = vpop.f32.mrf.mxu0  ;;  %v1102_v50 = vpop.f32.mrf.mxu1 }
 0x5ba   :  { %v1108_v51 = vadd.f32 %v3603_v48, %v1031_v49  ;;  %v1125_v62 = vadd.f32 %v4936_v39, %v1102_v50  ;;  %v5304_v48 = vld [vmem:[%s6432_s7 + $0xe8] sm:$0xff]  ;;  %v5310_v49 = vld [vmem:[%s6432_s7 + $0xc0] sm:$0xff]  ;;  %v5317_v50 = vld [vmem:[%s6432_s7 + $0xb0] sm:$0xff] }
 0x5bb   :  { %v1033_v53 = vpop.f32.mrf.mxu0  ;;  %v4029_v54 = vpop.f32.mrf.mxu1 }
 0x5bc   :  { %v3604_v55 = vmul.f32 -1.442695, %v1108_v51  ;;  %v1118_v56 = vadd.f32 %v1116_v52, %v1033_v53  ;;  %v5323_v51 = vld [vmem:[%s6432_s7 + $0xd0] sm:$0xff]  ;;  %v5329_v52 = vld [vmem:[%s6432_s7 + $0xa8] sm:$0xff]  ;;  %v5336_v53 = vld [vmem:[%s6432_s7 + $0x98] sm:$0xff] }
 0x5bd   :  { %v5342_v54 = vld [vmem:[%s6432_s7 + $0xb8] sm:$0xff] }
 0x5be   :  { %4456 = vpow2.f32 %v3604_v55  ;;  %v3605_v57 = vmul.f32 -1.442695, %v1118_v56  ;;  %v5348_v55 = vld [vmem:[%s6432_s7 + $0x90] sm:$0xff]  ;;  %v5355_v56 = vld [vmem:[%s6432_s7 + $0x80] sm:$0xff] }
 0x5c0   :  { %4458 = vpow2.f32 %v3605_v57  ;;  %v5361_v57 = vld [vmem:[%s6432_s7 + $0xa0] sm:$0xff] }
 0x5cb   :  { %v4457_v58 = vpop.eup %4456 }
 0x5cc   :  { %v1112_v59 = vadd.f32 1.0, %v4457_v58  ;;  %v5367_v58 = vld [vmem:[%s6432_s7 + $0x78] sm:$0xff] }
 0x5cd   :  { %v4459_v0 = vpop.eup %4458 }
 0x5ce   :  { %4460 = vrcp.f32 %v1112_v59  ;;  %v1122_v60 = vadd.f32 1.0, %v4459_v0  ;;  %v5374_v59 = vld [vmem:[%s6432_s7 + $0x68] sm:$0xff] }
 0x5cf   :  { %v5380_v0 = vld [vmem:[%s6432_s7 + $0x88] sm:$0xff] }
 0x5d0   :  { %4462 = vrcp.f32 %v1122_v60  ;;  %v5386_v60 = vld [vmem:[%s6432_s7 + $0x60] sm:$0xff] }
 0x5db   :  { %v4461_v63 = vpop.eup %4460 }
 0x5dc   :  { %v1126_v23 = vmul.f32 %v4461_v63, %v1125_v62  ;;  %v5399_v62 = vld [vmem:[%s6432_s7 + $0x70] sm:$0xff]  ;;  %v5405_v63 = vld [vmem:[%s6432_s7 + $0x48] sm:$0xff] }
 0x5dd   :  { %v4463_v27 = vpop.eup %4462 }
 0x5de   :  { %v1129_v26 = vadd.f32 %v1127_v61, %v1126_v23  ;;  %v1133_v28 = vsub.f32 1.0, %v4463_v27  ;;  %v5393_v61 = vld [vmem:[%s6432_s7 + $0x50] sm:$0xff]  ;;  %v5412_v23 = vld [vmem:[%s6432_s7 + $0x38] sm:$0xff] }
 0x5df   :  { %v5424_v27 = vld [vmem:[%s6432_s7 + $0x30] sm:$0xff] }
 0x5e0   :  { %4464 = vtanh.f32 %v1129_v26  ;;  %v1134_v31 = vmul.f32 %v3606_v29, %v1133_v28  ;;  %v5418_v26 = vld [vmem:[%s6432_s7 + $0x58] sm:$0xff]  ;;  %v5431_v28 = vld [vmem:[%s6432_s7 + $0x20] sm:$0xff] }
 0x5e1   :  { %v5437_v29 = vld [vmem:[%s6432_s7 + $0x40] sm:$0xff] }
 0x5ed   :  { %v4465_v30 = vpop.eup %4464 }
 0x5ee   :  { %v1135_v32 = vsub.f32 %v4465_v30, %v5144_v47  ;;  %v5443_v30 = vld [vmem:[%s6432_s7 + $0x18] sm:$0xff] }
 0x5f0   :  { %v1136_v33 = vmul.f32 %v1135_v32, %v1134_v31  ;;  %v5450_v31 = vld [vmem:[%s6432_s7 + $0x8] sm:$0xff] }
 0x5f1   :  { %v5456_v32 = vld [vmem:[%s6432_s7 + $0x28] sm:$0xff] }
 0x5f2   :  { %v5194_v34 = vadd.f32 %v1136_v33, %v5144_v47  ;;  %v5298_v47 = vld [vmem:[%s6432_s7 + $0xc8] sm:$0xff]  ;;  %v5462_v33 = vld [vmem:[%s6432_s7] sm:$0xff] }
 0x5f4   :  { %3607 = vmatmul.mubr.msk.f32.vlgmr.msra.gmra.mxu0 %vm83_vm1, %v5194_v34  ;;  %4047 = vmatmul.mubr.msk.f32.vlgmr.msra.gmra.mxu1 %vm83_vm1, %v5194_v34 }
 0x5f5   :  { %1334 = vmatpush1.msra.mxu0 %v4737_v1  ;;  %4050 = vmatpush3.msra.mxu1 %v4781_v9  ;;  %v5237_v1 = vld [vmem:[%s6432_s7 + $0x110] sm:$0xff] }
 0x5f6   :  { %1335 = vmatprep.subr.mxu0 %v4742_v2  ;;  %4051 = vmatprep.subr.mxu1 %v4646_v4  ;;  %v3609_v2 = vld [vmem:[%s6425_s0 + $0x24] sm:$0x3f] }
 0x5f7   :  { %1336 = vmatpush1.msra.mxu0 %v4748_v3  ;;  %4052 = vmatpush3.msra.mxu1 %v4793_v11 }
 0x5f8   :  { %1337 = vmatprep.subr.mxu0 %v4755_v5  ;;  %4053 = vmatprep.subr.mxu1 %v4646_v4 }
 0x5f9   :  { %1338 = vmatpush1.msra.mxu0 %v4762_v6  ;;  %4054 = vmatpush3.msra.mxu1 %v4805_v13 }
 0x5fa   :  { %1339 = vmatprep.subr.mxu0 %v4770_v7  ;;  %4055 = vmatprep.subr.mxu1 %v4646_v4  ;;  %v1292_v7 = vrot.slane %v3609_v2, 2 }
 0x5fb   :  { %1340 = vmatpush1.msra.mxu0 %v4776_v8  ;;  %4056 = vmatpush3.msra.mxu1 %v4824_v16 }
 0x5fc   :  { %1341 = vmatprep.subr.mxu0 %v4787_v10  ;;  %4057 = vmatprep.subr.mxu1 %v4646_v4 }
 0x5fd   :  { %1342 = vmatpush1.msra.mxu0 %v4799_v12  ;;  %4058 = vmatpush3.msra.mxu1 %v4843_v19 }
 0x5fe   :  { %1343 = vmatprep.subr.mxu0 %v4811_v14  ;;  %4059 = vmatprep.subr.mxu1 %v4646_v4 }
 0x5ff   :  { %1344 = vmatpush1.msra.mxu0 %v4818_v15  ;;  %4060 = vmatpush3.msra.mxu1 %v4862_v22 }
 0x600   :  { %1345 = vmatprep.subr.mxu0 %v4830_v17  ;;  %4061 = vmatprep.subr.mxu1 %v4646_v4  ;;  %v1303_v17 = vrot.slane %v3609_v2, 4 }
 0x601   :  { %1346 = vmatpush1.msra.mxu0 %v4837_v18  ;;  %4062 = vmatpush3.msra.mxu1 %v4876_v24 }
 0x602   :  { %1347 = vmatprep.subr.mxu0 %v4849_v20  ;;  %4063 = vmatprep.subr.mxu1 %v4646_v4 }
 0x603   :  { %1348 = vmatpush1.msra.mxu0 %v4856_v21  ;;  %1381 = vmatprep.mubr.f32.mxu0 %v4646_v4 }
 0x604   :  { %4064 = vmatpush3.msra.mxu1 %v4886_v25  ;;  %4065 = vmatprep.mubr.msk.f32.mxu1 %vm4647_vm0, %v4646_v4  ;;  %v3612_v25 = vld [vmem:[%s6426_s1 + $0xc] sm:$0x3] }
 0x605   :  { %4068 = vmatprep.subr.mxu1 %v4646_v4  ;;  %1546 = vmatprep.subr.mxu0 %v5237_v1 }
 0x6b4   :  { %v1207_v3 = vpop.f32.mrf.mxu0  ;;  %v1278_v5 = vpop.f32.mrf.mxu1 }
 0x6b5   :  { %v1284_v6 = vadd.f32 %v3609_v2, %v1207_v3  ;;  %v1301_v18 = vadd.f32 %v4936_v39, %v1278_v5  ;;  %v5254_v39 = vld [vmem:[%s6432_s7 + $0x108] sm:$0xff]  ;;  %v5475_v2 = vld [vmem:[%s6432_s7 + $0x10] sm:$0xff] }
 0x6b6   :  { %v1209_v8 = vpop.f32.mrf.mxu0  ;;  %v4048_v9 = vpop.f32.mrf.mxu1  ;;  %v3615_v3 = vld [vmem:[%s6425_s0 + $0x2a] sm:$0x3f] }
 0x6b7   :  { %v3610_v10 = vmul.f32 -1.442695, %v1284_v6  ;;  %v1294_v11 = vadd.f32 %v1292_v7, %v1209_v8  ;;  %v1468_v8 = vrot.slane %v3615_v3, 2 }
 0x6b9   :  { %4466 = vpow2.f32 %v3610_v10  ;;  %v3611_v12 = vmul.f32 -1.442695, %v1294_v11 }
 0x6bb   :  { %4468 = vpow2.f32 %v3611_v12 }
 0x6c6   :  { %v4467_v13 = vpop.eup %4466 }
 0x6c7   :  { %v1288_v14 = vadd.f32 1.0, %v4467_v13 }
 0x6c8   :  { %v4469_v15 = vpop.eup %4468 }
 0x6c9   :  { %4470 = vrcp.f32 %v1288_v14  ;;  %v1298_v16 = vadd.f32 1.0, %v4469_v15 }
 0x6cb   :  { %4472 = vrcp.f32 %v1298_v16  ;;  %v1679_v16 = vld [vmem:[%s6430_s5] sm:$0x3f] }
 0x6d6   :  { %v4471_v19 = vpop.eup %4470 }
 0x6d7   :  { %v1302_v20 = vmul.f32 %v4471_v19, %v1301_v18  ;;  %v1688_v19 = vrot.slane %v1679_v16, 2 }
 0x6d8   :  { %v4473_v22 = vpop.eup %4472 }
 0x6d9   :  { %v1305_v21 = vadd.f32 %v1303_v17, %v1302_v20  ;;  %v1309_v24 = vsub.f32 1.0, %v4473_v22 }
 0x6db   :  { %4474 = vtanh.f32 %v1305_v21  ;;  %v1310_v36 = vmul.f32 %v3612_v25, %v1309_v24 }
 0x6e8   :  { %v4475_v35 = vpop.eup %4474 }
 0x6e9   :  { %v1311_v37 = vsub.f32 %v4475_v35, %v5194_v34 }
 0x6eb   :  { %v1312_v38 = vmul.f32 %v1311_v37, %v1310_v36  ;;  %v1479_v37 = vrot.slane %v3615_v3, 4 }
 0x6ed   :  { %v5249_v40 = vadd.f32 %v1312_v38, %v5194_v34  ;;  %v5469_v34 = vld [vmem:[%s6434_s9] sm:$0x3] }
 0x6ee   :  { %v4586_v38 = vld [vmem:[%s6428_s3] ss:$0 sm:$0xff] }
 0x6ef   :  { %3613 = vmatmul.mubr.msk.f32.vlgmr.msra.gmra.mxu0 %vm83_vm1, %v5249_v40  ;;  %4066 = vmatmul.mubr.msk.f32.vlgmr.msra.gmra.mxu1 %vm83_vm1, %v5249_v40 }
 0x6f0   :  { %1547 = vmatpush1.msra.mxu0 %v5254_v39  ;;  %1602 = vmatprep.mubr.f32.mxu0 %v4646_v4 }
 0x6f1   :  { %1548 = vmatprep.subr.mxu0 %v5259_v41  ;;  %4069 = vmatpush3.msra.mxu1 %v5264_v42 }
 0x6f2   :  { %1549 = vmatpush1.msra.mxu0 %v5273_v43  ;;  %4070 = vmatprep.subr.mxu1 %v4646_v4 }
 0x6f3   :  { %1550 = vmatprep.subr.mxu0 %v5279_v44  ;;  %4071 = vmatpush3.msra.mxu1 %v5285_v45 }
 0x6f4   :  { %1551 = vmatpush1.msra.mxu0 %v5291_v46  ;;  %4072 = vmatprep.subr.mxu1 %v4646_v4 }
 0x6f5   :  { %1552 = vmatprep.subr.mxu0 %v5298_v47  ;;  %4073 = vmatpush3.msra.mxu1 %v5304_v48 }
 0x6f6   :  { %1553 = vmatpush1.msra.mxu0 %v5310_v49  ;;  %4074 = vmatprep.subr.mxu1 %v4646_v4 }
 0x6f7   :  { %1554 = vmatprep.subr.mxu0 %v5317_v50  ;;  %4075 = vmatpush3.msra.mxu1 %v5323_v51 }
 0x6f8   :  { %1555 = vmatpush1.msra.mxu0 %v5329_v52  ;;  %4076 = vmatprep.subr.mxu1 %v4646_v4 }
 0x6f9   :  { %1556 = vmatprep.subr.mxu0 %v5336_v53  ;;  %4077 = vmatpush3.msra.mxu1 %v5342_v54 }
 0x6fa   :  { %1557 = vmatpush1.msra.mxu0 %v5348_v55  ;;  %4078 = vmatprep.subr.mxu1 %v4646_v4 }
 0x6fb   :  { %1558 = vmatprep.subr.mxu0 %v5355_v56  ;;  %4079 = vmatpush3.msra.mxu1 %v5361_v57 }
 0x6fc   :  { %1559 = vmatpush1.msra.mxu0 %v5367_v58  ;;  %4080 = vmatprep.subr.mxu1 %v4646_v4 }
 0x6fd   :  { %1560 = vmatprep.subr.mxu0 %v5374_v59  ;;  %4081 = vmatpush3.msra.mxu1 %v5380_v0 }
 0x6fe   :  { %1561 = vmatpush1.msra.mxu0 %v5386_v60  ;;  %4082 = vmatprep.subr.mxu1 %v4646_v4 }
 0x6ff   :  { %1562 = vmatprep.subr.mxu0 %v5393_v61  ;;  %4083 = vmatpush3.msra.mxu1 %v5399_v62 }
 0x700   :  { %1563 = vmatpush1.msra.mxu0 %v5405_v63  ;;  %4084 = vmatprep.subr.mxu1 %v4646_v4 }
 0x701   :  { %1564 = vmatprep.subr.mxu0 %v5412_v23  ;;  %4085 = vmatpush3.msra.mxu1 %v5418_v26 }
 0x702   :  { %1565 = vmatpush1.msra.mxu0 %v5424_v27  ;;  %4086 = vmatprep.subr.mxu1 %v4646_v4 }
 0x703   :  { %1566 = vmatprep.subr.mxu0 %v5431_v28  ;;  %4087 = vmatpush3.msra.mxu1 %v5437_v29 }
 0x704   :  { %1567 = vmatpush1.msra.mxu0 %v5443_v30  ;;  %4088 = vmatprep.subr.mxu1 %v4646_v4 }
 0x705   :  { %1568 = vmatprep.subr.mxu0 %v5450_v31  ;;  %4089 = vmatpush3.msra.mxu1 %v5456_v32 }
 0x706   :  { %1569 = vmatpush1.msra.mxu0 %v5462_v33  ;;  %4090 = vmatprep.subr.mxu1 %v4646_v4 }
 0x707   :  { %3620 = vmatmul.mubr.msk.f32.vlgmr.msra.gmra.mxu0 %vm1534_vm2, %v5469_v34  ;;  %4091 = vmatpush3.msra.mxu1 %v5475_v2 }
 0x708   :  { %4092 = vmatprep.mubr.msk.f32.mxu1 %vm4647_vm0, %v4646_v4  ;;  %1720 = vmatprep.subr.mxu0 %v5237_v1 }
 0x709   :  { %4093 = vmatmul.mubr.msk.f32.vlgmr.msra.gmra.mxu1 %vm1534_vm2, %v5469_v34  ;;  %4095 = vmatprep.subr.mxu1 %v4646_v4 }
 0x70a   :  { %1721 = vmatpush1.msra.mxu0 %v5254_v39  ;;  %4096 = vmatpush3.msra.mxu1 %v5264_v42 }
 0x70b   :  { %1722 = vmatprep.subr.mxu0 %v5259_v41  ;;  %4097 = vmatprep.subr.mxu1 %v4646_v4 }
 0x70c   :  { %1723 = vmatpush1.msra.mxu0 %v5273_v43  ;;  %4098 = vmatpush3.msra.mxu1 %v5285_v45 }
 0x70d   :  { %1724 = vmatprep.subr.mxu0 %v5279_v44  ;;  %4099 = vmatprep.subr.mxu1 %v4646_v4 }
 0x70e   :  { %1725 = vmatpush1.msra.mxu0 %v5291_v46  ;;  %4100 = vmatpush3.msra.mxu1 %v5304_v48 }
 0x70f   :  { %1726 = vmatprep.subr.mxu0 %v5298_v47  ;;  %4101 = vmatprep.subr.mxu1 %v4646_v4 }
 0x710   :  { %1727 = vmatpush1.msra.mxu0 %v5310_v49  ;;  %4102 = vmatpush3.msra.mxu1 %v5323_v51 }
 0x711   :  { %1728 = vmatprep.subr.mxu0 %v5317_v50  ;;  %4103 = vmatprep.subr.mxu1 %v4646_v4 }
 0x712   :  { %1729 = vmatpush1.msra.mxu0 %v5329_v52  ;;  %4104 = vmatpush3.msra.mxu1 %v5342_v54 }
 0x713   :  { %1730 = vmatprep.subr.mxu0 %v5336_v53  ;;  %4105 = vmatprep.subr.mxu1 %v4646_v4 }
 0x714   :  { %1731 = vmatpush1.msra.mxu0 %v5348_v55  ;;  %4106 = vmatpush3.msra.mxu1 %v5361_v57 }
 0x715   :  { %1732 = vmatprep.subr.mxu0 %v5355_v56  ;;  %4107 = vmatprep.subr.mxu1 %v4646_v4 }
 0x716   :  { %1733 = vmatpush1.msra.mxu0 %v5367_v58  ;;  %4108 = vmatpush3.msra.mxu1 %v5380_v0 }
 0x717   :  { %1734 = vmatprep.subr.mxu0 %v5374_v59  ;;  %4109 = vmatprep.subr.mxu1 %v4646_v4 }
 0x718   :  { %1735 = vmatpush1.msra.mxu0 %v5386_v60  ;;  %4110 = vmatpush3.msra.mxu1 %v5399_v62 }
 0x719   :  { %1736 = vmatprep.subr.mxu0 %v5393_v61  ;;  %4111 = vmatprep.subr.mxu1 %v4646_v4 }
 0x71a   :  { %1737 = vmatpush1.msra.mxu0 %v5405_v63  ;;  %4112 = vmatpush3.msra.mxu1 %v5418_v26 }
 0x71b   :  { %1738 = vmatprep.subr.mxu0 %v5412_v23  ;;  %4113 = vmatprep.subr.mxu1 %v4646_v4 }
 0x71c   :  { %1739 = vmatpush1.msra.mxu0 %v5424_v27  ;;  %4114 = vmatpush3.msra.mxu1 %v5437_v29 }
 0x71d   :  { %1740 = vmatprep.subr.mxu0 %v5431_v28  ;;  %4115 = vmatprep.subr.mxu1 %v4646_v4 }
 0x71e   :  { %1741 = vmatpush1.msra.mxu0 %v5443_v30  ;;  %4116 = vmatpush3.msra.mxu1 %v5456_v32 }
 0x71f   :  { %1742 = vmatprep.subr.mxu0 %v5450_v31  ;;  %4117 = vmatprep.subr.mxu1 %v4646_v4 }
 0x720   :  { %1743 = vmatpush1.msra.mxu0 %v5462_v33  ;;  %1776 = vmatprep.mubr.f32.mxu0 %v4646_v4 }
 0x721   :  { %4118 = vmatpush3.msra.mxu1 %v5475_v2  ;;  %4119 = vmatprep.mubr.msk.f32.mxu1 %vm4647_vm0, %v4646_v4 }
 0x722   :  { %1896 = vmatprep.subr.mxu0 %v5237_v1  ;;  %4122 = vmatprep.subr.mxu1 %v4646_v4 }
 0x7af   :  { %v1383_v5 = vpop.f32.mrf.mxu0  ;;  %v1454_v6 = vpop.f32.mrf.mxu1 }
 0x7b0   :  { %v1460_v7 = vadd.f32 %v3615_v3, %v1383_v5  ;;  %v1477_v5 = vadd.f32 %v4586_v38, %v1454_v6  ;;  %v3618_v3 = vld [vmem:[%s6426_s1 + $0xe] sm:$0x3]  ;;  %v5556_v6 = vld [vmem:[%s6433_s8] ss:$0 sm:$0xff] }
 0x7b1   :  { %v1385_v9 = vpop.f32.mrf.mxu0  ;;  %v4067_v10 = vpop.f32.mrf.mxu1 }
 0x7b2   :  { %v3616_v11 = vmul.f32 -1.442695, %v1460_v7  ;;  %v1470_v12 = vadd.f32 %v1468_v8, %v1385_v9 }
 0x7b4   :  { %4476 = vpow2.f32 %v3616_v11  ;;  %v3617_v13 = vmul.f32 -1.442695, %v1470_v12 }
 0x7b6   :  { %4478 = vpow2.f32 %v3617_v13 }
 0x7c1   :  { %v4477_v14 = vpop.eup %4476 }
 0x7c2   :  { %v1464_v15 = vadd.f32 1.0, %v4477_v14 }
 0x7c3   :  { %v4479_v20 = vpop.eup %4478 }
 0x7c4   :  { %4480 = vrcp.f32 %v1464_v15  ;;  %v1474_v35 = vadd.f32 1.0, %v4479_v20 }
 0x7c7   :  { %v1604_v17 = vpop.f32.mrf.mxu0 }
 0x7c8   :  { %v1680_v18 = vadd.f32 %v1679_v16, %v1604_v17 }
 0x7c9   :  { %v1606_v21 = vpop.f32.mrf.mxu0  ;;  %v1675_v22 = vpop.f32.mrf.mxu1 }
 0x7ca   :  { %v3622_v24 = vmul.f32 -1.442695, %v1680_v18  ;;  %v1690_v36 = vadd.f32 %v1688_v19, %v1606_v21 }
 0x7cb   :  { %v4094_v25 = vpop.f32.mrf.mxu1 }
 0x7cc   :  { %4482 = vpow2.f32 %v3622_v24  ;;  %v3623_v7 = vmul.f32 -1.442695, %v1690_v36  ;;  %v1697_v24 = vadd.f32 %v5556_v6, %v1675_v22  ;;  %v1699_v25 = vrot.slane %v1679_v16, 4 }
 0x7cd   :  { %4484 = vrcp.f32 %v1474_v35 }
 0x7ce   :  { %4486 = vpow2.f32 %v3623_v7  ;;  %v1703_v7 = vld [vmem:[%s6431_s6] sm:$0x3] }
 0x7d1   :  { %v4481_v8 = vpop.eup %4480 }
 0x7d2   :  { %v1478_v9 = vmul.f32 %v4481_v8, %v1477_v5 }
 0x7d4   :  { %v1481_v10 = vadd.f32 %v1479_v37, %v1478_v9 }
 0x7d6   :  { %4488 = vtanh.f32 %v1481_v10 }
 0x7d9   :  { %v4483_v11 = vpop.eup %4482 }
 0x7da   :  { %v1684_v12 = vadd.f32 1.0, %v4483_v11  ;;  %v4485_v13 = vpop.eup %4484 }
 0x7db   :  { %v1485_v14 = vsub.f32 1.0, %v4485_v13  ;;  %v4487_v15 = vpop.eup %4486 }
 0x7dc   :  { %4490 = vrcp.f32 %v1684_v12  ;;  %v1694_v20 = vadd.f32 1.0, %v4487_v15 }
 0x7dd   :  { %v1486_v18 = vmul.f32 %v3618_v3, %v1485_v14 }
 0x7de   :  { %4492 = vrcp.f32 %v1694_v20 }
 0x7e3   :  { %v4489_v17 = vpop.eup %4488 }
 0x7e4   :  { %v1487_v19 = vsub.f32 %v4489_v17, %v5249_v40 }
 0x7e6   :  { %v5559_v21 = vmul.f32 %v1487_v19, %v1486_v18 }
 0x7e9   :  { %v4491_v35 = vpop.eup %4490 }
 0x7ea   :  { %v1698_v36 = vmul.f32 %v4491_v35, %v1697_v24 }
 0x7eb   :  { %v4493_v38 = vpop.eup %4492 }
 0x7ec   :  { %v1701_v37 = vadd.f32 %v1699_v25, %v1698_v36  ;;  %v1704_v5 = vsub.f32 1.0, %v4493_v38 }
 0x7ee   :  { %4494 = vtanh.f32 %v1701_v37  ;;  %v1705_v9 = vmul.f32 %v1704_v5, %v1703_v7 }
 0x7fb   :  { %v4495_v8 = vpop.eup %4494 }
 0x7fc   :  { %v1706_v10 = vsub.f32 %v4495_v8, %v5469_v34 }
 0x7fe   :  { %v1707_v11 = vmul.f32 %v1706_v10, %v1705_v9  ;;  %v3629_v10 = vld [vmem:[%s6431_s6 + $0x2] sm:$0x3] }
 0x800   :  { %v5567_v12 = vadd.f32 %v1707_v11, %v5469_v34  ;;  %v3626_v34 = vld [vmem:[%s6430_s5 + $0x6] sm:$0x3f] }
 0x801   :  { %v1863_v14 = vrot.slane %v3626_v34, 2  ;;  %v1874_v36 = vrot.slane %v3626_v34, 4 }
 0x802   :  { %3624 = vmatmul.mubr.msk.f32.vlgmr.msra.gmra.mxu0 %vm1534_vm2, %v5567_v12  ;;  %4120 = vmatmul.mubr.msk.f32.vlgmr.msra.gmra.mxu1 %vm1534_vm2, %v5567_v12 }
 0x803   :  { %1897 = vmatpush1.msra.mxu0 %v5254_v39  ;;  %4123 = vmatpush3.msra.mxu1 %v5264_v42 }
 0x804   :  { %1898 = vmatprep.subr.mxu0 %v5259_v41  ;;  %4124 = vmatprep.subr.mxu1 %v4646_v4 }
 0x805   :  { %1899 = vmatpush1.msra.mxu0 %v5273_v43  ;;  %4125 = vmatpush3.msra.mxu1 %v5285_v45 }
 0x806   :  { %1900 = vmatprep.subr.mxu0 %v5279_v44  ;;  %4126 = vmatprep.subr.mxu1 %v4646_v4 }
 0x807   :  { %1901 = vmatpush1.msra.mxu0 %v5291_v46  ;;  %4127 = vmatpush3.msra.mxu1 %v5304_v48 }
 0x808   :  { %1902 = vmatprep.subr.mxu0 %v5298_v47  ;;  %4128 = vmatprep.subr.mxu1 %v4646_v4 }
 0x809   :  { %1903 = vmatpush1.msra.mxu0 %v5310_v49  ;;  %4129 = vmatpush3.msra.mxu1 %v5323_v51 }
 0x80a   :  { %1904 = vmatprep.subr.mxu0 %v5317_v50  ;;  %4130 = vmatprep.subr.mxu1 %v4646_v4 }
 0x80b   :  { %1905 = vmatpush1.msra.mxu0 %v5329_v52  ;;  %4131 = vmatpush3.msra.mxu1 %v5342_v54 }
 0x80c   :  { %1906 = vmatprep.subr.mxu0 %v5336_v53  ;;  %4132 = vmatprep.subr.mxu1 %v4646_v4 }
 0x80d   :  { %1907 = vmatpush1.msra.mxu0 %v5348_v55  ;;  %4133 = vmatpush3.msra.mxu1 %v5361_v57 }
 0x80e   :  { %1908 = vmatprep.subr.mxu0 %v5355_v56  ;;  %4134 = vmatprep.subr.mxu1 %v4646_v4 }
 0x80f   :  { %1909 = vmatpush1.msra.mxu0 %v5367_v58  ;;  %4135 = vmatpush3.msra.mxu1 %v5380_v0 }
 0x810   :  { %1910 = vmatprep.subr.mxu0 %v5374_v59  ;;  %4136 = vmatprep.subr.mxu1 %v4646_v4 }
 0x811   :  { %1911 = vmatpush1.msra.mxu0 %v5386_v60  ;;  %4137 = vmatpush3.msra.mxu1 %v5399_v62 }
 0x812   :  { %1912 = vmatprep.subr.mxu0 %v5393_v61  ;;  %4138 = vmatprep.subr.mxu1 %v4646_v4 }
 0x813   :  { %1913 = vmatpush1.msra.mxu0 %v5405_v63  ;;  %4139 = vmatpush3.msra.mxu1 %v5418_v26 }
 0x814   :  { %1914 = vmatprep.subr.mxu0 %v5412_v23  ;;  %4140 = vmatprep.subr.mxu1 %v4646_v4 }
 0x815   :  { %1915 = vmatpush1.msra.mxu0 %v5424_v27  ;;  %4141 = vmatpush3.msra.mxu1 %v5437_v29 }
 0x816   :  { %1916 = vmatprep.subr.mxu0 %v5431_v28  ;;  %4142 = vmatprep.subr.mxu1 %v4646_v4 }
 0x817   :  { %1917 = vmatpush1.msra.mxu0 %v5443_v30  ;;  %4143 = vmatpush3.msra.mxu1 %v5456_v32 }
 0x818   :  { %1918 = vmatprep.subr.mxu0 %v5450_v31  ;;  %4144 = vmatprep.subr.mxu1 %v4646_v4 }
 0x819   :  { %1919 = vmatpush1.msra.mxu0 %v5462_v33  ;;  %1952 = vmatprep.mubr.f32.mxu0 %v4646_v4 }
 0x81a   :  { %4145 = vmatpush3.msra.mxu1 %v5475_v2  ;;  %4146 = vmatprep.mubr.msk.f32.mxu1 %vm4647_vm0, %v4646_v4 }
 0x81b   :  { %2072 = vmatprep.subr.mxu0 %v5237_v1  ;;  %4149 = vmatprep.subr.mxu1 %v4646_v4 }
 0x8c2   :  { %v1778_v16 = vpop.f32.mrf.mxu0  ;;  %v1849_v22 = vpop.f32.mrf.mxu1 }
 0x8c3   :  { %v1855_v13 = vadd.f32 %v3626_v34, %v1778_v16  ;;  %v1872_v37 = vadd.f32 %v5556_v6, %v1849_v22 }
 0x8c4   :  { %v1780_v15 = vpop.f32.mrf.mxu0  ;;  %v4121_v3 = vpop.f32.mrf.mxu1 }
 0x8c5   :  { %v3627_v17 = vmul.f32 -1.442695, %v1855_v13  ;;  %v1865_v18 = vadd.f32 %v1863_v14, %v1780_v15 }
 0x8c7   :  { %4496 = vpow2.f32 %v3627_v17  ;;  %v3628_v19 = vmul.f32 -1.442695, %v1865_v18 }
 0x8c9   :  { %4498 = vpow2.f32 %v3628_v19 }
 0x8d4   :  { %v4497_v20 = vpop.eup %4496 }
 0x8d5   :  { %v1859_v24 = vadd.f32 1.0, %v4497_v20 }
 0x8d6   :  { %v4499_v25 = vpop.eup %4498 }
 0x8d7   :  { %4500 = vrcp.f32 %v1859_v24  ;;  %v1869_v35 = vadd.f32 1.0, %v4499_v25 }
 0x8d9   :  { %4502 = vrcp.f32 %v1869_v35 }
 0x8e4   :  { %v4501_v38 = vpop.eup %4500 }
 0x8e5   :  { %v1873_v5 = vmul.f32 %v4501_v38, %v1872_v37 }
 0x8e6   :  { %v4503_v8 = vpop.eup %4502 }
 0x8e7   :  { %v1876_v7 = vadd.f32 %v1874_v36, %v1873_v5  ;;  %v1880_v9 = vsub.f32 1.0, %v4503_v8 }
 0x8e9   :  { %4504 = vtanh.f32 %v1876_v7  ;;  %v1881_v16 = vmul.f32 %v3629_v10, %v1880_v9 }
 0x8f6   :  { %v4505_v11 = vpop.eup %4504 }
 0x8f7   :  { %v1882_v13 = vsub.f32 %v4505_v11, %v5567_v12 }
 0x8f9   :  { %v1883_v14 = vmul.f32 %v1882_v13, %v1881_v16  ;;  %v3635_v13 = vld [vmem:[%s6431_s6 + $0x4] sm:$0x3] }
 0x8fb   :  { %v5633_v34 = vadd.f32 %v1883_v14, %v5567_v12  ;;  %v3632_v12 = vld [vmem:[%s6430_s5 + $0xc] sm:$0x3f] }
 0x8fc   :  { %v2039_v17 = vrot.slane %v3632_v12, 2  ;;  %v2050_v5 = vrot.slane %v3632_v12, 4 }
 0x8fd   :  { %3630 = vmatmul.mubr.msk.f32.vlgmr.msra.gmra.mxu0 %vm1534_vm2, %v5633_v34  ;;  %4147 = vmatmul.mubr.msk.f32.vlgmr.msra.gmra.mxu1 %vm1534_vm2, %v5633_v34 }
 0x8fe   :  { %2073 = vmatpush1.msra.mxu0 %v5254_v39  ;;  %4150 = vmatpush3.msra.mxu1 %v5264_v42 }
 0x8ff   :  { %2074 = vmatprep.subr.mxu0 %v5259_v41  ;;  %4151 = vmatprep.subr.mxu1 %v4646_v4 }
 0x900   :  { %2075 = vmatpush1.msra.mxu0 %v5273_v43  ;;  %4152 = vmatpush3.msra.mxu1 %v5285_v45 }
 0x901   :  { %2076 = vmatprep.subr.mxu0 %v5279_v44  ;;  %4153 = vmatprep.subr.mxu1 %v4646_v4 }
 0x902   :  { %2077 = vmatpush1.msra.mxu0 %v5291_v46  ;;  %4154 = vmatpush3.msra.mxu1 %v5304_v48 }
 0x903   :  { %2078 = vmatprep.subr.mxu0 %v5298_v47  ;;  %4155 = vmatprep.subr.mxu1 %v4646_v4 }
 0x904   :  { %2079 = vmatpush1.msra.mxu0 %v5310_v49  ;;  %4156 = vmatpush3.msra.mxu1 %v5323_v51 }
 0x905   :  { %2080 = vmatprep.subr.mxu0 %v5317_v50  ;;  %4157 = vmatprep.subr.mxu1 %v4646_v4 }
 0x906   :  { %2081 = vmatpush1.msra.mxu0 %v5329_v52  ;;  %4158 = vmatpush3.msra.mxu1 %v5342_v54 }
 0x907   :  { %2082 = vmatprep.subr.mxu0 %v5336_v53  ;;  %4159 = vmatprep.subr.mxu1 %v4646_v4 }
 0x908   :  { %2083 = vmatpush1.msra.mxu0 %v5348_v55  ;;  %4160 = vmatpush3.msra.mxu1 %v5361_v57 }
 0x909   :  { %2084 = vmatprep.subr.mxu0 %v5355_v56  ;;  %4161 = vmatprep.subr.mxu1 %v4646_v4 }
 0x90a   :  { %2085 = vmatpush1.msra.mxu0 %v5367_v58  ;;  %4162 = vmatpush3.msra.mxu1 %v5380_v0 }
 0x90b   :  { %2086 = vmatprep.subr.mxu0 %v5374_v59  ;;  %4163 = vmatprep.subr.mxu1 %v4646_v4 }
 0x90c   :  { %2087 = vmatpush1.msra.mxu0 %v5386_v60  ;;  %4164 = vmatpush3.msra.mxu1 %v5399_v62 }
 0x90d   :  { %2088 = vmatprep.subr.mxu0 %v5393_v61  ;;  %4165 = vmatprep.subr.mxu1 %v4646_v4 }
 0x90e   :  { %2089 = vmatpush1.msra.mxu0 %v5405_v63  ;;  %4166 = vmatpush3.msra.mxu1 %v5418_v26 }
 0x90f   :  { %2090 = vmatprep.subr.mxu0 %v5412_v23  ;;  %4167 = vmatprep.subr.mxu1 %v4646_v4 }
 0x910   :  { %2091 = vmatpush1.msra.mxu0 %v5424_v27  ;;  %4168 = vmatpush3.msra.mxu1 %v5437_v29 }
 0x911   :  { %2092 = vmatprep.subr.mxu0 %v5431_v28  ;;  %4169 = vmatprep.subr.mxu1 %v4646_v4 }
 0x912   :  { %2093 = vmatpush1.msra.mxu0 %v5443_v30  ;;  %4170 = vmatpush3.msra.mxu1 %v5456_v32 }
 0x913   :  { %2094 = vmatprep.subr.mxu0 %v5450_v31  ;;  %4171 = vmatprep.subr.mxu1 %v4646_v4 }
 0x914   :  { %2095 = vmatpush1.msra.mxu0 %v5462_v33  ;;  %2128 = vmatprep.mubr.f32.mxu0 %v4646_v4 }
 0x915   :  { %4172 = vmatpush3.msra.mxu1 %v5475_v2  ;;  %4173 = vmatprep.mubr.msk.f32.mxu1 %vm4647_vm0, %v4646_v4 }
 0x916   :  { %2248 = vmatprep.subr.mxu0 %v5237_v1  ;;  %4176 = vmatprep.subr.mxu1 %v4646_v4 }
 0x9bd   :  { %v1954_v22 = vpop.f32.mrf.mxu0  ;;  %v2025_v15 = vpop.f32.mrf.mxu1 }
 0x9be   :  { %v2031_v3 = vadd.f32 %v3632_v12, %v1954_v22  ;;  %v2048_v7 = vadd.f32 %v5556_v6, %v2025_v15 }
 0x9bf   :  { %v1956_v18 = vpop.f32.mrf.mxu0  ;;  %v4148_v19 = vpop.f32.mrf.mxu1 }
 0x9c0   :  { %v3633_v20 = vmul.f32 -1.442695, %v2031_v3  ;;  %v2041_v24 = vadd.f32 %v2039_v17, %v1956_v18 }
 0x9c2   :  { %4506 = vpow2.f32 %v3633_v20  ;;  %v3634_v25 = vmul.f32 -1.442695, %v2041_v24 }
 0x9c4   :  { %4508 = vpow2.f32 %v3634_v25 }
 0x9cf   :  { %v4507_v35 = vpop.eup %4506 }
 0x9d0   :  { %v2035_v36 = vadd.f32 1.0, %v4507_v35 }
 0x9d1   :  { %v4509_v37 = vpop.eup %4508 }
 0x9d2   :  { %4510 = vrcp.f32 %v2035_v36  ;;  %v2045_v38 = vadd.f32 1.0, %v4509_v37 }
 0x9d4   :  { %4512 = vrcp.f32 %v2045_v38 }
 0x9df   :  { %v4511_v8 = vpop.eup %4510 }
 0x9e0   :  { %v2049_v9 = vmul.f32 %v4511_v8, %v2048_v7 }
 0x9e1   :  { %v4513_v11 = vpop.eup %4512 }
 0x9e2   :  { %v2052_v10 = vadd.f32 %v2050_v5, %v2049_v9  ;;  %v2056_v16 = vsub.f32 1.0, %v4513_v11 }
 0x9e4   :  { %4514 = vtanh.f32 %v2052_v10  ;;  %v2057_v22 = vmul.f32 %v3635_v13, %v2056_v16 }
 0x9f1   :  { %v4515_v14 = vpop.eup %4514 }
 0x9f2   :  { %v2058_v3 = vsub.f32 %v4515_v14, %v5633_v34 }
 0x9f4   :  { %v2059_v17 = vmul.f32 %v2058_v3, %v2057_v22  ;;  %v3641_v22 = vld [vmem:[%s6431_s6 + $0x6] sm:$0x3] }
 0x9f6   :  { %v5699_v12 = vadd.f32 %v2059_v17, %v5633_v34  ;;  %v3638_v34 = vld [vmem:[%s6430_s5 + $0x12] sm:$0x3f] }
 0x9f7   :  { %v2215_v20 = vrot.slane %v3638_v34, 2  ;;  %v2226_v8 = vrot.slane %v3638_v34, 4 }
 0x9f8   :  { %3636 = vmatmul.mubr.msk.f32.vlgmr.msra.gmra.mxu0 %vm1534_vm2, %v5699_v12  ;;  %4174 = vmatmul.mubr.msk.f32.vlgmr.msra.gmra.mxu1 %vm1534_vm2, %v5699_v12 }
 0x9f9   :  { %2249 = vmatpush1.msra.mxu0 %v5254_v39  ;;  %4177 = vmatpush3.msra.mxu1 %v5264_v42 }
 0x9fa   :  { %2250 = vmatprep.subr.mxu0 %v5259_v41  ;;  %4178 = vmatprep.subr.mxu1 %v4646_v4 }
 0x9fb   :  { %2251 = vmatpush1.msra.mxu0 %v5273_v43  ;;  %4179 = vmatpush3.msra.mxu1 %v5285_v45 }
 0x9fc   :  { %2252 = vmatprep.subr.mxu0 %v5279_v44  ;;  %4180 = vmatprep.subr.mxu1 %v4646_v4 }
 0x9fd   :  { %2253 = vmatpush1.msra.mxu0 %v5291_v46  ;;  %4181 = vmatpush3.msra.mxu1 %v5304_v48 }
 0x9fe   :  { %2254 = vmatprep.subr.mxu0 %v5298_v47  ;;  %4182 = vmatprep.subr.mxu1 %v4646_v4 }
 0x9ff   :  { %2255 = vmatpush1.msra.mxu0 %v5310_v49  ;;  %4183 = vmatpush3.msra.mxu1 %v5323_v51 }
 0xa00   :  { %2256 = vmatprep.subr.mxu0 %v5317_v50  ;;  %4184 = vmatprep.subr.mxu1 %v4646_v4 }
 0xa01   :  { %2257 = vmatpush1.msra.mxu0 %v5329_v52  ;;  %4185 = vmatpush3.msra.mxu1 %v5342_v54 }
 0xa02   :  { %2258 = vmatprep.subr.mxu0 %v5336_v53  ;;  %4186 = vmatprep.subr.mxu1 %v4646_v4 }
 0xa03   :  { %2259 = vmatpush1.msra.mxu0 %v5348_v55  ;;  %4187 = vmatpush3.msra.mxu1 %v5361_v57 }
 0xa04   :  { %2260 = vmatprep.subr.mxu0 %v5355_v56  ;;  %4188 = vmatprep.subr.mxu1 %v4646_v4 }
 0xa05   :  { %2261 = vmatpush1.msra.mxu0 %v5367_v58  ;;  %4189 = vmatpush3.msra.mxu1 %v5380_v0 }
 0xa06   :  { %2262 = vmatprep.subr.mxu0 %v5374_v59  ;;  %4190 = vmatprep.subr.mxu1 %v4646_v4 }
 0xa07   :  { %2263 = vmatpush1.msra.mxu0 %v5386_v60  ;;  %4191 = vmatpush3.msra.mxu1 %v5399_v62 }
 0xa08   :  { %2264 = vmatprep.subr.mxu0 %v5393_v61  ;;  %4192 = vmatprep.subr.mxu1 %v4646_v4 }
 0xa09   :  { %2265 = vmatpush1.msra.mxu0 %v5405_v63  ;;  %4193 = vmatpush3.msra.mxu1 %v5418_v26 }
 0xa0a   :  { %2266 = vmatprep.subr.mxu0 %v5412_v23  ;;  %4194 = vmatprep.subr.mxu1 %v4646_v4 }
 0xa0b   :  { %2267 = vmatpush1.msra.mxu0 %v5424_v27  ;;  %4195 = vmatpush3.msra.mxu1 %v5437_v29 }
 0xa0c   :  { %2268 = vmatprep.subr.mxu0 %v5431_v28  ;;  %4196 = vmatprep.subr.mxu1 %v4646_v4 }
 0xa0d   :  { %2269 = vmatpush1.msra.mxu0 %v5443_v30  ;;  %4197 = vmatpush3.msra.mxu1 %v5456_v32 }
 0xa0e   :  { %2270 = vmatprep.subr.mxu0 %v5450_v31  ;;  %4198 = vmatprep.subr.mxu1 %v4646_v4 }
 0xa0f   :  { %2271 = vmatpush1.msra.mxu0 %v5462_v33  ;;  %2304 = vmatprep.mubr.f32.mxu0 %v4646_v4 }
 0xa10   :  { %4199 = vmatpush3.msra.mxu1 %v5475_v2  ;;  %4200 = vmatprep.mubr.msk.f32.mxu1 %vm4647_vm0, %v4646_v4 }
 0xa11   :  { %2424 = vmatprep.subr.mxu0 %v5237_v1  ;;  %4203 = vmatprep.subr.mxu1 %v4646_v4 }
 0xab8   :  { %v2130_v15 = vpop.f32.mrf.mxu0  ;;  %v2201_v18 = vpop.f32.mrf.mxu1 }
 0xab9   :  { %v2207_v19 = vadd.f32 %v3638_v34, %v2130_v15  ;;  %v2224_v9 = vadd.f32 %v5556_v6, %v2201_v18  ;;  %v5889_v18 = vld [vmem:[%s6432_s7 + $0xe8] sm:$0xff] }
 0xaba   :  { %v2132_v24 = vpop.f32.mrf.mxu0  ;;  %v4175_v25 = vpop.f32.mrf.mxu1 }
 0xabb   :  { %v3639_v35 = vmul.f32 -1.442695, %v2207_v19  ;;  %v2217_v36 = vadd.f32 %v2215_v20, %v2132_v24  ;;  %v5895_v20 = vld [vmem:[%s6432_s7 + $0xc8] sm:$0xff]  ;;  %v5902_v24 = vld [vmem:[%s6432_s7 + $0xc0] sm:$0xff]  ;;  %v5908_v25 = vld [vmem:[%s6432_s7 + $0xd0] sm:$0xff] }
 0xabd   :  { %4516 = vpow2.f32 %v3639_v35  ;;  %v3640_v37 = vmul.f32 -1.442695, %v2217_v36  ;;  %v5914_v35 = vld [vmem:[%s6432_s7 + $0xb0] sm:$0xff]  ;;  %v5921_v36 = vld [vmem:[%s6432_s7 + $0xa8] sm:$0xff] }
 0xabf   :  { %4518 = vpow2.f32 %v3640_v37  ;;  %v5927_v37 = vld [vmem:[%s6432_s7 + $0xb8] sm:$0xff] }
 0xaca   :  { %v4517_v38 = vpop.eup %4516 }
 0xacb   :  { %v2211_v5 = vadd.f32 1.0, %v4517_v38  ;;  %v5933_v38 = vld [vmem:[%s6432_s7 + $0x98] sm:$0xff] }
 0xacc   :  { %v4519_v1 = vpop.eup %4518 }
 0xacd   :  { %4520 = vrcp.f32 %v2211_v5  ;;  %v2221_v7 = vadd.f32 1.0, %v4519_v1  ;;  %v5940_v5 = vld [vmem:[%s6432_s7 + $0x90] sm:$0xff]  ;;  %v5946_v1 = vld [vmem:[%s6432_s7 + $0xa0] sm:$0xff] }
 0xacf   :  { %4522 = vrcp.f32 %v2221_v7  ;;  %v5952_v7 = vld [vmem:[%s6432_s7 + $0x80] sm:$0xff] }
 0xada   :  { %v4521_v10 = vpop.eup %4520 }
 0xadb   :  { %v2225_v11 = vmul.f32 %v4521_v10, %v2224_v9  ;;  %v5965_v9 = vld [vmem:[%s6432_s7 + $0x88] sm:$0xff] }
 0xadc   :  { %v4523_v13 = vpop.eup %4522  ;;  %v5971_v10 = vld [vmem:[%s6432_s7 + $0x68] sm:$0xff] }
 0xadd   :  { %v2228_v16 = vadd.f32 %v2226_v8, %v2225_v11  ;;  %v2232_v14 = vsub.f32 1.0, %v4523_v13  ;;  %v5959_v8 = vld [vmem:[%s6432_s7 + $0x78] sm:$0xff]  ;;  %v5978_v11 = vld [vmem:[%s6432_s7 + $0x60] sm:$0xff]  ;;  %v5990_v13 = vld [vmem:[%s6432_s7 + $0x50] sm:$0xff] }
 0xadf   :  { %4524 = vtanh.f32 %v2228_v16  ;;  %v2233_v17 = vmul.f32 %v3641_v22, %v2232_v14  ;;  %v5984_v16 = vld [vmem:[%s6432_s7 + $0x70] sm:$0xff]  ;;  %v5997_v14 = vld [vmem:[%s6432_s7 + $0x48] sm:$0xff]  ;;  %v6003_v22 = vld [vmem:[%s6432_s7 + $0x58] sm:$0xff] }
 0xaec   :  { %v4525_v3 = vpop.eup %4524 }
 0xaed   :  { %v2234_v15 = vsub.f32 %v4525_v3, %v5699_v12  ;;  %v6009_v3 = vld [vmem:[%s6432_s7 + $0x38] sm:$0xff] }
 0xaef   :  { %v2235_v19 = vmul.f32 %v2234_v15, %v2233_v17  ;;  %v6016_v17 = vld [vmem:[%s6432_s7 + $0x30] sm:$0xff]  ;;  %v6022_v15 = vld [vmem:[%s6432_s7 + $0x40] sm:$0xff] }
 0xaf1   :  { %v5765_v34 = vadd.f32 %v2235_v19, %v5699_v12  ;;  %v5883_v12 = vld [vmem:[%s6432_s7 + $0xd8] sm:$0xff]  ;;  %v6028_v19 = vld [vmem:[%s6432_s7 + $0x20] sm:$0xff] }
 0xaf3   :  { %3642 = vmatmul.mubr.msk.f32.vlgmr.msra.gmra.mxu0 %vm1534_vm2, %v5765_v34  ;;  %4201 = vmatmul.mubr.msk.f32.vlgmr.msra.gmra.mxu1 %vm1534_vm2, %v5765_v34 }
 0xaf4   :  { %2425 = vmatpush1.msra.mxu0 %v5254_v39  ;;  %4204 = vmatpush3.msra.mxu1 %v5264_v42  ;;  %v5823_v39 = vld [vmem:[%s6432_s7 + $0x110] sm:$0xff] }
 0xaf5   :  { %2426 = vmatprep.subr.mxu0 %v5259_v41  ;;  %4205 = vmatprep.subr.mxu1 %v4646_v4  ;;  %v3644_v41 = vld [vmem:[%s6430_s5 + $0x18] sm:$0x3f] }
 0xaf6   :  { %2427 = vmatpush1.msra.mxu0 %v5273_v43  ;;  %4206 = vmatpush3.msra.mxu1 %v5285_v45  ;;  %v2391_v45 = vrot.slane %v3644_v41, 2 }
 0xaf7   :  { %2428 = vmatprep.subr.mxu0 %v5279_v44  ;;  %4207 = vmatprep.subr.mxu1 %v4646_v4 }
 0xaf8   :  { %2429 = vmatpush1.msra.mxu0 %v5291_v46  ;;  %4208 = vmatpush3.msra.mxu1 %v5304_v48 }
 0xaf9   :  { %2430 = vmatprep.subr.mxu0 %v5298_v47  ;;  %4209 = vmatprep.subr.mxu1 %v4646_v4 }
 0xafa   :  { %2431 = vmatpush1.msra.mxu0 %v5310_v49  ;;  %4210 = vmatpush3.msra.mxu1 %v5323_v51 }
 0xafb   :  { %2432 = vmatprep.subr.mxu0 %v5317_v50  ;;  %4211 = vmatprep.subr.mxu1 %v4646_v4 }
 0xafc   :  { %2433 = vmatpush1.msra.mxu0 %v5329_v52  ;;  %4212 = vmatpush3.msra.mxu1 %v5342_v54 }
 0xafd   :  { %2434 = vmatprep.subr.mxu0 %v5336_v53  ;;  %4213 = vmatprep.subr.mxu1 %v4646_v4 }
 0xafe   :  { %2435 = vmatpush1.msra.mxu0 %v5348_v55  ;;  %4214 = vmatpush3.msra.mxu1 %v5361_v57  ;;  %v2402_v55 = vrot.slane %v3644_v41, 4 }
 0xaff   :  { %2436 = vmatprep.subr.mxu0 %v5355_v56  ;;  %4215 = vmatprep.subr.mxu1 %v4646_v4 }
 0xb00   :  { %2437 = vmatpush1.msra.mxu0 %v5367_v58  ;;  %4216 = vmatpush3.msra.mxu1 %v5380_v0 }
 0xb01   :  { %2438 = vmatprep.subr.mxu0 %v5374_v59  ;;  %4217 = vmatprep.subr.mxu1 %v4646_v4 }
 0xb02   :  { %2439 = vmatpush1.msra.mxu0 %v5386_v60  ;;  %4218 = vmatpush3.msra.mxu1 %v5399_v62 }
 0xb03   :  { %2440 = vmatprep.subr.mxu0 %v5393_v61  ;;  %4219 = vmatprep.subr.mxu1 %v4646_v4  ;;  %v3647_v61 = vld [vmem:[%s6431_s6 + $0x8] sm:$0x3] }
 0xb04   :  { %2441 = vmatpush1.msra.mxu0 %v5405_v63  ;;  %4220 = vmatpush3.msra.mxu1 %v5418_v26 }
 0xb05   :  { %2442 = vmatprep.subr.mxu0 %v5412_v23  ;;  %4221 = vmatprep.subr.mxu1 %v4646_v4 }
 0xb06   :  { %2443 = vmatpush1.msra.mxu0 %v5424_v27  ;;  %4222 = vmatpush3.msra.mxu1 %v5437_v29  ;;  %v5851_v29 = vld [vmem:[%s6432_s7 + $0x118] sm:$0xff] }
 0xb07   :  { %2444 = vmatprep.subr.mxu0 %v5431_v28  ;;  %4223 = vmatprep.subr.mxu1 %v4646_v4  ;;  %v5845_v28 = vld [vmem:[%s6432_s7 + $0x108] sm:$0xff] }
 0xb08   :  { %2445 = vmatpush1.msra.mxu0 %v5443_v30  ;;  %4224 = vmatpush3.msra.mxu1 %v5456_v32  ;;  %v5857_v30 = vld [vmem:[%s6432_s7 + $0xf8] sm:$0xff]  ;;  %v5870_v32 = vld [vmem:[%s6432_s7 + $0x100] sm:$0xff] }
 0xb09   :  { %2446 = vmatprep.subr.mxu0 %v5450_v31  ;;  %4225 = vmatprep.subr.mxu1 %v4646_v4  ;;  %v5864_v31 = vld [vmem:[%s6432_s7 + $0xf0] sm:$0xff] }
 0xb0a   :  { %2447 = vmatpush1.msra.mxu0 %v5462_v33  ;;  %2480 = vmatprep.mubr.f32.mxu0 %v4646_v4  ;;  %v5876_v33 = vld [vmem:[%s6432_s7 + $0xe0] sm:$0xff] }
 0xb0b   :  { %4226 = vmatpush3.msra.mxu1 %v5475_v2  ;;  %4227 = vmatprep.mubr.msk.f32.mxu1 %vm4647_vm0, %v4646_v4 }
 0xb0c   :  { %2600 = vmatprep.subr.mxu0 %v5823_v39  ;;  %4230 = vmatprep.subr.mxu1 %v4646_v4 }
 0xbb3   :  { %v2306_v42 = vpop.f32.mrf.mxu0  ;;  %v2377_v43 = vpop.f32.mrf.mxu1 }
 0xbb4   :  { %v2383_v44 = vadd.f32 %v3644_v41, %v2306_v42  ;;  %v2400_v56 = vadd.f32 %v5556_v6, %v2377_v43  ;;  %v6041_v41 = vld [vmem:[%s6432_s7 + $0x28] sm:$0xff]  ;;  %v6054_v43 = vld [vmem:[%s6432_s7] sm:$0xff] }
 0xbb5   :  { %v2308_v46 = vpop.f32.mrf.mxu0  ;;  %v4202_v47 = vpop.f32.mrf.mxu1  ;;  %v6047_v42 = vld [vmem:[%s6432_s7 + $0x8] sm:$0xff] }
 0xbb6   :  { %v3645_v48 = vmul.f32 -1.442695, %v2383_v44  ;;  %v2393_v49 = vadd.f32 %v2391_v45, %v2308_v46  ;;  %v3650_v44 = vld [vmem:[%s6430_s5 + $0x1e] sm:$0x3f] }
 0xbb8   :  { %4526 = vpow2.f32 %v3645_v48  ;;  %v3646_v50 = vmul.f32 -1.442695, %v2393_v49  ;;  %v2567_v48 = vrot.slane %v3650_v44, 2 }
 0xbba   :  { %4528 = vpow2.f32 %v3646_v50 }
 0xbc5   :  { %v4527_v51 = vpop.eup %4526 }
 0xbc6   :  { %v2387_v52 = vadd.f32 1.0, %v4527_v51 }
 0xbc7   :  { %v4529_v53 = vpop.eup %4528 }
 0xbc8   :  { %4530 = vrcp.f32 %v2387_v52  ;;  %v2397_v54 = vadd.f32 1.0, %v4529_v53 }
 0xbca   :  { %4532 = vrcp.f32 %v2397_v54 }
 0xbd5   :  { %v4531_v57 = vpop.eup %4530 }
 0xbd6   :  { %v2401_v58 = vmul.f32 %v4531_v57, %v2400_v56  ;;  %v2578_v57 = vrot.slane %v3650_v44, 4 }
 0xbd7   :  { %v4533_v0 = vpop.eup %4532 }
 0xbd8   :  { %v2404_v59 = vadd.f32 %v2402_v55, %v2401_v58  ;;  %v2408_v60 = vsub.f32 1.0, %v4533_v0 }
 0xbda   :  { %4534 = vtanh.f32 %v2404_v59  ;;  %v2409_v63 = vmul.f32 %v3647_v61, %v2408_v60 }
 0xbe7   :  { %v4535_v62 = vpop.eup %4534 }
 0xbe8   :  { %v2410_v23 = vsub.f32 %v4535_v62, %v5765_v34 }
 0xbea   :  { %v2411_v26 = vmul.f32 %v2410_v23, %v2409_v63  ;;  %v3653_v63 = vld [vmem:[%s6431_s6 + $0xa] sm:$0x3] }
 0xbec   :  { %v5836_v27 = vadd.f32 %v2411_v26, %v5765_v34  ;;  %v6035_v34 = vld [vmem:[%s6432_s7 + $0x18] sm:$0xff] }
 0xbee   :  { %3648 = vmatmul.mubr.msk.f32.vlgmr.msra.gmra.mxu0 %vm1534_vm2, %v5836_v27  ;;  %4228 = vmatmul.mubr.msk.f32.vlgmr.msra.gmra.mxu1 %vm1534_vm2, %v5836_v27 }
 0xbef   :  { %2601 = vmatpush1.msra.mxu0 %v5845_v28  ;;  %4231 = vmatpush3.msra.mxu1 %v5851_v29 }
 0xbf0   :  { %2602 = vmatprep.subr.mxu0 %v5857_v30  ;;  %4232 = vmatprep.subr.mxu1 %v4646_v4 }
 0xbf1   :  { %2603 = vmatpush1.msra.mxu0 %v5864_v31  ;;  %4233 = vmatpush3.msra.mxu1 %v5870_v32 }
 0xbf2   :  { %2604 = vmatprep.subr.mxu0 %v5876_v33  ;;  %4234 = vmatprep.subr.mxu1 %v4646_v4 }
 0xbf3   :  { %2605 = vmatpush1.msra.mxu0 %v5883_v12  ;;  %4235 = vmatpush3.msra.mxu1 %v5889_v18 }
 0xbf4   :  { %2606 = vmatprep.subr.mxu0 %v5895_v20  ;;  %4236 = vmatprep.subr.mxu1 %v4646_v4 }
 0xbf5   :  { %2607 = vmatpush1.msra.mxu0 %v5902_v24  ;;  %4237 = vmatpush3.msra.mxu1 %v5908_v25 }
 0xbf6   :  { %2608 = vmatprep.subr.mxu0 %v5914_v35  ;;  %4238 = vmatprep.subr.mxu1 %v4646_v4 }
 0xbf7   :  { %2609 = vmatpush1.msra.mxu0 %v5921_v36  ;;  %4239 = vmatpush3.msra.mxu1 %v5927_v37 }
 0xbf8   :  { %2610 = vmatprep.subr.mxu0 %v5933_v38  ;;  %4240 = vmatprep.subr.mxu1 %v4646_v4 }
 0xbf9   :  { %2611 = vmatpush1.msra.mxu0 %v5940_v5  ;;  %4241 = vmatpush3.msra.mxu1 %v5946_v1 }
 0xbfa   :  { %2612 = vmatprep.subr.mxu0 %v5952_v7  ;;  %4242 = vmatprep.subr.mxu1 %v4646_v4 }
 0xbfb   :  { %2613 = vmatpush1.msra.mxu0 %v5959_v8  ;;  %4243 = vmatpush3.msra.mxu1 %v5965_v9 }
 0xbfc   :  { %2614 = vmatprep.subr.mxu0 %v5971_v10  ;;  %4244 = vmatprep.subr.mxu1 %v4646_v4 }
 0xbfd   :  { %2615 = vmatpush1.msra.mxu0 %v5978_v11  ;;  %4245 = vmatpush3.msra.mxu1 %v5984_v16 }
 0xbfe   :  { %2616 = vmatprep.subr.mxu0 %v5990_v13  ;;  %4246 = vmatprep.subr.mxu1 %v4646_v4 }
 0xbff   :  { %2617 = vmatpush1.msra.mxu0 %v5997_v14  ;;  %4247 = vmatpush3.msra.mxu1 %v6003_v22 }
 0xc00   :  { %2618 = vmatprep.subr.mxu0 %v6009_v3  ;;  %4248 = vmatprep.subr.mxu1 %v4646_v4 }
 0xc01   :  { %2619 = vmatpush1.msra.mxu0 %v6016_v17  ;;  %4249 = vmatpush3.msra.mxu1 %v6022_v15 }
 0xc02   :  { %2620 = vmatprep.subr.mxu0 %v6028_v19  ;;  %4250 = vmatprep.subr.mxu1 %v4646_v4 }
 0xc03   :  { %2621 = vmatpush1.msra.mxu0 %v6035_v34  ;;  %4251 = vmatpush3.msra.mxu1 %v6041_v41 }
 0xc04   :  { %2622 = vmatprep.subr.mxu0 %v6047_v42  ;;  %4252 = vmatprep.subr.mxu1 %v4646_v4 }
 0xc05   :  { %2623 = vmatpush1.msra.mxu0 %v6054_v43  ;;  %2656 = vmatprep.mubr.f32.mxu0 %v4646_v4 }
 0xc06   :  { %4253 = vmatpush3.msra.mxu1 %v5475_v2  ;;  %4254 = vmatprep.mubr.msk.f32.mxu1 %vm4647_vm0, %v4646_v4 }
 0xc07   :  { %2776 = vmatprep.subr.mxu0 %v5823_v39  ;;  %4257 = vmatprep.subr.mxu1 %v4646_v4 }
 0xcae   :  { %v2482_v45 = vpop.f32.mrf.mxu0  ;;  %v2553_v46 = vpop.f32.mrf.mxu1 }
 0xcaf   :  { %v2559_v47 = vadd.f32 %v3650_v44, %v2482_v45  ;;  %v2576_v58 = vadd.f32 %v5556_v6, %v2553_v46  ;;  %v3656_v46 = vld [vmem:[%s6430_s5 + $0x24] sm:$0x3f] }
 0xcb0   :  { %v2484_v49 = vpop.f32.mrf.mxu0  ;;  %v4229_v50 = vpop.f32.mrf.mxu1 }
 0xcb1   :  { %v3651_v51 = vmul.f32 -1.442695, %v2559_v47  ;;  %v2569_v2 = vadd.f32 %v2567_v48, %v2484_v49 }
 0xcb3   :  { %4536 = vpow2.f32 %v3651_v51  ;;  %v3652_v52 = vmul.f32 -1.442695, %v2569_v2  ;;  %v2743_v51 = vrot.slane %v3656_v46, 2 }
 0xcb5   :  { %4538 = vpow2.f32 %v3652_v52 }
 0xcc0   :  { %v4537_v53 = vpop.eup %4536 }
 0xcc1   :  { %v2563_v54 = vadd.f32 1.0, %v4537_v53 }
 0xcc2   :  { %v4539_v55 = vpop.eup %4538 }
 0xcc3   :  { %4540 = vrcp.f32 %v2563_v54  ;;  %v2573_v56 = vadd.f32 1.0, %v4539_v55 }
 0xcc5   :  { %4542 = vrcp.f32 %v2573_v56 }
 0xcd0   :  { %v4541_v59 = vpop.eup %4540 }
 0xcd1   :  { %v2577_v0 = vmul.f32 %v4541_v59, %v2576_v58 }
 0xcd2   :  { %v4543_v61 = vpop.eup %4542 }
 0xcd3   :  { %v2580_v60 = vadd.f32 %v2578_v57, %v2577_v0  ;;  %v2584_v62 = vsub.f32 1.0, %v4543_v61  ;;  %v2754_v0 = vrot.slane %v3656_v46, 4 }
 0xcd5   :  { %4544 = vtanh.f32 %v2580_v60  ;;  %v2585_v26 = vmul.f32 %v3653_v63, %v2584_v62 }
 0xce2   :  { %v4545_v23 = vpop.eup %4544 }
 0xce3   :  { %v2586_v45 = vsub.f32 %v4545_v23, %v5836_v27 }
 0xce5   :  { %v2587_v47 = vmul.f32 %v2586_v45, %v2585_v26  ;;  %v3659_v45 = vld [vmem:[%s6431_s6 + $0xc] sm:$0x3] }
 0xce7   :  { %v6072_v44 = vadd.f32 %v2587_v47, %v5836_v27  ;;  %v6127_v27 = vld [vmem:[%s6432_s7 + $0x10] sm:$0xff] }
 0xce9   :  { %3654 = vmatmul.mubr.msk.f32.vlgmr.msra.gmra.mxu0 %vm1534_vm2, %v6072_v44  ;;  %4255 = vmatmul.mubr.msk.f32.vlgmr.msra.gmra.mxu1 %vm1534_vm2, %v6072_v44 }
 0xcea   :  { %2777 = vmatpush1.msra.mxu0 %v5845_v28  ;;  %4258 = vmatpush3.msra.mxu1 %v5851_v29 }
 0xceb   :  { %2778 = vmatprep.subr.mxu0 %v5857_v30  ;;  %4259 = vmatprep.subr.mxu1 %v4646_v4 }
 0xcec   :  { %2779 = vmatpush1.msra.mxu0 %v5864_v31  ;;  %4260 = vmatpush3.msra.mxu1 %v5870_v32 }
 0xced   :  { %2780 = vmatprep.subr.mxu0 %v5876_v33  ;;  %4261 = vmatprep.subr.mxu1 %v4646_v4 }
 0xcee   :  { %2781 = vmatpush1.msra.mxu0 %v5883_v12  ;;  %4262 = vmatpush3.msra.mxu1 %v5889_v18 }
 0xcef   :  { %2782 = vmatprep.subr.mxu0 %v5895_v20  ;;  %4263 = vmatprep.subr.mxu1 %v4646_v4 }
 0xcf0   :  { %2783 = vmatpush1.msra.mxu0 %v5902_v24  ;;  %4264 = vmatpush3.msra.mxu1 %v5908_v25 }
 0xcf1   :  { %2784 = vmatprep.subr.mxu0 %v5914_v35  ;;  %4265 = vmatprep.subr.mxu1 %v4646_v4 }
 0xcf2   :  { %2785 = vmatpush1.msra.mxu0 %v5921_v36  ;;  %4266 = vmatpush3.msra.mxu1 %v5927_v37 }
 0xcf3   :  { %2786 = vmatprep.subr.mxu0 %v5933_v38  ;;  %4267 = vmatprep.subr.mxu1 %v4646_v4 }
 0xcf4   :  { %2787 = vmatpush1.msra.mxu0 %v5940_v5  ;;  %4268 = vmatpush3.msra.mxu1 %v5946_v1 }
 0xcf5   :  { %2788 = vmatprep.subr.mxu0 %v5952_v7  ;;  %4269 = vmatprep.subr.mxu1 %v4646_v4 }
 0xcf6   :  { %2789 = vmatpush1.msra.mxu0 %v5959_v8  ;;  %4270 = vmatpush3.msra.mxu1 %v5965_v9 }
 0xcf7   :  { %2790 = vmatprep.subr.mxu0 %v5971_v10  ;;  %4271 = vmatprep.subr.mxu1 %v4646_v4 }
 0xcf8   :  { %2791 = vmatpush1.msra.mxu0 %v5978_v11  ;;  %4272 = vmatpush3.msra.mxu1 %v5984_v16 }
 0xcf9   :  { %2792 = vmatprep.subr.mxu0 %v5990_v13  ;;  %4273 = vmatprep.subr.mxu1 %v4646_v4 }
 0xcfa   :  { %2793 = vmatpush1.msra.mxu0 %v5997_v14  ;;  %4274 = vmatpush3.msra.mxu1 %v6003_v22 }
 0xcfb   :  { %2794 = vmatprep.subr.mxu0 %v6009_v3  ;;  %4275 = vmatprep.subr.mxu1 %v4646_v4 }
 0xcfc   :  { %2795 = vmatpush1.msra.mxu0 %v6016_v17  ;;  %4276 = vmatpush3.msra.mxu1 %v6022_v15 }
 0xcfd   :  { %2796 = vmatprep.subr.mxu0 %v6028_v19  ;;  %4277 = vmatprep.subr.mxu1 %v4646_v4 }
 0xcfe   :  { %2797 = vmatpush1.msra.mxu0 %v6035_v34  ;;  %4278 = vmatpush3.msra.mxu1 %v6041_v41 }
 0xcff   :  { %2798 = vmatprep.subr.mxu0 %v6047_v42  ;;  %4279 = vmatprep.subr.mxu1 %v4646_v4 }
 0xd00   :  { %2799 = vmatpush1.msra.mxu0 %v6054_v43  ;;  %2832 = vmatprep.mubr.f32.mxu0 %v4646_v4 }
 0xd01   :  { %4280 = vmatpush3.msra.mxu1 %v6127_v27  ;;  %4281 = vmatprep.mubr.msk.f32.mxu1 %vm4647_vm0, %v4646_v4 }
 0xd02   :  { %2952 = vmatprep.subr.mxu0 %v5823_v39  ;;  %4284 = vmatprep.subr.mxu1 %v4646_v4 }
 0xda9   :  { %v2658_v48 = vpop.f32.mrf.mxu0  ;;  %v2729_v49 = vpop.f32.mrf.mxu1 }
 0xdaa   :  { %v2735_v50 = vadd.f32 %v3656_v46, %v2658_v48  ;;  %v2752_v60 = vadd.f32 %v5556_v6, %v2729_v49  ;;  %v3662_v6 = vld [vmem:[%s6430_s5 + $0x2a] sm:$0x3f] }
 0xdab   :  { %v2660_v2 = vpop.f32.mrf.mxu0  ;;  %v4256_v52 = vpop.f32.mrf.mxu1 }
 0xdac   :  { %v3657_v53 = vmul.f32 -1.442695, %v2735_v50  ;;  %v2745_v54 = vadd.f32 %v2743_v51, %v2660_v2  ;;  %v2919_v52 = vrot.slane %v3662_v6, 2 }
 0xdae   :  { %4546 = vpow2.f32 %v3657_v53  ;;  %v3658_v55 = vmul.f32 -1.442695, %v2745_v54 }
 0xdb0   :  { %4548 = vpow2.f32 %v3658_v55 }
 0xdbb   :  { %v4547_v56 = vpop.eup %4546 }
 0xdbc   :  { %v2739_v57 = vadd.f32 1.0, %v4547_v56 }
 0xdbd   :  { %v4549_v58 = vpop.eup %4548 }
 0xdbe   :  { %4550 = vrcp.f32 %v2739_v57  ;;  %v2749_v59 = vadd.f32 1.0, %v4549_v58 }
 0xdc0   :  { %4552 = vrcp.f32 %v2749_v59 }
 0xdcb   :  { %v4551_v61 = vpop.eup %4550 }
 0xdcc   :  { %v2753_v62 = vmul.f32 %v4551_v61, %v2752_v60  ;;  %v2930_v60 = vrot.slane %v3662_v6, 4  ;;  %v6206_v61 = vld [vmem:[%s6433_s8] ss:$0 sm:$0xff] }
 0xdcd   :  { %v4553_v23 = vpop.eup %4552 }
 0xdce   :  { %v2756_v63 = vadd.f32 %v2754_v0, %v2753_v62  ;;  %v2760_v26 = vsub.f32 1.0, %v4553_v23 }
 0xdd0   :  { %4554 = vtanh.f32 %v2756_v63  ;;  %v2761_v48 = vmul.f32 %v3659_v45, %v2760_v26 }
 0xddd   :  { %v4555_v47 = vpop.eup %4554 }
 0xdde   :  { %v2762_v50 = vsub.f32 %v4555_v47, %v6072_v44 }
 0xde0   :  { %v2763_v51 = vmul.f32 %v2762_v50, %v2761_v48  ;;  %v3665_v48 = vld [vmem:[%s6431_s6 + $0xe] sm:$0x3] }
 0xde2   :  { %v6143_v46 = vadd.f32 %v2763_v51, %v6072_v44 }
 0xde4   :  { %3660 = vmatmul.mubr.msk.f32.vlgmr.msra.gmra.mxu0 %vm1534_vm2, %v6143_v46  ;;  %4282 = vmatmul.mubr.msk.f32.vlgmr.msra.gmra.mxu1 %vm1534_vm2, %v6143_v46 }
 0xde5   :  { %2953 = vmatpush1.msra.mxu0 %v5845_v28  ;;  %4285 = vmatpush3.msra.mxu1 %v5851_v29 }
 0xde6   :  { %2954 = vmatprep.subr.mxu0 %v5857_v30  ;;  %4286 = vmatprep.subr.mxu1 %v4646_v4 }
 0xde7   :  { %2955 = vmatpush1.msra.mxu0 %v5864_v31  ;;  %4287 = vmatpush3.msra.mxu1 %v5870_v32 }
 0xde8   :  { %2956 = vmatprep.subr.mxu0 %v5876_v33  ;;  %4288 = vmatprep.subr.mxu1 %v4646_v4 }
 0xde9   :  { %2957 = vmatpush1.msra.mxu0 %v5883_v12  ;;  %4289 = vmatpush3.msra.mxu1 %v5889_v18 }
 0xdea   :  { %2958 = vmatprep.subr.mxu0 %v5895_v20  ;;  %4290 = vmatprep.subr.mxu1 %v4646_v4 }
 0xdeb   :  { %2959 = vmatpush1.msra.mxu0 %v5902_v24  ;;  %4291 = vmatpush3.msra.mxu1 %v5908_v25 }
 0xdec   :  { %2960 = vmatprep.subr.mxu0 %v5914_v35  ;;  %4292 = vmatprep.subr.mxu1 %v4646_v4 }
 0xded   :  { %2961 = vmatpush1.msra.mxu0 %v5921_v36  ;;  %4293 = vmatpush3.msra.mxu1 %v5927_v37 }
 0xdee   :  { %2962 = vmatprep.subr.mxu0 %v5933_v38  ;;  %4294 = vmatprep.subr.mxu1 %v4646_v4 }
 0xdef   :  { %2963 = vmatpush1.msra.mxu0 %v5940_v5  ;;  %4295 = vmatpush3.msra.mxu1 %v5946_v1 }
 0xdf0   :  { %2964 = vmatprep.subr.mxu0 %v5952_v7  ;;  %4296 = vmatprep.subr.mxu1 %v4646_v4 }
 0xdf1   :  { %2965 = vmatpush1.msra.mxu0 %v5959_v8  ;;  %4297 = vmatpush3.msra.mxu1 %v5965_v9 }
 0xdf2   :  { %2966 = vmatprep.subr.mxu0 %v5971_v10  ;;  %4298 = vmatprep.subr.mxu1 %v4646_v4 }
 0xdf3   :  { %2967 = vmatpush1.msra.mxu0 %v5978_v11  ;;  %4299 = vmatpush3.msra.mxu1 %v5984_v16 }
 0xdf4   :  { %2968 = vmatprep.subr.mxu0 %v5990_v13  ;;  %4300 = vmatprep.subr.mxu1 %v4646_v4 }
 0xdf5   :  { %2969 = vmatpush1.msra.mxu0 %v5997_v14  ;;  %4301 = vmatpush3.msra.mxu1 %v6003_v22 }
 0xdf6   :  { %2970 = vmatprep.subr.mxu0 %v6009_v3  ;;  %4302 = vmatprep.subr.mxu1 %v4646_v4 }
 0xdf7   :  { %2971 = vmatpush1.msra.mxu0 %v6016_v17  ;;  %4303 = vmatpush3.msra.mxu1 %v6022_v15 }
 0xdf8   :  { %2972 = vmatprep.subr.mxu0 %v6028_v19  ;;  %4304 = vmatprep.subr.mxu1 %v4646_v4 }
 0xdf9   :  { %2973 = vmatpush1.msra.mxu0 %v6035_v34  ;;  %4305 = vmatpush3.msra.mxu1 %v6041_v41 }
 0xdfa   :  { %2974 = vmatprep.subr.mxu0 %v6047_v42  ;;  %4306 = vmatprep.subr.mxu1 %v4646_v4 }
 0xdfb   :  { %2975 = vmatpush1.msra.mxu0 %v6054_v43  ;;  %3008 = vmatprep.mubr.f32.mxu0 %v4646_v4 }
 0xdfc   :  { %4307 = vmatpush3.msra.mxu1 %v6127_v27  ;;  %4308 = vmatprep.mubr.msk.f32.mxu1 %vm4647_vm0, %v4646_v4 }
 0xdfd   :  { %4311 = vmatprep.subr.mxu1 %v4646_v4  ;;  %3128 = vmatprep.subr.mxu0 %v5823_v39 }
 0xea4   :  { %v2834_v44 = vpop.f32.mrf.mxu0  ;;  %v2905_v49 = vpop.f32.mrf.mxu1 }
 0xea5   :  { %v2911_v2 = vadd.f32 %v3662_v6, %v2834_v44  ;;  %v2928_v62 = vadd.f32 %v6206_v61, %v2905_v49  ;;  %v3312_v49 = vld [vmem:[%s6436_s11 + $0x58] sm:$0xff] }
 0xea6   :  { %v2836_v53 = vpop.f32.mrf.mxu0  ;;  %v4283_v54 = vpop.f32.mrf.mxu1 }
 0xea7   :  { %v3663_v55 = vmul.f32 -1.442695, %v2911_v2  ;;  %v2921_v56 = vadd.f32 %v2919_v52, %v2836_v53  ;;  %v3311_v52 = vld [vmem:[%s6436_s11 + $0x50] sm:$0xff]  ;;  %v3308_v53 = vld [vmem:[%s6436_s11 + $0x38] sm:$0xff] }
 0xea8   :  { %v3307_v54 = vld [vmem:[%s6436_s11 + $0x30] sm:$0xff] }
 0xea9   :  { %4556 = vpow2.f32 %v3663_v55  ;;  %v3664_v57 = vmul.f32 -1.442695, %v2921_v56  ;;  %v3306_v55 = vld [vmem:[%s6436_s11 + $0x28] sm:$0xff]  ;;  %v3305_v56 = vld [vmem:[%s6436_s11 + $0x20] sm:$0xff] }
 0xeab   :  { %4558 = vpow2.f32 %v3664_v57  ;;  %v3304_v57 = vld [vmem:[%s6436_s11 + $0x18] sm:$0xff] }
 0xeb6   :  { %v4557_v58 = vpop.eup %4556 }
 0xeb7   :  { %v2915_v59 = vadd.f32 1.0, %v4557_v58  ;;  %v3303_v58 = vld [vmem:[%s6436_s11 + $0x10] sm:$0xff] }
 0xeb8   :  { %v4559_v0 = vpop.eup %4558 }
 0xeb9   :  { %4560 = vrcp.f32 %v2915_v59  ;;  %v2925_v39 = vadd.f32 1.0, %v4559_v0  ;;  %v3302_v59 = vld [vmem:[%s6436_s11 + $0x8] sm:$0xff]  ;;  %v3301_v0 = vld [vmem:[%s6436_s11] sm:$0xff] }
 0xebb   :  { %4562 = vrcp.f32 %v2925_v39  ;;  %v3475_v39 = vld [vmem:[%s6438_s13 + $0x38] sm:$0xff] }
 0xec6   :  { %v4561_v63 = vpop.eup %4560 }
 0xec7   :  { %v2929_v23 = vmul.f32 %v4561_v63, %v2928_v62  ;;  %v3473_v62 = vld [vmem:[%s6438_s13 + $0x28] sm:$0xff]  ;;  %v3472_v63 = vld [vmem:[%s6438_s13 + $0x20] sm:$0xff] }
 0xec8   :  { %v4563_v45 = vpop.eup %4562 }
 0xec9   :  { %v2932_v26 = vadd.f32 %v2930_v60, %v2929_v23  ;;  %v2936_v47 = vsub.f32 1.0, %v4563_v45  ;;  %v3474_v60 = vld [vmem:[%s6438_s13 + $0x30] sm:$0xff] }
 0xeca   :  { %v3674_v23 = vld [vmem:[%s6430_s5 + $0x36] sm:$0x3f] }
 0xecb   :  { %4564 = vtanh.f32 %v2932_v26  ;;  %v2937_v51 = vmul.f32 %v3665_v48, %v2936_v47  ;;  %v3271_v48 = vrot.slane %v3674_v23, 2 }
 0xed8   :  { %v4565_v50 = vpop.eup %4564 }
 0xed9   :  { %v2938_v6 = vsub.f32 %v4565_v50, %v6143_v46 }
 0xedb   :  { %v2939_v44 = vmul.f32 %v2938_v6, %v2937_v51 }
 0xedd   :  { %v6214_v2 = vadd.f32 %v2939_v44, %v6143_v46  ;;  %v1489_v46 = vadd.f32 %v5559_v21, %v5249_v40  ;;  %v3310_v40 = vld [vmem:[%s6436_s11 + $0x48] sm:$0xff]  ;;  %v3309_v21 = vld [vmem:[%s6436_s11 + $0x40] sm:$0xff] }
 0xedf   :  { %3666 = vmatmul.mubr.msk.f32.vlgmr.msra.gmra.mxu0 %vm1534_vm2, %v6214_v2  ;;  %4309 = vmatmul.mubr.msk.f32.vlgmr.msra.gmra.mxu1 %vm1534_vm2, %v6214_v2 }
 0xee0   :  { %4312 = vmatpush3.msra.mxu1 %v5851_v29  ;;  %3129 = vmatpush1.msra.mxu0 %v5845_v28  ;;  %v3668_v28 = vld [vmem:[%s6430_s5 + $0x30] sm:$0x3f] }
 0xee1   :  { %4313 = vmatprep.subr.mxu1 %v4646_v4  ;;  %3130 = vmatprep.subr.mxu0 %v5857_v30 }
 0xee2   :  { %4314 = vmatpush3.msra.mxu1 %v5870_v32  ;;  %3131 = vmatpush1.msra.mxu0 %v5864_v31  ;;  %v3095_v32 = vrot.slane %v3668_v28, 2 }
 0xee3   :  { %4315 = vmatprep.subr.mxu1 %v4646_v4  ;;  %3132 = vmatprep.subr.mxu0 %v5876_v33 }
 0xee4   :  { %4316 = vmatpush3.msra.mxu1 %v5889_v18  ;;  %3133 = vmatpush1.msra.mxu0 %v5883_v12 }
 0xee5   :  { %4317 = vmatprep.subr.mxu1 %v4646_v4  ;;  %3134 = vmatprep.subr.mxu0 %v5895_v20 }
 0xee6   :  { %4318 = vmatpush3.msra.mxu1 %v5908_v25  ;;  %3135 = vmatpush1.msra.mxu0 %v5902_v24 }
 0xee7   :  { %4319 = vmatprep.subr.mxu1 %v4646_v4  ;;  %3136 = vmatprep.subr.mxu0 %v5914_v35 }
 0xee8   :  { %4320 = vmatpush3.msra.mxu1 %v5927_v37  ;;  %3137 = vmatpush1.msra.mxu0 %v5921_v36 }
 0xee9   :  { %4321 = vmatprep.subr.mxu1 %v4646_v4  ;;  %3138 = vmatprep.subr.mxu0 %v5933_v38  ;;  %v3106_v38 = vrot.slane %v3668_v28, 4 }
 0xeea   :  { %4322 = vmatpush3.msra.mxu1 %v5946_v1  ;;  %3139 = vmatpush1.msra.mxu0 %v5940_v5 }
 0xeeb   :  { %4323 = vmatprep.subr.mxu1 %v4646_v4  ;;  %3140 = vmatprep.subr.mxu0 %v5952_v7 }
 0xeec   :  { %4324 = vmatpush3.msra.mxu1 %v5965_v9  ;;  %3141 = vmatpush1.msra.mxu0 %v5959_v8 }
 0xeed   :  { %4325 = vmatprep.subr.mxu1 %v4646_v4  ;;  %3142 = vmatprep.subr.mxu0 %v5971_v10 }
 0xeee   :  { %4326 = vmatpush3.msra.mxu1 %v5984_v16  ;;  %3143 = vmatpush1.msra.mxu0 %v5978_v11  ;;  %v3671_v11 = vld [vmem:[%s6431_s6 + $0x10] sm:$0x3] }
 0xeef   :  { %4327 = vmatprep.subr.mxu1 %v4646_v4  ;;  %3144 = vmatprep.subr.mxu0 %v5990_v13 }
 0xef0   :  { %4328 = vmatpush3.msra.mxu1 %v6003_v22  ;;  %3145 = vmatpush1.msra.mxu0 %v5997_v14 }
 0xef1   :  { %4329 = vmatprep.subr.mxu1 %v4646_v4  ;;  %3146 = vmatprep.subr.mxu0 %v6009_v3 }
 0xef2   :  { %4330 = vmatpush3.msra.mxu1 %v6022_v15  ;;  %3147 = vmatpush1.msra.mxu0 %v6016_v17  ;;  %v3300_v17 = vld [vmem:[%s6435_s10 + $0x38] sm:$0xff]  ;;  %v3299_v15 = vld [vmem:[%s6435_s10 + $0x30] sm:$0xff] }
 0xef3   :  { %4331 = vmatprep.subr.mxu1 %v4646_v4  ;;  %3148 = vmatprep.subr.mxu0 %v6028_v19  ;;  %v3298_v19 = vld [vmem:[%s6435_s10 + $0x28] sm:$0xff] }
 0xef4   :  { %4332 = vmatpush3.msra.mxu1 %v6041_v41  ;;  %3149 = vmatpush1.msra.mxu0 %v6035_v34  ;;  %v3297_v34 = vld [vmem:[%s6435_s10 + $0x20] sm:$0xff]  ;;  %v3296_v41 = vld [vmem:[%s6435_s10 + $0x18] sm:$0xff] }
 0xef5   :  { %4333 = vmatprep.subr.mxu1 %v4646_v4  ;;  %3150 = vmatprep.subr.mxu0 %v6047_v42  ;;  %v3295_v42 = vld [vmem:[%s6435_s10 + $0x10] sm:$0xff] }
 0xef6   :  { %4334 = vmatpush3.msra.mxu1 %v6127_v27  ;;  %3151 = vmatpush1.msra.mxu0 %v6054_v43  ;;  %v3294_v43 = vld [vmem:[%s6435_s10 + $0x8] sm:$0xff]  ;;  %v3293_v27 = vld [vmem:[%s6435_s10] sm:$0xff] }
 0xef7   :  { %3184 = vmatprep.mubr.f32.mxu0 %v4646_v4  ;;  %4335 = vmatprep.mubr.msk.f32.mxu1 %vm4647_vm0, %v4646_v4 }
 0xef8   :  { %4365 = vmatprep.subr.mxu1 %v4646_v4  ;;  %4338 = vmatprep.subr.mxu0 %v4646_v4 }
 0xf9f   :  { %v3010_v29 = vpop.f32.mrf.mxu0  ;;  %v3081_v30 = vpop.f32.mrf.mxu1 }
 0xfa0   :  { %v3087_v31 = vadd.f32 %v3668_v28, %v3010_v29  ;;  %v3104_v5 = vadd.f32 %v6206_v61, %v3081_v30 }
 0xfa1   :  { %v3012_v33 = vpop.f32.mrf.mxu0  ;;  %v4310_v12 = vpop.f32.mrf.mxu1 }
 0xfa2   :  { %v3669_v18 = vmul.f32 -1.442695, %v3087_v31  ;;  %v3097_v20 = vadd.f32 %v3095_v32, %v3012_v33  ;;  %v3282_v12 = vrot.slane %v3674_v23, 4 }
 0xfa4   :  { %4566 = vpow2.f32 %v3669_v18  ;;  %v3670_v24 = vmul.f32 -1.442695, %v3097_v20 }
 0xfa6   :  { %4568 = vpow2.f32 %v3670_v24 }
 0xfb1   :  { %v4567_v25 = vpop.eup %4566 }
 0xfb2   :  { %v3091_v35 = vadd.f32 1.0, %v4567_v25 }
 0xfb3   :  { %v4569_v36 = vpop.eup %4568 }
 0xfb4   :  { %4570 = vrcp.f32 %v3091_v35  ;;  %v3101_v37 = vadd.f32 1.0, %v4569_v36 }
 0xfb6   :  { %4572 = vrcp.f32 %v3101_v37  ;;  %v3677_v37 = vld [vmem:[%s6431_s6 + $0x12] sm:$0x3] }
 0xfc1   :  { %v4571_v1 = vpop.eup %4570 }
 0xfc2   :  { %v3105_v7 = vmul.f32 %v4571_v1, %v3104_v5 }
 0xfc3   :  { %v4573_v9 = vpop.eup %4572 }
 0xfc4   :  { %v3108_v8 = vadd.f32 %v3106_v38, %v3105_v7  ;;  %v3112_v10 = vsub.f32 1.0, %v4573_v9  ;;  %v3470_v9 = vld [vmem:[%s6438_s13 + $0x10] sm:$0xff] }
 0xfc6   :  { %4574 = vtanh.f32 %v3108_v8  ;;  %v3113_v13 = vmul.f32 %v3671_v11, %v3112_v10  ;;  %v3469_v10 = vld [vmem:[%s6438_s13 + $0x8] sm:$0xff]  ;;  %v3468_v11 = vld [vmem:[%s6438_s13] sm:$0xff] }
 0xfd3   :  { %v4575_v16 = vpop.eup %4574 }
 0xfd4   :  { %v3114_v14 = vsub.f32 %v4575_v16, %v6214_v2 }
 0xfd6   :  { %v3115_v22 = vmul.f32 %v3114_v14, %v3113_v13  ;;  %v3680_v13 = vld [vmem:[%s6437_s12] ss:$0 sm:$0xff] }
 0xfd8   :  { %v6280_v3 = vadd.f32 %v3115_v22, %v6214_v2 }
 0xfda   :  { %3672 = vmatmul.mubr.msk.f32.vlgmr.msra.gmra.mxu0 %vm1534_vm2, %v6280_v3  ;;  %4336 = vmatmul.mubr.msk.f32.vlgmr.msra.gmra.mxu1 %vm1534_vm2, %v6280_v3 }
 0xfdb   :  { %4366 = vmatpush3.msra.mxu1 %v3300_v17  ;;  %4381 = vmatprep.mubr.msk.f32.mxu1 %vm4647_vm0, %v4646_v4 }
 0xfdc   :  { %4367 = vmatprep.subr.mxu1 %v4646_v4  ;;  %4362 = vmatprep.mubr.msk.f32.mxu0 %vm4647_vm0, %v4646_v4 }
 0xfdd   :  { %4368 = vmatpush3.msra.mxu1 %v3299_v15  ;;  %4339 = vmatpush3.msra.mxu0 %v3312_v49  ;;  %v3681_v15 = vld [vmem:[%s6439_s14] ss:$0 sm:$0xff] }
 0xfde   :  { %4369 = vmatprep.subr.mxu1 %v4646_v4  ;;  %4340 = vmatprep.subr.mxu0 %v4646_v4 }
 0xfdf   :  { %4370 = vmatpush3.msra.mxu1 %v3298_v19  ;;  %4341 = vmatpush3.msra.mxu0 %v3311_v52 }
 0xfe0   :  { %4371 = vmatprep.subr.mxu1 %v4646_v4  ;;  %4342 = vmatprep.subr.mxu0 %v4646_v4 }
 0xfe1   :  { %4372 = vmatpush3.msra.mxu1 %v3297_v34  ;;  %4343 = vmatpush3.msra.mxu0 %v3310_v40 }
 0xfe2   :  { %4373 = vmatprep.subr.mxu1 %v4646_v4  ;;  %4344 = vmatprep.subr.mxu0 %v4646_v4 }
 0xfe3   :  { %4374 = vmatpush3.msra.mxu1 %v3296_v41  ;;  %4345 = vmatpush3.msra.mxu0 %v3309_v21 }
 0xfe4   :  { %4375 = vmatprep.subr.mxu1 %v4646_v4  ;;  %4346 = vmatprep.subr.mxu0 %v4646_v4 }
 0xfe5   :  { %4376 = vmatpush3.msra.mxu1 %v3295_v42  ;;  %4347 = vmatpush3.msra.mxu0 %v3308_v53 }
 0xfe6   :  { %4377 = vmatprep.subr.mxu1 %v4646_v4  ;;  %4348 = vmatprep.subr.mxu0 %v4646_v4 }
 0xfe7   :  { %4378 = vmatpush3.msra.mxu1 %v3294_v43  ;;  %4349 = vmatpush3.msra.mxu0 %v3307_v54 }
 0xfe8   :  { %4379 = vmatprep.subr.mxu1 %v4646_v4  ;;  %4350 = vmatprep.subr.mxu0 %v4646_v4 }
 0xfe9   :  { %4380 = vmatpush3.msra.mxu1 %v3293_v27  ;;  %4351 = vmatpush3.msra.mxu0 %v3306_v55 }
 0xfea   :  { %4382 = vmatmul.mubr.msk.f32.vlgmr.msra.gmra.mxu1 %vm83_vm1, %v1489_v46  ;;  %4384 = vmatprep.subr.mxu1 %v4646_v4 }
 0xfeb   :  { %4400 = vmatprep.mubr.msk.f32.mxu1 %vm4647_vm0, %v4646_v4  ;;  %4352 = vmatprep.subr.mxu0 %v4646_v4 }
 0xfec   :  { %4353 = vmatpush3.msra.mxu0 %v3305_v56  ;;  %4385 = vmatpush3.msra.mxu1 %v3475_v39 }
 0xfed   :  { %4354 = vmatprep.subr.mxu0 %v4646_v4  ;;  %4386 = vmatprep.subr.mxu1 %v4646_v4 }
 0xfee   :  { %4355 = vmatpush3.msra.mxu0 %v3304_v57  ;;  %4387 = vmatpush3.msra.mxu1 %v3474_v60 }
 0xfef   :  { %4356 = vmatprep.subr.mxu0 %v4646_v4  ;;  %4388 = vmatprep.subr.mxu1 %v4646_v4 }
 0xff0   :  { %4357 = vmatpush3.msra.mxu0 %v3303_v58  ;;  %4389 = vmatpush3.msra.mxu1 %v3473_v62 }
 0xff1   :  { %4358 = vmatprep.subr.mxu0 %v4646_v4  ;;  %4390 = vmatprep.subr.mxu1 %v4646_v4 }
 0xff2   :  { %4359 = vmatpush3.msra.mxu0 %v3302_v59  ;;  %4391 = vmatpush3.msra.mxu1 %v3472_v63 }
 0xff3   :  { %4360 = vmatprep.subr.mxu0 %v4646_v4  ;;  %4392 = vmatprep.subr.mxu1 %v4646_v4 }
 0xff4   :  { %4361 = vmatpush3.msra.mxu0 %v3301_v0 }
0x109a   :  { %v3186_v26 = vpop.f32.mrf.mxu0  ;;  %v3257_v45 = vpop.f32.mrf.mxu1 }
0x109b   :  { %v3263_v47 = vadd.f32 %v3674_v23, %v3186_v26  ;;  %v3280_v18 = vadd.f32 %v6206_v61, %v3257_v45  ;;  %v3471_v61 = vld [vmem:[%s6438_s13 + $0x18] sm:$0xff]  ;;  %s3564_s13 = sshll.u32 %s4648_s24, 4  ;;  %s3565_s13 = int_to_ptr.vmem [resolvable:$true] %s3564_s13 }
0x109c   :  { %v3188_v50 = vpop.f32.mrf.mxu0  ;;  %v4337_v51 = vpop.f32.mrf.mxu1  ;;  %4393 = vmatpush3.msra.mxu1 %v3471_v61  ;;  %s4624_s25 = scalar_lea.vmem %s3565_s13, 32  ;;  %p4629_p1 = scmp.lt.s32.totalorder %s3565_s13, %s3565_s13 }
0x109d   :  { %v3675_v6 = vmul.f32 -1.442695, %v3263_v47  ;;  %v3273_v44 = vadd.f32 %v3271_v48, %v3188_v50  ;;  %4394 = vmatprep.subr.mxu1 %v4646_v4  ;;  %p4625_p0 = scmp.ne.s32.totalorder %s3565_s13, %s4624_s25  ;;  %p4630_p2 = scmp.lt.s32.totalorder %s4624_s25, %s4624_s25 }
0x109e   :  { %4395 = vmatpush3.msra.mxu1 %v3470_v9 }
0x109f   :  { %4576 = vpow2.f32 %v3675_v6  ;;  %v3676_v2 = vmul.f32 -1.442695, %v3273_v44  ;;  %4396 = vmatprep.subr.mxu1 %v4646_v4  ;;  %p4631_p3 = por %p4630_p2, %p4629_p1 }
0x10a0   :  { %4397 = vmatpush3.msra.mxu1 %v3469_v10 }
0x10a1   :  { %4578 = vpow2.f32 %v3676_v2  ;;  %4398 = vmatprep.subr.mxu1 %v4646_v4  ;;  %p4632_p4 = pnand %p4631_p3, %p4625_p0 }
0x10a2   :  { %4399 = vmatpush3.msra.mxu1 %v3468_v11 }
0x10aa   :  { %v3455_v28 = vpop.f32.mrf.mxu1 }
0x10ac   :  { %v4577_v29 = vpop.eup %4576  ;;  %v4383_v30 = vpop.f32.mrf.mxu1 }
0x10ad   :  { %v3267_v31 = vadd.f32 1.0, %v4577_v29 }
0x10ae   :  { %v4579_v32 = vpop.eup %4578 }
0x10af   :  { %4580 = vrcp.f32 %v3267_v31  ;;  %v3277_v33 = vadd.f32 1.0, %v4579_v32 }
0x10b1   :  { %4582 = vrcp.f32 %v3277_v33 }
0x10bc   :  { %v4581_v20 = vpop.eup %4580 }
0x10bd   :  { %v3281_v24 = vmul.f32 %v4581_v20, %v3280_v18 }
0x10be   :  { %v4583_v35 = vpop.eup %4582 }
0x10bf   :  { %v3284_v25 = vadd.f32 %v3282_v12, %v3281_v24  ;;  %v3288_v36 = vsub.f32 1.0, %v4583_v35 }
0x10c1   :  { %4584 = vtanh.f32 %v3284_v25  ;;  %v3289_v5 = vmul.f32 %v3677_v37, %v3288_v36 }
0x10ce   :  { %v4585_v38 = vpop.eup %4584 }
0x10cf   :  { %v3290_v1 = vsub.f32 %v4585_v38, %v6280_v3 }
0x10d1   :  { %v3291_v7 = vmul.f32 %v3290_v1, %v3289_v5 }
0x10d3   :  { %v3292_v8 = vadd.f32 %v3291_v7, %v6280_v3 }
0x10d5   :  { %4363 = vmatmul.mubr.msk.f32.vlgmr.msra.gmra.mxu0 %vm1534_vm2, %v3292_v8 }
0x1195   :  { %v3382_v16 = vpop.f32.mrf.mxu0 }
0x1196   :  { %v3456_v14 = vadd.f32 %v3455_v28, %v3382_v16 }
0x1197   :  { %v4364_v22 = vpop.f32.mrf.mxu0 }
0x1198   :  { %v3466_v3 = vadd.f32 %v3680_v13, %v3456_v14 }
0x119a   :  { %v3467_v17 = vmax.f32 %v3466_v3, 0.0 }
0x119c   :  { %4401 = vmatmul.mubr.msk.f32.vlgmr.msra.gmra.mxu1 %vm83_vm1, %v3467_v17 }
0x125c   :  { %v3552_v19 = vpop.f32.mrf.mxu1 }
0x125d   :  { %v3553_v4 = vadd.f32 %v3681_v15, %v3552_v19 }
0x125e   :  { %v4402_v34 = vpop.f32.mrf.mxu1 }
0x125f   :  { %3557 = vst.msk [vmem:[#allocation2] sm:$0x3] %vm3556_vm3, %v3553_v4 }
0x1260   :  { %4635 = shalt.err (!%p4632_p4)
}
0x1261   :  { %3567 = dma.vmem_to_hbm [thread:$0]  %s3565_s13, 32, %s6440_s15, [#allocation3]  }
0x1262   :  { %4644 = dma.done.wait [#allocation3], 32  }
0x1263   :  { %4645 = vsyncadd [#allocation3], 4294967264 }
0x1264   :  { %3571 = vsyncpa [#allocation3], 1 }

</bundles_post_ra>
